<compile_context>
chip_gen: v6e
topology: v6e:2x2x1
jax: 0.10.0
libtpu: 0.0.40
codegen_flags: <defaults>
</compile_context>

<pallas_src>
import jax
import jax.numpy as jnp
from jax import lax
from jax.experimental import pallas as pl
from jax.experimental.pallas import tpu as pltpu


def _round_up(x, m):
    return (x + m - 1) // m * m


def _choose_batch_block(B):
    """Pick (Bb, Bp): Bb <= 64, multiple of 8, >= 2 blocks whenever B permits (v7x 2 TCs)."""
    b8 = _round_up(B, 8)
    if b8 >= 128:
        Bb = 64
    elif b8 >= 16:
        Bb = _round_up(b8 // 2, 8)
    else:
        Bb = b8
    Bp = _round_up(B, Bb)
    return Bb, Bp


# ----------------------------- Pallas kernel -------------------------------
def _make_fused_lstm_kernel(depth, T, Bb, Hp):
    """Fused multi-layer LSTM over the full sequence for one batch block."""

    def kernel(lens_ref, x_ref, *args):
        # args = depth * (wih_ref, whh_ref, b_ref), hlast_ref, seq_a, seq_b, gx_scr
        w_refs = [args[3 * l: 3 * l + 3] for l in range(depth)]
        hlast_ref = args[3 * depth]
        seq_bufs = (args[3 * depth + 1], args[3 * depth + 2])   # (T*Bb, Hp) f32 ping-pong
        gx_scr = args[3 * depth + 3]                            # (T*Bb, 4*Hp) f32

        # last valid timestep per row; lengths==0 clamps to t=0 (valid PackedSequence
        # inputs never hit this; documented divergence from the wrap-around reference).
        t_last = jnp.maximum(lens_ref[...] - 1, 0)              # (Bb, 1) int32

        unroll = min(T, 8)

        for l in range(depth):
            wih_ref, whh_ref, b_ref = w_refs[l]
            is_last = (l == depth - 1)
            out_buf = seq_bufs[l % 2]

            # ---- hoisted input projection: ONE big bf16 MXU matmul over all timesteps ----
            if l == 0:
                x_all = x_ref[0]                                 # (T*Bb, Dp0) bf16
            else:
                x_all = seq_bufs[(l - 1) % 2][...].astype(jnp.bfloat16)
            gx_scr[...] = (
                jnp.dot(x_all, wih_ref[...], preferred_element_type=jnp.float32)
                + b_ref[...]
            )

            # ---- recurrence: h/c (and h_last for the final layer) live in vregs ----
            def step(t, carry, out_buf=out_buf, whh_ref=whh_ref, is_last=is_last):
                if is_last:
                    h_prev, c_prev, h_last = carry
                else:
                    h_prev, c_prev = carry
                off = pl.multiple_of(t * Bb, Bb)
                gates = gx_scr[pl.ds(off, Bb), :] + jnp.dot(
                    h_prev.astype(jnp.bfloat16), whh_ref[...],
                    preferred_element_type=jnp.float32)
                i_g = jax.nn.sigmoid(gates[:, 0 * Hp:1 * Hp])
                f_g = jax.nn.sigmoid(gates[:, 1 * Hp:2 * Hp])
                g_g = jnp.tanh(gates[:, 2 * Hp:3 * Hp])
                o_g = jax.nn.sigmoid(gates[:, 3 * Hp:4 * Hp])
                c_new = f_g * c_prev + i_g * g_g
                h_new = o_g * jnp.tanh(c_new)
                if is_last:
                    # select the hidden state at t == len-1; no hidden-seq store needed
                    h_last = jnp.where(t == t_last, h_new, h_last)
                    return (h_new, c_new, h_last)
                out_buf[pl.ds(off, Bb), :] = h_new
                return (h_new, c_new)

            zeros = jnp.zeros((Bb, Hp), jnp.float32)
            if is_last:
                carry = lax.fori_loop(0, T, step, (zeros, zeros, zeros), unroll=unroll)
                hlast_ref[...] = carry[2]
            else:
                lax.fori_loop(0, T, step, (zeros, zeros), unroll=unroll)

    return kernel


def _vmem_bytes_estimate(T, Bb, Hp, Dp0, padded_params):
    est = 2 * (T * Bb * Dp0 * 2)          # x block (bf16), double-buffered
    est += 2 * (Bb * 1 * 4)               # lengths block
    est += 2 * (Bb * Hp * 4)              # output block
    for (wih_t, whh_t, b) in padded_params:   # weights double-buffered by the pipeline
        est += 2 * (wih_t.size * 2 + whh_t.size * 2 + b.size * 4)
    est += 2 * (T * Bb * Hp * 4)          # hidden-seq ping/pong scratch
    est += T * Bb * 4 * Hp * 4            # hoisted gate-projection scratch
    return est


def _fused_lstm_pallas(x_blk, lens_pad, padded_params, T, Bp, Bb, Hp, Dp0):
    depth = len(padded_params)
    nblk = Bp // Bb
    grid = (nblk,)

    in_specs = [
        pl.BlockSpec((Bb, 1), lambda i: (i, 0)),              # lengths (int32)
        pl.BlockSpec((1, T * Bb, Dp0), lambda i: (i, 0, 0)),  # pre-blocked x (bf16)
    ]
    flat_w = []
    for (wih_t, whh_t, b) in padded_params:
        in_specs.append(pl.BlockSpec(wih_t.shape, lambda i: (0, 0)))
        in_specs.append(pl.BlockSpec(whh_t.shape, lambda i: (0, 0)))
        in_specs.append(pl.BlockSpec(b.shape, lambda i: (0, 0)))
        flat_w += [wih_t, whh_t, b]

    out_spec = pl.BlockSpec((Bb, Hp), lambda i: (i, 0))       # lane-dense (Hp multiple of 128)

    vmem_limit = min(
        max(32 * 1024 * 1024,
            int(1.5 * _vmem_bytes_estimate(T, Bb, Hp, Dp0, padded_params))),
        64 * 1024 * 1024)

    kernel = _make_fused_lstm_kernel(depth, T, Bb, Hp)
    hlast = pl.pallas_call(
        kernel,
        out_shape=jax.ShapeDtypeStruct((Bp, Hp), jnp.float32),
        grid_spec=pltpu.PrefetchScalarGridSpec(
            num_scalar_prefetch=0,
            grid=grid,
            in_specs=in_specs,
            out_specs=out_spec,
            scratch_shapes=[
                pltpu.VMEM((T * Bb, Hp), jnp.float32),        # hidden-seq ping
                pltpu.VMEM((T * Bb, Hp), jnp.float32),        # hidden-seq pong
                pltpu.VMEM((T * Bb, 4 * Hp), jnp.float32),    # hoisted input-gate projections
            ],
        ),
        compiler_params=pltpu.CompilerParams(
            dimension_semantics=("parallel",),                # shard batch blocks across TCs
            vmem_limit_bytes=vmem_limit,
        ),
    )(lens_pad, x_blk, *flat_w)
    return hlast


# ------------------------- parameter padding (lane-dense, bf16) -------------
def _pad_gate_matrix(w, H, Hp, d_in, dp_in):
    """w: (4H, d_in) PyTorch layout -> (4Hp, dp_in), zero padded per gate block."""
    out = jnp.zeros((4 * Hp, dp_in), jnp.float32)
    for g in range(4):
        out = out.at[g * Hp:g * Hp + H, :d_in].set(w[g * H:(g + 1) * H, :])
    return out


def _pad_gate_vector(b, H, Hp):
    out = jnp.zeros((4 * Hp,), jnp.float32)
    for g in range(4):
        out = out.at[g * Hp:g * Hp + H].set(b[g * H:(g + 1) * H])
    return out


def _prepare_params(params, input_dim, H, Hp, Dp0):
    padded = []
    for l, (w_ih, w_hh, b_ih, b_hh) in enumerate(params):
        d_in = input_dim if l == 0 else H
        dp_in = Dp0 if l == 0 else Hp
        wih_t = _pad_gate_matrix(w_ih, H, Hp, d_in, dp_in).T.astype(jnp.bfloat16)  # (dp_in,4Hp)
        whh_t = _pad_gate_matrix(w_hh, H, Hp, H, Hp).T.astype(jnp.bfloat16)        # (Hp, 4Hp)
        b = _pad_gate_vector(b_ih + b_hh, H, Hp).reshape(1, -1)                    # (1, 4Hp) f32
        padded.append((wih_t, whh_t, b))
    return padded


# ------------------------------- wrapper ------------------------------------
def observe_embedding_lstm_forward(x, lengths, params):
    """x: (B, T, input_dim) batch_first; lengths: (B,) int; params: PyTorch-layout tuples."""
    B, T, input_dim = x.shape
    H = params[0][1].shape[1]                 # w_hh: (4H, H)
    Hp = _round_up(H, 128)                    # lane-dense hidden (zero-padded lanes stay 0)
    Dp0 = _round_up(input_dim, 8)             # NO 128-padding of input_dim
    Bb, Bp = _choose_batch_block(B)
    nblk = Bp // Bb

    # time-major, zero-pad, pre-block into (nblk, T*Bb, Dp0) bf16 (halves x HBM traffic and
    # removes any in-kernel reshape/relayout)
    x_tm = jnp.transpose(x.astype(jnp.bfloat16), (1, 0, 2))            # (T, B, D)
    x_pad = jnp.zeros((T, Bp, Dp0), jnp.bfloat16).at[:, :B, :input_dim].set(x_tm)
    x_blk = (x_pad.reshape(T, nblk, Bb, Dp0)
                  .transpose(1, 0, 2, 3)
                  .reshape(nblk, T * Bb, Dp0))

    lens_pad = jnp.ones((Bp, 1), jnp.int32).at[:B, 0].set(lengths.astype(jnp.int32))

    padded_params = _prepare_params(params, input_dim, H, Hp, Dp0)
    hlast = _fused_lstm_pallas(x_blk, lens_pad, padded_params, T, Bp, Bb, Hp, Dp0)
    return hlast[:B, :H]                                              # (B, output_dim)


# --------------------- deterministic parameter init -------------------------
def init_lstm_params(key, input_dim, output_dim, depth):
    # TODO(synk): `weights_init` from infcomp is not given; use the standard
    # uniform(-1/sqrt(H), 1/sqrt(H)) nn.LSTM init deterministically instead.
    params = []
    bound = 1.0 / float(output_dim) ** 0.5
    for layer in range(depth):
        in_dim = input_dim if layer == 0 else output_dim
        key, k1, k2, k3, k4 = jax.random.split(key, 5)
        w_ih = jax.random.uniform(k1, (4 * output_dim, in_dim), jnp.float32, -bound, bound)
        w_hh = jax.random.uniform(k2, (4 * output_dim, output_dim), jnp.float32, -bound, bound)
        b_ih = jax.random.uniform(k3, (4 * output_dim,), jnp.float32, -bound, bound)
        b_hh = jax.random.uniform(k4, (4 * output_dim,), jnp.float32, -bound, bound)
        params.append((w_ih, w_hh, b_ih, b_hh))
    return params, key


# ----------------------------- pure-JAX reference ----------------------------
def _lstm_ref(x, lengths, params):
    B, T, _ = x.shape
    inp = x.astype(jnp.float32)
    for (w_ih, w_hh, b_ih, b_hh) in params:
        H = w_hh.shape[1]
        wih_t, whh_t, b = w_ih.T, w_hh.T, (b_ih + b_hh)[None, :]

        def step(carry, x_t, wih_t=wih_t, whh_t=whh_t, b=b, H=H):
            h, c = carry
            gates = x_t @ wih_t + h @ whh_t + b
            i = jax.nn.sigmoid(gates[:, 0 * H:1 * H])
            f = jax.nn.sigmoid(gates[:, 1 * H:2 * H])
            g = jnp.tanh(gates[:, 2 * H:3 * H])
            o = jax.nn.sigmoid(gates[:, 3 * H:4 * H])
            c = f * c + i * g
            h = o * jnp.tanh(c)
            return (h, c), h

        (_, _), hs = lax.scan(
            step,
            (jnp.zeros((B, H), jnp.float32), jnp.zeros((B, H), jnp.float32)),
            jnp.transpose(inp, (1, 0, 2)))
        inp = jnp.transpose(hs, (1, 0, 2))
    return inp[jnp.arange(B), lengths - 1]


# --------------------------------- main --------------------------------------
if __name__ == "__main__":
    B, T, INPUT_DIM, OUTPUT_DIM, DEPTH = 2, 8, 16, 32, 2

    key = jax.random.PRNGKey(0)
    params, key = init_lstm_params(key, INPUT_DIM, OUTPUT_DIM, DEPTH)
    key, kx = jax.random.split(key)
    x = jax.random.normal(kx, (B, T, INPUT_DIM), jnp.float32)
    lengths = jnp.array([T, 5], dtype=jnp.int32)   # packed-sequence style lengths

    out = observe_embedding_lstm_forward(x, lengths, params)
    out = jax.block_until_ready(out)

    ref = _lstm_ref(x, lengths, params)
    assert out.shape == (B, OUTPUT_DIM), out.shape
    err = float(jnp.max(jnp.abs(out - ref)))
    # matmul operands are bf16 on the MXU (f32 accumulation) -> compare against the pure-f32
    # reference at bf16-level tolerance.
    assert jnp.allclose(out, ref, rtol=2e-2, atol=2e-2), err

    print("KERNEL_OK")
</pallas_src>

<mosaic_0001>
module attributes {stable_mosaic.version = 11 : i64} {
  func.func @kernel(%arg0: i32, %arg1: memref<8x1xi32, #tpu.memory_space<vmem>>, %arg2: memref<1x64x16xbf16, #tpu.memory_space<vmem>>, %arg3: memref<16x512xbf16, #tpu.memory_space<vmem>>, %arg4: memref<128x512xbf16, #tpu.memory_space<vmem>>, %arg5: memref<1x512xf32, #tpu.memory_space<vmem>>, %arg6: memref<128x512xbf16, #tpu.memory_space<vmem>>, %arg7: memref<128x512xbf16, #tpu.memory_space<vmem>>, %arg8: memref<1x512xf32, #tpu.memory_space<vmem>>, %arg9: memref<8x128xf32, #tpu.memory_space<vmem>>, %arg10: memref<64x128xf32, #tpu.memory_space<vmem>>, %arg11: memref<64x128xf32, #tpu.memory_space<vmem>>, %arg12: memref<64x512xf32, #tpu.memory_space<vmem>>) attributes {dimension_semantics = [#tpu.dimension_semantics<parallel>], iteration_bounds = array<i64: 1>, scalar_prefetch = 0 : i64, scratch_operands = 3 : i64, tpu.core_type = #tpu.core_type<tc>, window_params = [{transform_indices = @transform_0, window_bounds = array<i64: 8, 1>}, {transform_indices = @transform_1, window_bounds = array<i64: 1, 64, 16>}, {pipeline_mode = #tpu.pipeline_mode<synchronous>, transform_indices = @transform_2, window_bounds = array<i64: 16, 512>}, {pipeline_mode = #tpu.pipeline_mode<synchronous>, transform_indices = @transform_3, window_bounds = array<i64: 128, 512>}, {pipeline_mode = #tpu.pipeline_mode<synchronous>, transform_indices = @transform_4, window_bounds = array<i64: 1, 512>}, {pipeline_mode = #tpu.pipeline_mode<synchronous>, transform_indices = @transform_5, window_bounds = array<i64: 128, 512>}, {pipeline_mode = #tpu.pipeline_mode<synchronous>, transform_indices = @transform_6, window_bounds = array<i64: 128, 512>}, {pipeline_mode = #tpu.pipeline_mode<synchronous>, transform_indices = @transform_7, window_bounds = array<i64: 1, 512>}, {transform_indices = @transform_8, window_bounds = array<i64: 8, 128>}]} {
    %c0 = arith.constant 0 : index
    %c0_0 = arith.constant 0 : index
    %0 = vector.load %arg1[%c0, %c0_0] : memref<8x1xi32, #tpu.memory_space<vmem>>, vector<8x1xi32>
    %c1_i32 = arith.constant 1 : i32
    %1 = vector.broadcast %c1_i32 : i32 to vector<8x1xi32>
    %2 = arith.subi %0, %1 : vector<8x1xi32>
    %c0_i32 = arith.constant 0 : i32
    %3 = vector.broadcast %c0_i32 : i32 to vector<8x1xi32>
    %4 = arith.maxsi %2, %3 : vector<8x1xi32>
    %c0_1 = arith.constant 0 : index
    %c0_2 = arith.constant 0 : index
    %c0_3 = arith.constant 0 : index
    %5 = vector.load %arg2[%c0_1, %c0_2, %c0_3] : memref<1x64x16xbf16, #tpu.memory_space<vmem>>, vector<1x64x16xbf16>
    %6 = vector.shape_cast %5 : vector<1x64x16xbf16> to vector<64x16xbf16>
    %c0_4 = arith.constant 0 : index
    %c0_5 = arith.constant 0 : index
    %7 = vector.load %arg3[%c0_4, %c0_5] : memref<16x512xbf16, #tpu.memory_space<vmem>>, vector<16x512xbf16>
    %cst = arith.constant dense<0.000000e+00> : vector<64x512xf32>
    %8 = tpu.matmul %6, %7, %cst {dimension_numbers = #tpu.dot_dimension_numbers<[1], [0], [0], [1], [0, 0, 1, 1], [], []>} : vector<64x16xbf16>, vector<16x512xbf16>, vector<64x512xf32> -> vector<64x512xf32>
    %c0_6 = arith.constant 0 : index
    %c0_7 = arith.constant 0 : index
    %9 = vector.load %arg5[%c0_6, %c0_7] : memref<1x512xf32, #tpu.memory_space<vmem>>, vector<1x512xf32>
    %10 = vector.broadcast %9 : vector<1x512xf32> to vector<64x512xf32>
    %11 = arith.addf %8, %10 : vector<64x512xf32>
    %c0_8 = arith.constant 0 : index
    %c0_9 = arith.constant 0 : index
    %12 = vector.load %arg12[%c0_8, %c0_9] : memref<64x512xf32, #tpu.memory_space<vmem>>, vector<64x512xf32>
    tpu.vector_store %arg12[%c0_8, %c0_9], %11 {strides = array<i32>} : memref<64x512xf32, #tpu.memory_space<vmem>>, vector<64x512xf32>,
    %cst_10 = arith.constant 0.000000e+00 : f32
    %13 = vector.broadcast %cst_10 : f32 to vector<8x128xf32>
    %c0_i32_11 = arith.constant 0 : i32
    %c8_i32 = arith.constant 8 : i32
    %14 = arith.muli %c0_i32_11, %c8_i32 : i32
    %15 = tpu.assume_multiple %14, 8 : i32
    %16 = arith.index_cast %15 : i32 to index
    %c0_12 = arith.constant 0 : index
    %17 = vector.load %arg12[%16, %c0_12] : memref<64x512xf32, #tpu.memory_space<vmem>>, vector<8x512xf32>
    %18 = arith.truncf %13 : vector<8x128xf32> to vector<8x128xbf16>
    %c0_13 = arith.constant 0 : index
    %c0_14 = arith.constant 0 : index
    %19 = vector.load %arg4[%c0_13, %c0_14] : memref<128x512xbf16, #tpu.memory_space<vmem>>, vector<128x512xbf16>
    %cst_15 = arith.constant dense<0.000000e+00> : vector<8x512xf32>
    %20 = tpu.matmul %18, %19, %cst_15 {dimension_numbers = #tpu.dot_dimension_numbers<[1], [0], [0], [1], [0, 0, 1, 1], [], []>} : vector<8x128xbf16>, vector<128x512xbf16>, vector<8x512xf32> -> vector<8x512xf32>
    %21 = arith.addf %17, %20 : vector<8x512xf32>
    %22 = vector.extract_strided_slice %21 {offsets = [0, 0], sizes = [8, 128], strides = [1, 1]} : vector<8x512xf32> to vector<8x128xf32>
    %23 = arith.negf %22 : vector<8x128xf32>
    %24 = math.exp %23 : vector<8x128xf32>
    %cst_16 = arith.constant 1.000000e+00 : f32
    %25 = vector.broadcast %cst_16 : f32 to vector<8x128xf32>
    %26 = arith.addf %25, %24 : vector<8x128xf32>
    %27 = arith.divf %25, %26 : vector<8x128xf32>
    %28 = vector.extract_strided_slice %21 {offsets = [0, 128], sizes = [8, 128], strides = [1, 1]} : vector<8x512xf32> to vector<8x128xf32>
    %29 = arith.negf %28 : vector<8x128xf32>
    %30 = math.exp %29 : vector<8x128xf32>
    %cst_17 = arith.constant 1.000000e+00 : f32
    %31 = vector.broadcast %cst_17 : f32 to vector<8x128xf32>
    %32 = arith.addf %31, %30 : vector<8x128xf32>
    %33 = arith.divf %31, %32 : vector<8x128xf32>
    %34 = vector.extract_strided_slice %21 {offsets = [0, 256], sizes = [8, 128], strides = [1, 1]} : vector<8x512xf32> to vector<8x128xf32>
    %35 = math.tanh %34 : vector<8x128xf32>
    %36 = vector.extract_strided_slice %21 {offsets = [0, 384], sizes = [8, 128], strides = [1, 1]} : vector<8x512xf32> to vector<8x128xf32>
    %37 = arith.negf %36 : vector<8x128xf32>
    %38 = math.exp %37 : vector<8x128xf32>
    %cst_18 = arith.constant 1.000000e+00 : f32
    %39 = vector.broadcast %cst_18 : f32 to vector<8x128xf32>
    %40 = arith.addf %39, %38 : vector<8x128xf32>
    %41 = arith.divf %39, %40 : vector<8x128xf32>
    %42 = arith.mulf %33, %13 : vector<8x128xf32>
    %43 = arith.mulf %27, %35 : vector<8x128xf32>
    %44 = arith.addf %42, %43 : vector<8x128xf32>
    %45 = math.tanh %44 : vector<8x128xf32>
    %46 = arith.mulf %41, %45 : vector<8x128xf32>
    %47 = arith.index_cast %15 : i32 to index
    %c0_19 = arith.constant 0 : index
    %48 = vector.load %arg10[%47, %c0_19] : memref<64x128xf32, #tpu.memory_space<vmem>>, vector<8x128xf32>
    tpu.vector_store %arg10[%47, %c0_19], %46 {strides = array<i32>} : memref<64x128xf32, #tpu.memory_space<vmem>>, vector<8x128xf32>,
    %c1_i32_20 = arith.constant 1 : i32
    %c8_i32_21 = arith.constant 8 : i32
    %49 = arith.muli %c1_i32_20, %c8_i32_21 : i32
    %50 = tpu.assume_multiple %49, 8 : i32
    %51 = arith.index_cast %50 : i32 to index
    %c0_22 = arith.constant 0 : index
    %52 = vector.load %arg12[%51, %c0_22] : memref<64x512xf32, #tpu.memory_space<vmem>>, vector<8x512xf32>
    %53 = arith.truncf %46 : vector<8x128xf32> to vector<8x128xbf16>
    %c0_23 = arith.constant 0 : index
    %c0_24 = arith.constant 0 : index
    %54 = vector.load %arg4[%c0_23, %c0_24] : memref<128x512xbf16, #tpu.memory_space<vmem>>, vector<128x512xbf16>
    %cst_25 = arith.constant dense<0.000000e+00> : vector<8x512xf32>
    %55 = tpu.matmul %53, %54, %cst_25 {dimension_numbers = #tpu.dot_dimension_numbers<[1], [0], [0], [1], [0, 0, 1, 1], [], []>} : vector<8x128xbf16>, vector<128x512xbf16>, vector<8x512xf32> -> vector<8x512xf32>
    %56 = arith.addf %52, %55 : vector<8x512xf32>
    %57 = vector.extract_strided_slice %56 {offsets = [0, 0], sizes = [8, 128], strides = [1, 1]} : vector<8x512xf32> to vector<8x128xf32>
    %58 = arith.negf %57 : vector<8x128xf32>
    %59 = math.exp %58 : vector<8x128xf32>
    %cst_26 = arith.constant 1.000000e+00 : f32
    %60 = vector.broadcast %cst_26 : f32 to vector<8x128xf32>
    %61 = arith.addf %60, %59 : vector<8x128xf32>
    %62 = arith.divf %60, %61 : vector<8x128xf32>
    %63 = vector.extract_strided_slice %56 {offsets = [0, 128], sizes = [8, 128], strides = [1, 1]} : vector<8x512xf32> to vector<8x128xf32>
    %64 = arith.negf %63 : vector<8x128xf32>
    %65 = math.exp %64 : vector<8x128xf32>
    %cst_27 = arith.constant 1.000000e+00 : f32
    %66 = vector.broadcast %cst_27 : f32 to vector<8x128xf32>
    %67 = arith.addf %66, %65 : vector<8x128xf32>
    %68 = arith.divf %66, %67 : vector<8x128xf32>
    %69 = vector.extract_strided_slice %56 {offsets = [0, 256], sizes = [8, 128], strides = [1, 1]} : vector<8x512xf32> to vector<8x128xf32>
    %70 = math.tanh %69 : vector<8x128xf32>
    %71 = vector.extract_strided_slice %56 {offsets = [0, 384], sizes = [8, 128], strides = [1, 1]} : vector<8x512xf32> to vector<8x128xf32>
    %72 = arith.negf %71 : vector<8x128xf32>
    %73 = math.exp %72 : vector<8x128xf32>
    %cst_28 = arith.constant 1.000000e+00 : f32
    %74 = vector.broadcast %cst_28 : f32 to vector<8x128xf32>
    %75 = arith.addf %74, %73 : vector<8x128xf32>
    %76 = arith.divf %74, %75 : vector<8x128xf32>
    %77 = arith.mulf %68, %44 : vector<8x128xf32>
    %78 = arith.mulf %62, %70 : vector<8x128xf32>
    %79 = arith.addf %77, %78 : vector<8x128xf32>
    %80 = math.tanh %79 : vector<8x128xf32>
    %81 = arith.mulf %76, %80 : vector<8x128xf32>
    %82 = arith.index_cast %50 : i32 to index
    %c0_29 = arith.constant 0 : index
    %83 = vector.load %arg10[%82, %c0_29] : memref<64x128xf32, #tpu.memory_space<vmem>>, vector<8x128xf32>
    tpu.vector_store %arg10[%82, %c0_29], %81 {strides = array<i32>} : memref<64x128xf32, #tpu.memory_space<vmem>>, vector<8x128xf32>,
    %c2_i32 = arith.constant 2 : i32
    %c8_i32_30 = arith.constant 8 : i32
    %84 = arith.muli %c2_i32, %c8_i32_30 : i32
    %85 = tpu.assume_multiple %84, 8 : i32
    %86 = arith.index_cast %85 : i32 to index
    %c0_31 = arith.constant 0 : index
    %87 = vector.load %arg12[%86, %c0_31] : memref<64x512xf32, #tpu.memory_space<vmem>>, vector<8x512xf32>
    %88 = arith.truncf %81 : vector<8x128xf32> to vector<8x128xbf16>
    %c0_32 = arith.constant 0 : index
    %c0_33 = arith.constant 0 : index
    %89 = vector.load %arg4[%c0_32, %c0_33] : memref<128x512xbf16, #tpu.memory_space<vmem>>, vector<128x512xbf16>
    %cst_34 = arith.constant dense<0.000000e+00> : vector<8x512xf32>
    %90 = tpu.matmul %88, %89, %cst_34 {dimension_numbers = #tpu.dot_dimension_numbers<[1], [0], [0], [1], [0, 0, 1, 1], [], []>} : vector<8x128xbf16>, vector<128x512xbf16>, vector<8x512xf32> -> vector<8x512xf32>
    %91 = arith.addf %87, %90 : vector<8x512xf32>
    %92 = vector.extract_strided_slice %91 {offsets = [0, 0], sizes = [8, 128], strides = [1, 1]} : vector<8x512xf32> to vector<8x128xf32>
    %93 = arith.negf %92 : vector<8x128xf32>
    %94 = math.exp %93 : vector<8x128xf32>
    %cst_35 = arith.constant 1.000000e+00 : f32
    %95 = vector.broadcast %cst_35 : f32 to vector<8x128xf32>
    %96 = arith.addf %95, %94 : vector<8x128xf32>
    %97 = arith.divf %95, %96 : vector<8x128xf32>
    %98 = vector.extract_strided_slice %91 {offsets = [0, 128], sizes = [8, 128], strides = [1, 1]} : vector<8x512xf32> to vector<8x128xf32>
    %99 = arith.negf %98 : vector<8x128xf32>
    %100 = math.exp %99 : vector<8x128xf32>
    %cst_36 = arith.constant 1.000000e+00 : f32
    %101 = vector.broadcast %cst_36 : f32 to vector<8x128xf32>
    %102 = arith.addf %101, %100 : vector<8x128xf32>
    %103 = arith.divf %101, %102 : vector<8x128xf32>
    %104 = vector.extract_strided_slice %91 {offsets = [0, 256], sizes = [8, 128], strides = [1, 1]} : vector<8x512xf32> to vector<8x128xf32>
    %105 = math.tanh %104 : vector<8x128xf32>
    %106 = vector.extract_strided_slice %91 {offsets = [0, 384], sizes = [8, 128], strides = [1, 1]} : vector<8x512xf32> to vector<8x128xf32>
    %107 = arith.negf %106 : vector<8x128xf32>
    %108 = math.exp %107 : vector<8x128xf32>
    %cst_37 = arith.constant 1.000000e+00 : f32
    %109 = vector.broadcast %cst_37 : f32 to vector<8x128xf32>
    %110 = arith.addf %109, %108 : vector<8x128xf32>
    %111 = arith.divf %109, %110 : vector<8x128xf32>
    %112 = arith.mulf %103, %79 : vector<8x128xf32>
    %113 = arith.mulf %97, %105 : vector<8x128xf32>
    %114 = arith.addf %112, %113 : vector<8x128xf32>
    %115 = math.tanh %114 : vector<8x128xf32>
    %116 = arith.mulf %111, %115 : vector<8x128xf32>
    %117 = arith.index_cast %85 : i32 to index
    %c0_38 = arith.constant 0 : index
    %118 = vector.load %arg10[%117, %c0_38] : memref<64x128xf32, #tpu.memory_space<vmem>>, vector<8x128xf32>
    tpu.vector_store %arg10[%117, %c0_38], %116 {strides = array<i32>} : memref<64x128xf32, #tpu.memory_space<vmem>>, vector<8x128xf32>,
    %c3_i32 = arith.constant 3 : i32
    %c8_i32_39 = arith.constant 8 : i32
    %119 = arith.muli %c3_i32, %c8_i32_39 : i32
    %120 = tpu.assume_multiple %119, 8 : i32
    %121 = arith.index_cast %120 : i32 to index
    %c0_40 = arith.constant 0 : index
    %122 = vector.load %arg12[%121, %c0_40] : memref<64x512xf32, #tpu.memory_space<vmem>>, vector<8x512xf32>
    %123 = arith.truncf %116 : vector<8x128xf32> to vector<8x128xbf16>
    %c0_41 = arith.constant 0 : index
    %c0_42 = arith.constant 0 : index
    %124 = vector.load %arg4[%c0_41, %c0_42] : memref<128x512xbf16, #tpu.memory_space<vmem>>, vector<128x512xbf16>
    %cst_43 = arith.constant dense<0.000000e+00> : vector<8x512xf32>
    %125 = tpu.matmul %123, %124, %cst_43 {dimension_numbers = #tpu.dot_dimension_numbers<[1], [0], [0], [1], [0, 0, 1, 1], [], []>} : vector<8x128xbf16>, vector<128x512xbf16>, vector<8x512xf32> -> vector<8x512xf32>
    %126 = arith.addf %122, %125 : vector<8x512xf32>
    %127 = vector.extract_strided_slice %126 {offsets = [0, 0], sizes = [8, 128], strides = [1, 1]} : vector<8x512xf32> to vector<8x128xf32>
    %128 = arith.negf %127 : vector<8x128xf32>
    %129 = math.exp %128 : vector<8x128xf32>
    %cst_44 = arith.constant 1.000000e+00 : f32
    %130 = vector.broadcast %cst_44 : f32 to vector<8x128xf32>
    %131 = arith.addf %130, %129 : vector<8x128xf32>
    %132 = arith.divf %130, %131 : vector<8x128xf32>
    %133 = vector.extract_strided_slice %126 {offsets = [0, 128], sizes = [8, 128], strides = [1, 1]} : vector<8x512xf32> to vector<8x128xf32>
    %134 = arith.negf %133 : vector<8x128xf32>
    %135 = math.exp %134 : vector<8x128xf32>
    %cst_45 = arith.constant 1.000000e+00 : f32
    %136 = vector.broadcast %cst_45 : f32 to vector<8x128xf32>
    %137 = arith.addf %136, %135 : vector<8x128xf32>
    %138 = arith.divf %136, %137 : vector<8x128xf32>
    %139 = vector.extract_strided_slice %126 {offsets = [0, 256], sizes = [8, 128], strides = [1, 1]} : vector<8x512xf32> to vector<8x128xf32>
    %140 = math.tanh %139 : vector<8x128xf32>
    %141 = vector.extract_strided_slice %126 {offsets = [0, 384], sizes = [8, 128], strides = [1, 1]} : vector<8x512xf32> to vector<8x128xf32>
    %142 = arith.negf %141 : vector<8x128xf32>
    %143 = math.exp %142 : vector<8x128xf32>
    %cst_46 = arith.constant 1.000000e+00 : f32
    %144 = vector.broadcast %cst_46 : f32 to vector<8x128xf32>
    %145 = arith.addf %144, %143 : vector<8x128xf32>
    %146 = arith.divf %144, %145 : vector<8x128xf32>
    %147 = arith.mulf %138, %114 : vector<8x128xf32>
    %148 = arith.mulf %132, %140 : vector<8x128xf32>
    %149 = arith.addf %147, %148 : vector<8x128xf32>
    %150 = math.tanh %149 : vector<8x128xf32>
    %151 = arith.mulf %146, %150 : vector<8x128xf32>
    %152 = arith.index_cast %120 : i32 to index
    %c0_47 = arith.constant 0 : index
    %153 = vector.load %arg10[%152, %c0_47] : memref<64x128xf32, #tpu.memory_space<vmem>>, vector<8x128xf32>
    tpu.vector_store %arg10[%152, %c0_47], %151 {strides = array<i32>} : memref<64x128xf32, #tpu.memory_space<vmem>>, vector<8x128xf32>,
    %c4_i32 = arith.constant 4 : i32
    %c8_i32_48 = arith.constant 8 : i32
    %154 = arith.muli %c4_i32, %c8_i32_48 : i32
    %155 = tpu.assume_multiple %154, 8 : i32
    %156 = arith.index_cast %155 : i32 to index
    %c0_49 = arith.constant 0 : index
    %157 = vector.load %arg12[%156, %c0_49] : memref<64x512xf32, #tpu.memory_space<vmem>>, vector<8x512xf32>
    %158 = arith.truncf %151 : vector<8x128xf32> to vector<8x128xbf16>
    %c0_50 = arith.constant 0 : index
    %c0_51 = arith.constant 0 : index
    %159 = vector.load %arg4[%c0_50, %c0_51] : memref<128x512xbf16, #tpu.memory_space<vmem>>, vector<128x512xbf16>
    %cst_52 = arith.constant dense<0.000000e+00> : vector<8x512xf32>
    %160 = tpu.matmul %158, %159, %cst_52 {dimension_numbers = #tpu.dot_dimension_numbers<[1], [0], [0], [1], [0, 0, 1, 1], [], []>} : vector<8x128xbf16>, vector<128x512xbf16>, vector<8x512xf32> -> vector<8x512xf32>
    %161 = arith.addf %157, %160 : vector<8x512xf32>
    %162 = vector.extract_strided_slice %161 {offsets = [0, 0], sizes = [8, 128], strides = [1, 1]} : vector<8x512xf32> to vector<8x128xf32>
    %163 = arith.negf %162 : vector<8x128xf32>
    %164 = math.exp %163 : vector<8x128xf32>
    %cst_53 = arith.constant 1.000000e+00 : f32
    %165 = vector.broadcast %cst_53 : f32 to vector<8x128xf32>
    %166 = arith.addf %165, %164 : vector<8x128xf32>
    %167 = arith.divf %165, %166 : vector<8x128xf32>
    %168 = vector.extract_strided_slice %161 {offsets = [0, 128], sizes = [8, 128], strides = [1, 1]} : vector<8x512xf32> to vector<8x128xf32>
    %169 = arith.negf %168 : vector<8x128xf32>
    %170 = math.exp %169 : vector<8x128xf32>
    %cst_54 = arith.constant 1.000000e+00 : f32
    %171 = vector.broadcast %cst_54 : f32 to vector<8x128xf32>
    %172 = arith.addf %171, %170 : vector<8x128xf32>
    %173 = arith.divf %171, %172 : vector<8x128xf32>
    %174 = vector.extract_strided_slice %161 {offsets = [0, 256], sizes = [8, 128], strides = [1, 1]} : vector<8x512xf32> to vector<8x128xf32>
    %175 = math.tanh %174 : vector<8x128xf32>
    %176 = vector.extract_strided_slice %161 {offsets = [0, 384], sizes = [8, 128], strides = [1, 1]} : vector<8x512xf32> to vector<8x128xf32>
    %177 = arith.negf %176 : vector<8x128xf32>
    %178 = math.exp %177 : vector<8x128xf32>
    %cst_55 = arith.constant 1.000000e+00 : f32
    %179 = vector.broadcast %cst_55 : f32 to vector<8x128xf32>
    %180 = arith.addf %179, %178 : vector<8x128xf32>
    %181 = arith.divf %179, %180 : vector<8x128xf32>
    %182 = arith.mulf %173, %149 : vector<8x128xf32>
    %183 = arith.mulf %167, %175 : vector<8x128xf32>
    %184 = arith.addf %182, %183 : vector<8x128xf32>
    %185 = math.tanh %184 : vector<8x128xf32>
    %186 = arith.mulf %181, %185 : vector<8x128xf32>
    %187 = arith.index_cast %155 : i32 to index
    %c0_56 = arith.constant 0 : index
    %188 = vector.load %arg10[%187, %c0_56] : memref<64x128xf32, #tpu.memory_space<vmem>>, vector<8x128xf32>
    tpu.vector_store %arg10[%187, %c0_56], %186 {strides = array<i32>} : memref<64x128xf32, #tpu.memory_space<vmem>>, vector<8x128xf32>,
    %c5_i32 = arith.constant 5 : i32
    %c8_i32_57 = arith.constant 8 : i32
    %189 = arith.muli %c5_i32, %c8_i32_57 : i32
    %190 = tpu.assume_multiple %189, 8 : i32
    %191 = arith.index_cast %190 : i32 to index
    %c0_58 = arith.constant 0 : index
    %192 = vector.load %arg12[%191, %c0_58] : memref<64x512xf32, #tpu.memory_space<vmem>>, vector<8x512xf32>
    %193 = arith.truncf %186 : vector<8x128xf32> to vector<8x128xbf16>
    %c0_59 = arith.constant 0 : index
    %c0_60 = arith.constant 0 : index
    %194 = vector.load %arg4[%c0_59, %c0_60] : memref<128x512xbf16, #tpu.memory_space<vmem>>, vector<128x512xbf16>
    %cst_61 = arith.constant dense<0.000000e+00> : vector<8x512xf32>
    %195 = tpu.matmul %193, %194, %cst_61 {dimension_numbers = #tpu.dot_dimension_numbers<[1], [0], [0], [1], [0, 0, 1, 1], [], []>} : vector<8x128xbf16>, vector<128x512xbf16>, vector<8x512xf32> -> vector<8x512xf32>
    %196 = arith.addf %192, %195 : vector<8x512xf32>
    %197 = vector.extract_strided_slice %196 {offsets = [0, 0], sizes = [8, 128], strides = [1, 1]} : vector<8x512xf32> to vector<8x128xf32>
    %198 = arith.negf %197 : vector<8x128xf32>
    %199 = math.exp %198 : vector<8x128xf32>
    %cst_62 = arith.constant 1.000000e+00 : f32
    %200 = vector.broadcast %cst_62 : f32 to vector<8x128xf32>
    %201 = arith.addf %200, %199 : vector<8x128xf32>
    %202 = arith.divf %200, %201 : vector<8x128xf32>
    %203 = vector.extract_strided_slice %196 {offsets = [0, 128], sizes = [8, 128], strides = [1, 1]} : vector<8x512xf32> to vector<8x128xf32>
    %204 = arith.negf %203 : vector<8x128xf32>
    %205 = math.exp %204 : vector<8x128xf32>
    %cst_63 = arith.constant 1.000000e+00 : f32
    %206 = vector.broadcast %cst_63 : f32 to vector<8x128xf32>
    %207 = arith.addf %206, %205 : vector<8x128xf32>
    %208 = arith.divf %206, %207 : vector<8x128xf32>
    %209 = vector.extract_strided_slice %196 {offsets = [0, 256], sizes = [8, 128], strides = [1, 1]} : vector<8x512xf32> to vector<8x128xf32>
    %210 = math.tanh %209 : vector<8x128xf32>
    %211 = vector.extract_strided_slice %196 {offsets = [0, 384], sizes = [8, 128], strides = [1, 1]} : vector<8x512xf32> to vector<8x128xf32>
    %212 = arith.negf %211 : vector<8x128xf32>
    %213 = math.exp %212 : vector<8x128xf32>
    %cst_64 = arith.constant 1.000000e+00 : f32
    %214 = vector.broadcast %cst_64 : f32 to vector<8x128xf32>
    %215 = arith.addf %214, %213 : vector<8x128xf32>
    %216 = arith.divf %214, %215 : vector<8x128xf32>
    %217 = arith.mulf %208, %184 : vector<8x128xf32>
    %218 = arith.mulf %202, %210 : vector<8x128xf32>
    %219 = arith.addf %217, %218 : vector<8x128xf32>
    %220 = math.tanh %219 : vector<8x128xf32>
    %221 = arith.mulf %216, %220 : vector<8x128xf32>
    %222 = arith.index_cast %190 : i32 to index
    %c0_65 = arith.constant 0 : index
    %223 = vector.load %arg10[%222, %c0_65] : memref<64x128xf32, #tpu.memory_space<vmem>>, vector<8x128xf32>
    tpu.vector_store %arg10[%222, %c0_65], %221 {strides = array<i32>} : memref<64x128xf32, #tpu.memory_space<vmem>>, vector<8x128xf32>,
    %c6_i32 = arith.constant 6 : i32
    %c8_i32_66 = arith.constant 8 : i32
    %224 = arith.muli %c6_i32, %c8_i32_66 : i32
    %225 = tpu.assume_multiple %224, 8 : i32
    %226 = arith.index_cast %225 : i32 to index
    %c0_67 = arith.constant 0 : index
    %227 = vector.load %arg12[%226, %c0_67] : memref<64x512xf32, #tpu.memory_space<vmem>>, vector<8x512xf32>
    %228 = arith.truncf %221 : vector<8x128xf32> to vector<8x128xbf16>
    %c0_68 = arith.constant 0 : index
    %c0_69 = arith.constant 0 : index
    %229 = vector.load %arg4[%c0_68, %c0_69] : memref<128x512xbf16, #tpu.memory_space<vmem>>, vector<128x512xbf16>
    %cst_70 = arith.constant dense<0.000000e+00> : vector<8x512xf32>
    %230 = tpu.matmul %228, %229, %cst_70 {dimension_numbers = #tpu.dot_dimension_numbers<[1], [0], [0], [1], [0, 0, 1, 1], [], []>} : vector<8x128xbf16>, vector<128x512xbf16>, vector<8x512xf32> -> vector<8x512xf32>
    %231 = arith.addf %227, %230 : vector<8x512xf32>
    %232 = vector.extract_strided_slice %231 {offsets = [0, 0], sizes = [8, 128], strides = [1, 1]} : vector<8x512xf32> to vector<8x128xf32>
    %233 = arith.negf %232 : vector<8x128xf32>
    %234 = math.exp %233 : vector<8x128xf32>
    %cst_71 = arith.constant 1.000000e+00 : f32
    %235 = vector.broadcast %cst_71 : f32 to vector<8x128xf32>
    %236 = arith.addf %235, %234 : vector<8x128xf32>
    %237 = arith.divf %235, %236 : vector<8x128xf32>
    %238 = vector.extract_strided_slice %231 {offsets = [0, 128], sizes = [8, 128], strides = [1, 1]} : vector<8x512xf32> to vector<8x128xf32>
    %239 = arith.negf %238 : vector<8x128xf32>
    %240 = math.exp %239 : vector<8x128xf32>
    %cst_72 = arith.constant 1.000000e+00 : f32
    %241 = vector.broadcast %cst_72 : f32 to vector<8x128xf32>
    %242 = arith.addf %241, %240 : vector<8x128xf32>
    %243 = arith.divf %241, %242 : vector<8x128xf32>
    %244 = vector.extract_strided_slice %231 {offsets = [0, 256], sizes = [8, 128], strides = [1, 1]} : vector<8x512xf32> to vector<8x128xf32>
    %245 = math.tanh %244 : vector<8x128xf32>
    %246 = vector.extract_strided_slice %231 {offsets = [0, 384], sizes = [8, 128], strides = [1, 1]} : vector<8x512xf32> to vector<8x128xf32>
    %247 = arith.negf %246 : vector<8x128xf32>
    %248 = math.exp %247 : vector<8x128xf32>
    %cst_73 = arith.constant 1.000000e+00 : f32
    %249 = vector.broadcast %cst_73 : f32 to vector<8x128xf32>
    %250 = arith.addf %249, %248 : vector<8x128xf32>
    %251 = arith.divf %249, %250 : vector<8x128xf32>
    %252 = arith.mulf %243, %219 : vector<8x128xf32>
    %253 = arith.mulf %237, %245 : vector<8x128xf32>
    %254 = arith.addf %252, %253 : vector<8x128xf32>
    %255 = math.tanh %254 : vector<8x128xf32>
    %256 = arith.mulf %251, %255 : vector<8x128xf32>
    %257 = arith.index_cast %225 : i32 to index
    %c0_74 = arith.constant 0 : index
    %258 = vector.load %arg10[%257, %c0_74] : memref<64x128xf32, #tpu.memory_space<vmem>>, vector<8x128xf32>
    tpu.vector_store %arg10[%257, %c0_74], %256 {strides = array<i32>} : memref<64x128xf32, #tpu.memory_space<vmem>>, vector<8x128xf32>,
    %c7_i32 = arith.constant 7 : i32
    %c8_i32_75 = arith.constant 8 : i32
    %259 = arith.muli %c7_i32, %c8_i32_75 : i32
    %260 = tpu.assume_multiple %259, 8 : i32
    %261 = arith.index_cast %260 : i32 to index
    %c0_76 = arith.constant 0 : index
    %262 = vector.load %arg12[%261, %c0_76] : memref<64x512xf32, #tpu.memory_space<vmem>>, vector<8x512xf32>
    %263 = arith.truncf %256 : vector<8x128xf32> to vector<8x128xbf16>
    %c0_77 = arith.constant 0 : index
    %c0_78 = arith.constant 0 : index
    %264 = vector.load %arg4[%c0_77, %c0_78] : memref<128x512xbf16, #tpu.memory_space<vmem>>, vector<128x512xbf16>
    %cst_79 = arith.constant dense<0.000000e+00> : vector<8x512xf32>
    %265 = tpu.matmul %263, %264, %cst_79 {dimension_numbers = #tpu.dot_dimension_numbers<[1], [0], [0], [1], [0, 0, 1, 1], [], []>} : vector<8x128xbf16>, vector<128x512xbf16>, vector<8x512xf32> -> vector<8x512xf32>
    %266 = arith.addf %262, %265 : vector<8x512xf32>
    %267 = vector.extract_strided_slice %266 {offsets = [0, 0], sizes = [8, 128], strides = [1, 1]} : vector<8x512xf32> to vector<8x128xf32>
    %268 = arith.negf %267 : vector<8x128xf32>
    %269 = math.exp %268 : vector<8x128xf32>
    %cst_80 = arith.constant 1.000000e+00 : f32
    %270 = vector.broadcast %cst_80 : f32 to vector<8x128xf32>
    %271 = arith.addf %270, %269 : vector<8x128xf32>
    %272 = arith.divf %270, %271 : vector<8x128xf32>
    %273 = vector.extract_strided_slice %266 {offsets = [0, 128], sizes = [8, 128], strides = [1, 1]} : vector<8x512xf32> to vector<8x128xf32>
    %274 = arith.negf %273 : vector<8x128xf32>
    %275 = math.exp %274 : vector<8x128xf32>
    %cst_81 = arith.constant 1.000000e+00 : f32
    %276 = vector.broadcast %cst_81 : f32 to vector<8x128xf32>
    %277 = arith.addf %276, %275 : vector<8x128xf32>
    %278 = arith.divf %276, %277 : vector<8x128xf32>
    %279 = vector.extract_strided_slice %266 {offsets = [0, 256], sizes = [8, 128], strides = [1, 1]} : vector<8x512xf32> to vector<8x128xf32>
    %280 = math.tanh %279 : vector<8x128xf32>
    %281 = vector.extract_strided_slice %266 {offsets = [0, 384], sizes = [8, 128], strides = [1, 1]} : vector<8x512xf32> to vector<8x128xf32>
    %282 = arith.negf %281 : vector<8x128xf32>
    %283 = math.exp %282 : vector<8x128xf32>
    %cst_82 = arith.constant 1.000000e+00 : f32
    %284 = vector.broadcast %cst_82 : f32 to vector<8x128xf32>
    %285 = arith.addf %284, %283 : vector<8x128xf32>
    %286 = arith.divf %284, %285 : vector<8x128xf32>
    %287 = arith.mulf %278, %254 : vector<8x128xf32>
    %288 = arith.mulf %272, %280 : vector<8x128xf32>
    %289 = arith.addf %287, %288 : vector<8x128xf32>
    %290 = math.tanh %289 : vector<8x128xf32>
    %291 = arith.mulf %286, %290 : vector<8x128xf32>
    %292 = arith.index_cast %260 : i32 to index
    %c0_83 = arith.constant 0 : index
    %293 = vector.load %arg10[%292, %c0_83] : memref<64x128xf32, #tpu.memory_space<vmem>>, vector<8x128xf32>
    tpu.vector_store %arg10[%292, %c0_83], %291 {strides = array<i32>} : memref<64x128xf32, #tpu.memory_space<vmem>>, vector<8x128xf32>,
    %c8_i32_84 = arith.constant 8 : i32
    %c0_85 = arith.constant 0 : index
    %c0_86 = arith.constant 0 : index
    %294 = vector.load %arg10[%c0_85, %c0_86] : memref<64x128xf32, #tpu.memory_space<vmem>>, vector<64x128xf32>
    %295 = arith.truncf %294 : vector<64x128xf32> to vector<64x128xbf16>
    %c0_87 = arith.constant 0 : index
    %c0_88 = arith.constant 0 : index
    %296 = vector.load %arg6[%c0_87, %c0_88] : memref<128x512xbf16, #tpu.memory_space<vmem>>, vector<128x512xbf16>
    %cst_89 = arith.constant dense<0.000000e+00> : vector<64x512xf32>
    %297 = tpu.matmul %295, %296, %cst_89 {dimension_numbers = #tpu.dot_dimension_numbers<[1], [0], [0], [1], [0, 0, 1, 1], [], []>} : vector<64x128xbf16>, vector<128x512xbf16>, vector<64x512xf32> -> vector<64x512xf32>
    %c0_90 = arith.constant 0 : index
    %c0_91 = arith.constant 0 : index
    %298 = vector.load %arg8[%c0_90, %c0_91] : memref<1x512xf32, #tpu.memory_space<vmem>>, vector<1x512xf32>
    %299 = vector.broadcast %298 : vector<1x512xf32> to vector<64x512xf32>
    %300 = arith.addf %297, %299 : vector<64x512xf32>
    %c0_92 = arith.constant 0 : index
    %c0_93 = arith.constant 0 : index
    %301 = vector.load %arg12[%c0_92, %c0_93] : memref<64x512xf32, #tpu.memory_space<vmem>>, vector<64x512xf32>
    tpu.vector_store %arg12[%c0_92, %c0_93], %300 {strides = array<i32>} : memref<64x512xf32, #tpu.memory_space<vmem>>, vector<64x512xf32>,
    %cst_94 = arith.constant 0.000000e+00 : f32
    %302 = vector.broadcast %cst_94 : f32 to vector<8x128xf32>
    %c0_i32_95 = arith.constant 0 : i32
    %c8_i32_96 = arith.constant 8 : i32
    %303 = arith.muli %c0_i32_95, %c8_i32_96 : i32
    %304 = tpu.assume_multiple %303, 8 : i32
    %305 = arith.index_cast %304 : i32 to index
    %c0_97 = arith.constant 0 : index
    %306 = vector.load %arg12[%305, %c0_97] : memref<64x512xf32, #tpu.memory_space<vmem>>, vector<8x512xf32>
    %307 = arith.truncf %302 : vector<8x128xf32> to vector<8x128xbf16>
    %c0_98 = arith.constant 0 : index
    %c0_99 = arith.constant 0 : index
    %308 = vector.load %arg7[%c0_98, %c0_99] : memref<128x512xbf16, #tpu.memory_space<vmem>>, vector<128x512xbf16>
    %cst_100 = arith.constant dense<0.000000e+00> : vector<8x512xf32>
    %309 = tpu.matmul %307, %308, %cst_100 {dimension_numbers = #tpu.dot_dimension_numbers<[1], [0], [0], [1], [0, 0, 1, 1], [], []>} : vector<8x128xbf16>, vector<128x512xbf16>, vector<8x512xf32> -> vector<8x512xf32>
    %310 = arith.addf %306, %309 : vector<8x512xf32>
    %311 = vector.extract_strided_slice %310 {offsets = [0, 0], sizes = [8, 128], strides = [1, 1]} : vector<8x512xf32> to vector<8x128xf32>
    %312 = arith.negf %311 : vector<8x128xf32>
    %313 = math.exp %312 : vector<8x128xf32>
    %cst_101 = arith.constant 1.000000e+00 : f32
    %314 = vector.broadcast %cst_101 : f32 to vector<8x128xf32>
    %315 = arith.addf %314, %313 : vector<8x128xf32>
    %316 = arith.divf %314, %315 : vector<8x128xf32>
    %317 = vector.extract_strided_slice %310 {offsets = [0, 128], sizes = [8, 128], strides = [1, 1]} : vector<8x512xf32> to vector<8x128xf32>
    %318 = arith.negf %317 : vector<8x128xf32>
    %319 = math.exp %318 : vector<8x128xf32>
    %cst_102 = arith.constant 1.000000e+00 : f32
    %320 = vector.broadcast %cst_102 : f32 to vector<8x128xf32>
    %321 = arith.addf %320, %319 : vector<8x128xf32>
    %322 = arith.divf %320, %321 : vector<8x128xf32>
    %323 = vector.extract_strided_slice %310 {offsets = [0, 256], sizes = [8, 128], strides = [1, 1]} : vector<8x512xf32> to vector<8x128xf32>
    %324 = math.tanh %323 : vector<8x128xf32>
    %325 = vector.extract_strided_slice %310 {offsets = [0, 384], sizes = [8, 128], strides = [1, 1]} : vector<8x512xf32> to vector<8x128xf32>
    %326 = arith.negf %325 : vector<8x128xf32>
    %327 = math.exp %326 : vector<8x128xf32>
    %cst_103 = arith.constant 1.000000e+00 : f32
    %328 = vector.broadcast %cst_103 : f32 to vector<8x128xf32>
    %329 = arith.addf %328, %327 : vector<8x128xf32>
    %330 = arith.divf %328, %329 : vector<8x128xf32>
    %331 = arith.mulf %322, %302 : vector<8x128xf32>
    %332 = arith.mulf %316, %324 : vector<8x128xf32>
    %333 = arith.addf %331, %332 : vector<8x128xf32>
    %334 = math.tanh %333 : vector<8x128xf32>
    %335 = arith.mulf %330, %334 : vector<8x128xf32>
    %336 = vector.broadcast %c0_i32_95 : i32 to vector<8x1xi32>
    %337 = arith.cmpi eq, %336, %4 : vector<8x1xi32>
    %338 = vector.shape_cast %337 : vector<8x1xi1> to vector<8x1xi1>
    %339 = vector.broadcast %338 : vector<8x1xi1> to vector<8x128xi1>
    %340 = arith.select %339, %335, %302 : vector<8x128xi1>, vector<8x128xf32>
    %c1_i32_104 = arith.constant 1 : i32
    %c8_i32_105 = arith.constant 8 : i32
    %341 = arith.muli %c1_i32_104, %c8_i32_105 : i32
    %342 = tpu.assume_multiple %341, 8 : i32
    %343 = arith.index_cast %342 : i32 to index
    %c0_106 = arith.constant 0 : index
    %344 = vector.load %arg12[%343, %c0_106] : memref<64x512xf32, #tpu.memory_space<vmem>>, vector<8x512xf32>
    %345 = arith.truncf %335 : vector<8x128xf32> to vector<8x128xbf16>
    %c0_107 = arith.constant 0 : index
    %c0_108 = arith.constant 0 : index
    %346 = vector.load %arg7[%c0_107, %c0_108] : memref<128x512xbf16, #tpu.memory_space<vmem>>, vector<128x512xbf16>
    %cst_109 = arith.constant dense<0.000000e+00> : vector<8x512xf32>
    %347 = tpu.matmul %345, %346, %cst_109 {dimension_numbers = #tpu.dot_dimension_numbers<[1], [0], [0], [1], [0, 0, 1, 1], [], []>} : vector<8x128xbf16>, vector<128x512xbf16>, vector<8x512xf32> -> vector<8x512xf32>
    %348 = arith.addf %344, %347 : vector<8x512xf32>
    %349 = vector.extract_strided_slice %348 {offsets = [0, 0], sizes = [8, 128], strides = [1, 1]} : vector<8x512xf32> to vector<8x128xf32>
    %350 = arith.negf %349 : vector<8x128xf32>
    %351 = math.exp %350 : vector<8x128xf32>
    %cst_110 = arith.constant 1.000000e+00 : f32
    %352 = vector.broadcast %cst_110 : f32 to vector<8x128xf32>
    %353 = arith.addf %352, %351 : vector<8x128xf32>
    %354 = arith.divf %352, %353 : vector<8x128xf32>
    %355 = vector.extract_strided_slice %348 {offsets = [0, 128], sizes = [8, 128], strides = [1, 1]} : vector<8x512xf32> to vector<8x128xf32>
    %356 = arith.negf %355 : vector<8x128xf32>
    %357 = math.exp %356 : vector<8x128xf32>
    %cst_111 = arith.constant 1.000000e+00 : f32
    %358 = vector.broadcast %cst_111 : f32 to vector<8x128xf32>
    %359 = arith.addf %358, %357 : vector<8x128xf32>
    %360 = arith.divf %358, %359 : vector<8x128xf32>
    %361 = vector.extract_strided_slice %348 {offsets = [0, 256], sizes = [8, 128], strides = [1, 1]} : vector<8x512xf32> to vector<8x128xf32>
    %362 = math.tanh %361 : vector<8x128xf32>
    %363 = vector.extract_strided_slice %348 {offsets = [0, 384], sizes = [8, 128], strides = [1, 1]} : vector<8x512xf32> to vector<8x128xf32>
    %364 = arith.negf %363 : vector<8x128xf32>
    %365 = math.exp %364 : vector<8x128xf32>
    %cst_112 = arith.constant 1.000000e+00 : f32
    %366 = vector.broadcast %cst_112 : f32 to vector<8x128xf32>
    %367 = arith.addf %366, %365 : vector<8x128xf32>
    %368 = arith.divf %366, %367 : vector<8x128xf32>
    %369 = arith.mulf %360, %333 : vector<8x128xf32>
    %370 = arith.mulf %354, %362 : vector<8x128xf32>
    %371 = arith.addf %369, %370 : vector<8x128xf32>
    %372 = math.tanh %371 : vector<8x128xf32>
    %373 = arith.mulf %368, %372 : vector<8x128xf32>
    %374 = vector.broadcast %c1_i32_104 : i32 to vector<8x1xi32>
    %375 = arith.cmpi eq, %374, %4 : vector<8x1xi32>
    %376 = vector.shape_cast %375 : vector<8x1xi1> to vector<8x1xi1>
    %377 = vector.broadcast %376 : vector<8x1xi1> to vector<8x128xi1>
    %378 = arith.select %377, %373, %340 : vector<8x128xi1>, vector<8x128xf32>
    %c2_i32_113 = arith.constant 2 : i32
    %c8_i32_114 = arith.constant 8 : i32
    %379 = arith.muli %c2_i32_113, %c8_i32_114 : i32
    %380 = tpu.assume_multiple %379, 8 : i32
    %381 = arith.index_cast %380 : i32 to index
    %c0_115 = arith.constant 0 : index
    %382 = vector.load %arg12[%381, %c0_115] : memref<64x512xf32, #tpu.memory_space<vmem>>, vector<8x512xf32>
    %383 = arith.truncf %373 : vector<8x128xf32> to vector<8x128xbf16>
    %c0_116 = arith.constant 0 : index
    %c0_117 = arith.constant 0 : index
    %384 = vector.load %arg7[%c0_116, %c0_117] : memref<128x512xbf16, #tpu.memory_space<vmem>>, vector<128x512xbf16>
    %cst_118 = arith.constant dense<0.000000e+00> : vector<8x512xf32>
    %385 = tpu.matmul %383, %384, %cst_118 {dimension_numbers = #tpu.dot_dimension_numbers<[1], [0], [0], [1], [0, 0, 1, 1], [], []>} : vector<8x128xbf16>, vector<128x512xbf16>, vector<8x512xf32> -> vector<8x512xf32>
    %386 = arith.addf %382, %385 : vector<8x512xf32>
    %387 = vector.extract_strided_slice %386 {offsets = [0, 0], sizes = [8, 128], strides = [1, 1]} : vector<8x512xf32> to vector<8x128xf32>
    %388 = arith.negf %387 : vector<8x128xf32>
    %389 = math.exp %388 : vector<8x128xf32>
    %cst_119 = arith.constant 1.000000e+00 : f32
    %390 = vector.broadcast %cst_119 : f32 to vector<8x128xf32>
    %391 = arith.addf %390, %389 : vector<8x128xf32>
    %392 = arith.divf %390, %391 : vector<8x128xf32>
    %393 = vector.extract_strided_slice %386 {offsets = [0, 128], sizes = [8, 128], strides = [1, 1]} : vector<8x512xf32> to vector<8x128xf32>
    %394 = arith.negf %393 : vector<8x128xf32>
    %395 = math.exp %394 : vector<8x128xf32>
    %cst_120 = arith.constant 1.000000e+00 : f32
    %396 = vector.broadcast %cst_120 : f32 to vector<8x128xf32>
    %397 = arith.addf %396, %395 : vector<8x128xf32>
    %398 = arith.divf %396, %397 : vector<8x128xf32>
    %399 = vector.extract_strided_slice %386 {offsets = [0, 256], sizes = [8, 128], strides = [1, 1]} : vector<8x512xf32> to vector<8x128xf32>
    %400 = math.tanh %399 : vector<8x128xf32>
    %401 = vector.extract_strided_slice %386 {offsets = [0, 384], sizes = [8, 128], strides = [1, 1]} : vector<8x512xf32> to vector<8x128xf32>
    %402 = arith.negf %401 : vector<8x128xf32>
    %403 = math.exp %402 : vector<8x128xf32>
    %cst_121 = arith.constant 1.000000e+00 : f32
    %404 = vector.broadcast %cst_121 : f32 to vector<8x128xf32>
    %405 = arith.addf %404, %403 : vector<8x128xf32>
    %406 = arith.divf %404, %405 : vector<8x128xf32>
    %407 = arith.mulf %398, %371 : vector<8x128xf32>
    %408 = arith.mulf %392, %400 : vector<8x128xf32>
    %409 = arith.addf %407, %408 : vector<8x128xf32>
    %410 = math.tanh %409 : vector<8x128xf32>
    %411 = arith.mulf %406, %410 : vector<8x128xf32>
    %412 = vector.broadcast %c2_i32_113 : i32 to vector<8x1xi32>
    %413 = arith.cmpi eq, %412, %4 : vector<8x1xi32>
    %414 = vector.shape_cast %413 : vector<8x1xi1> to vector<8x1xi1>
    %415 = vector.broadcast %414 : vector<8x1xi1> to vector<8x128xi1>
    %416 = arith.select %415, %411, %378 : vector<8x128xi1>, vector<8x128xf32>
    %c3_i32_122 = arith.constant 3 : i32
    %c8_i32_123 = arith.constant 8 : i32
    %417 = arith.muli %c3_i32_122, %c8_i32_123 : i32
    %418 = tpu.assume_multiple %417, 8 : i32
    %419 = arith.index_cast %418 : i32 to index
    %c0_124 = arith.constant 0 : index
    %420 = vector.load %arg12[%419, %c0_124] : memref<64x512xf32, #tpu.memory_space<vmem>>, vector<8x512xf32>
    %421 = arith.truncf %411 : vector<8x128xf32> to vector<8x128xbf16>
    %c0_125 = arith.constant 0 : index
    %c0_126 = arith.constant 0 : index
    %422 = vector.load %arg7[%c0_125, %c0_126] : memref<128x512xbf16, #tpu.memory_space<vmem>>, vector<128x512xbf16>
    %cst_127 = arith.constant dense<0.000000e+00> : vector<8x512xf32>
    %423 = tpu.matmul %421, %422, %cst_127 {dimension_numbers = #tpu.dot_dimension_numbers<[1], [0], [0], [1], [0, 0, 1, 1], [], []>} : vector<8x128xbf16>, vector<128x512xbf16>, vector<8x512xf32> -> vector<8x512xf32>
    %424 = arith.addf %420, %423 : vector<8x512xf32>
    %425 = vector.extract_strided_slice %424 {offsets = [0, 0], sizes = [8, 128], strides = [1, 1]} : vector<8x512xf32> to vector<8x128xf32>
    %426 = arith.negf %425 : vector<8x128xf32>
    %427 = math.exp %426 : vector<8x128xf32>
    %cst_128 = arith.constant 1.000000e+00 : f32
    %428 = vector.broadcast %cst_128 : f32 to vector<8x128xf32>
    %429 = arith.addf %428, %427 : vector<8x128xf32>
    %430 = arith.divf %428, %429 : vector<8x128xf32>
    %431 = vector.extract_strided_slice %424 {offsets = [0, 128], sizes = [8, 128], strides = [1, 1]} : vector<8x512xf32> to vector<8x128xf32>
    %432 = arith.negf %431 : vector<8x128xf32>
    %433 = math.exp %432 : vector<8x128xf32>
    %cst_129 = arith.constant 1.000000e+00 : f32
    %434 = vector.broadcast %cst_129 : f32 to vector<8x128xf32>
    %435 = arith.addf %434, %433 : vector<8x128xf32>
    %436 = arith.divf %434, %435 : vector<8x128xf32>
    %437 = vector.extract_strided_slice %424 {offsets = [0, 256], sizes = [8, 128], strides = [1, 1]} : vector<8x512xf32> to vector<8x128xf32>
    %438 = math.tanh %437 : vector<8x128xf32>
    %439 = vector.extract_strided_slice %424 {offsets = [0, 384], sizes = [8, 128], strides = [1, 1]} : vector<8x512xf32> to vector<8x128xf32>
    %440 = arith.negf %439 : vector<8x128xf32>
    %441 = math.exp %440 : vector<8x128xf32>
    %cst_130 = arith.constant 1.000000e+00 : f32
    %442 = vector.broadcast %cst_130 : f32 to vector<8x128xf32>
    %443 = arith.addf %442, %441 : vector<8x128xf32>
    %444 = arith.divf %442, %443 : vector<8x128xf32>
    %445 = arith.mulf %436, %409 : vector<8x128xf32>
    %446 = arith.mulf %430, %438 : vector<8x128xf32>
    %447 = arith.addf %445, %446 : vector<8x128xf32>
    %448 = math.tanh %447 : vector<8x128xf32>
    %449 = arith.mulf %444, %448 : vector<8x128xf32>
    %450 = vector.broadcast %c3_i32_122 : i32 to vector<8x1xi32>
    %451 = arith.cmpi eq, %450, %4 : vector<8x1xi32>
    %452 = vector.shape_cast %451 : vector<8x1xi1> to vector<8x1xi1>
    %453 = vector.broadcast %452 : vector<8x1xi1> to vector<8x128xi1>
    %454 = arith.select %453, %449, %416 : vector<8x128xi1>, vector<8x128xf32>
    %c4_i32_131 = arith.constant 4 : i32
    %c8_i32_132 = arith.constant 8 : i32
    %455 = arith.muli %c4_i32_131, %c8_i32_132 : i32
    %456 = tpu.assume_multiple %455, 8 : i32
    %457 = arith.index_cast %456 : i32 to index
    %c0_133 = arith.constant 0 : index
    %458 = vector.load %arg12[%457, %c0_133] : memref<64x512xf32, #tpu.memory_space<vmem>>, vector<8x512xf32>
    %459 = arith.truncf %449 : vector<8x128xf32> to vector<8x128xbf16>
    %c0_134 = arith.constant 0 : index
    %c0_135 = arith.constant 0 : index
    %460 = vector.load %arg7[%c0_134, %c0_135] : memref<128x512xbf16, #tpu.memory_space<vmem>>, vector<128x512xbf16>
    %cst_136 = arith.constant dense<0.000000e+00> : vector<8x512xf32>
    %461 = tpu.matmul %459, %460, %cst_136 {dimension_numbers = #tpu.dot_dimension_numbers<[1], [0], [0], [1], [0, 0, 1, 1], [], []>} : vector<8x128xbf16>, vector<128x512xbf16>, vector<8x512xf32> -> vector<8x512xf32>
    %462 = arith.addf %458, %461 : vector<8x512xf32>
    %463 = vector.extract_strided_slice %462 {offsets = [0, 0], sizes = [8, 128], strides = [1, 1]} : vector<8x512xf32> to vector<8x128xf32>
    %464 = arith.negf %463 : vector<8x128xf32>
    %465 = math.exp %464 : vector<8x128xf32>
    %cst_137 = arith.constant 1.000000e+00 : f32
    %466 = vector.broadcast %cst_137 : f32 to vector<8x128xf32>
    %467 = arith.addf %466, %465 : vector<8x128xf32>
    %468 = arith.divf %466, %467 : vector<8x128xf32>
    %469 = vector.extract_strided_slice %462 {offsets = [0, 128], sizes = [8, 128], strides = [1, 1]} : vector<8x512xf32> to vector<8x128xf32>
    %470 = arith.negf %469 : vector<8x128xf32>
    %471 = math.exp %470 : vector<8x128xf32>
    %cst_138 = arith.constant 1.000000e+00 : f32
    %472 = vector.broadcast %cst_138 : f32 to vector<8x128xf32>
    %473 = arith.addf %472, %471 : vector<8x128xf32>
    %474 = arith.divf %472, %473 : vector<8x128xf32>
    %475 = vector.extract_strided_slice %462 {offsets = [0, 256], sizes = [8, 128], strides = [1, 1]} : vector<8x512xf32> to vector<8x128xf32>
    %476 = math.tanh %475 : vector<8x128xf32>
    %477 = vector.extract_strided_slice %462 {offsets = [0, 384], sizes = [8, 128], strides = [1, 1]} : vector<8x512xf32> to vector<8x128xf32>
    %478 = arith.negf %477 : vector<8x128xf32>
    %479 = math.exp %478 : vector<8x128xf32>
    %cst_139 = arith.constant 1.000000e+00 : f32
    %480 = vector.broadcast %cst_139 : f32 to vector<8x128xf32>
    %481 = arith.addf %480, %479 : vector<8x128xf32>
    %482 = arith.divf %480, %481 : vector<8x128xf32>
    %483 = arith.mulf %474, %447 : vector<8x128xf32>
    %484 = arith.mulf %468, %476 : vector<8x128xf32>
    %485 = arith.addf %483, %484 : vector<8x128xf32>
    %486 = math.tanh %485 : vector<8x128xf32>
    %487 = arith.mulf %482, %486 : vector<8x128xf32>
    %488 = vector.broadcast %c4_i32_131 : i32 to vector<8x1xi32>
    %489 = arith.cmpi eq, %488, %4 : vector<8x1xi32>
    %490 = vector.shape_cast %489 : vector<8x1xi1> to vector<8x1xi1>
    %491 = vector.broadcast %490 : vector<8x1xi1> to vector<8x128xi1>
    %492 = arith.select %491, %487, %454 : vector<8x128xi1>, vector<8x128xf32>
    %c5_i32_140 = arith.constant 5 : i32
    %c8_i32_141 = arith.constant 8 : i32
    %493 = arith.muli %c5_i32_140, %c8_i32_141 : i32
    %494 = tpu.assume_multiple %493, 8 : i32
    %495 = arith.index_cast %494 : i32 to index
    %c0_142 = arith.constant 0 : index
    %496 = vector.load %arg12[%495, %c0_142] : memref<64x512xf32, #tpu.memory_space<vmem>>, vector<8x512xf32>
    %497 = arith.truncf %487 : vector<8x128xf32> to vector<8x128xbf16>
    %c0_143 = arith.constant 0 : index
    %c0_144 = arith.constant 0 : index
    %498 = vector.load %arg7[%c0_143, %c0_144] : memref<128x512xbf16, #tpu.memory_space<vmem>>, vector<128x512xbf16>
    %cst_145 = arith.constant dense<0.000000e+00> : vector<8x512xf32>
    %499 = tpu.matmul %497, %498, %cst_145 {dimension_numbers = #tpu.dot_dimension_numbers<[1], [0], [0], [1], [0, 0, 1, 1], [], []>} : vector<8x128xbf16>, vector<128x512xbf16>, vector<8x512xf32> -> vector<8x512xf32>
    %500 = arith.addf %496, %499 : vector<8x512xf32>
    %501 = vector.extract_strided_slice %500 {offsets = [0, 0], sizes = [8, 128], strides = [1, 1]} : vector<8x512xf32> to vector<8x128xf32>
    %502 = arith.negf %501 : vector<8x128xf32>
    %503 = math.exp %502 : vector<8x128xf32>
    %cst_146 = arith.constant 1.000000e+00 : f32
    %504 = vector.broadcast %cst_146 : f32 to vector<8x128xf32>
    %505 = arith.addf %504, %503 : vector<8x128xf32>
    %506 = arith.divf %504, %505 : vector<8x128xf32>
    %507 = vector.extract_strided_slice %500 {offsets = [0, 128], sizes = [8, 128], strides = [1, 1]} : vector<8x512xf32> to vector<8x128xf32>
    %508 = arith.negf %507 : vector<8x128xf32>
    %509 = math.exp %508 : vector<8x128xf32>
    %cst_147 = arith.constant 1.000000e+00 : f32
    %510 = vector.broadcast %cst_147 : f32 to vector<8x128xf32>
    %511 = arith.addf %510, %509 : vector<8x128xf32>
    %512 = arith.divf %510, %511 : vector<8x128xf32>
    %513 = vector.extract_strided_slice %500 {offsets = [0, 256], sizes = [8, 128], strides = [1, 1]} : vector<8x512xf32> to vector<8x128xf32>
    %514 = math.tanh %513 : vector<8x128xf32>
    %515 = vector.extract_strided_slice %500 {offsets = [0, 384], sizes = [8, 128], strides = [1, 1]} : vector<8x512xf32> to vector<8x128xf32>
    %516 = arith.negf %515 : vector<8x128xf32>
    %517 = math.exp %516 : vector<8x128xf32>
    %cst_148 = arith.constant 1.000000e+00 : f32
    %518 = vector.broadcast %cst_148 : f32 to vector<8x128xf32>
    %519 = arith.addf %518, %517 : vector<8x128xf32>
    %520 = arith.divf %518, %519 : vector<8x128xf32>
    %521 = arith.mulf %512, %485 : vector<8x128xf32>
    %522 = arith.mulf %506, %514 : vector<8x128xf32>
    %523 = arith.addf %521, %522 : vector<8x128xf32>
    %524 = math.tanh %523 : vector<8x128xf32>
    %525 = arith.mulf %520, %524 : vector<8x128xf32>
    %526 = vector.broadcast %c5_i32_140 : i32 to vector<8x1xi32>
    %527 = arith.cmpi eq, %526, %4 : vector<8x1xi32>
    %528 = vector.shape_cast %527 : vector<8x1xi1> to vector<8x1xi1>
    %529 = vector.broadcast %528 : vector<8x1xi1> to vector<8x128xi1>
    %530 = arith.select %529, %525, %492 : vector<8x128xi1>, vector<8x128xf32>
    %c6_i32_149 = arith.constant 6 : i32
    %c8_i32_150 = arith.constant 8 : i32
    %531 = arith.muli %c6_i32_149, %c8_i32_150 : i32
    %532 = tpu.assume_multiple %531, 8 : i32
    %533 = arith.index_cast %532 : i32 to index
    %c0_151 = arith.constant 0 : index
    %534 = vector.load %arg12[%533, %c0_151] : memref<64x512xf32, #tpu.memory_space<vmem>>, vector<8x512xf32>
    %535 = arith.truncf %525 : vector<8x128xf32> to vector<8x128xbf16>
    %c0_152 = arith.constant 0 : index
    %c0_153 = arith.constant 0 : index
    %536 = vector.load %arg7[%c0_152, %c0_153] : memref<128x512xbf16, #tpu.memory_space<vmem>>, vector<128x512xbf16>
    %cst_154 = arith.constant dense<0.000000e+00> : vector<8x512xf32>
    %537 = tpu.matmul %535, %536, %cst_154 {dimension_numbers = #tpu.dot_dimension_numbers<[1], [0], [0], [1], [0, 0, 1, 1], [], []>} : vector<8x128xbf16>, vector<128x512xbf16>, vector<8x512xf32> -> vector<8x512xf32>
    %538 = arith.addf %534, %537 : vector<8x512xf32>
    %539 = vector.extract_strided_slice %538 {offsets = [0, 0], sizes = [8, 128], strides = [1, 1]} : vector<8x512xf32> to vector<8x128xf32>
    %540 = arith.negf %539 : vector<8x128xf32>
    %541 = math.exp %540 : vector<8x128xf32>
    %cst_155 = arith.constant 1.000000e+00 : f32
    %542 = vector.broadcast %cst_155 : f32 to vector<8x128xf32>
    %543 = arith.addf %542, %541 : vector<8x128xf32>
    %544 = arith.divf %542, %543 : vector<8x128xf32>
    %545 = vector.extract_strided_slice %538 {offsets = [0, 128], sizes = [8, 128], strides = [1, 1]} : vector<8x512xf32> to vector<8x128xf32>
    %546 = arith.negf %545 : vector<8x128xf32>
    %547 = math.exp %546 : vector<8x128xf32>
    %cst_156 = arith.constant 1.000000e+00 : f32
    %548 = vector.broadcast %cst_156 : f32 to vector<8x128xf32>
    %549 = arith.addf %548, %547 : vector<8x128xf32>
    %550 = arith.divf %548, %549 : vector<8x128xf32>
    %551 = vector.extract_strided_slice %538 {offsets = [0, 256], sizes = [8, 128], strides = [1, 1]} : vector<8x512xf32> to vector<8x128xf32>
    %552 = math.tanh %551 : vector<8x128xf32>
    %553 = vector.extract_strided_slice %538 {offsets = [0, 384], sizes = [8, 128], strides = [1, 1]} : vector<8x512xf32> to vector<8x128xf32>
    %554 = arith.negf %553 : vector<8x128xf32>
    %555 = math.exp %554 : vector<8x128xf32>
    %cst_157 = arith.constant 1.000000e+00 : f32
    %556 = vector.broadcast %cst_157 : f32 to vector<8x128xf32>
    %557 = arith.addf %556, %555 : vector<8x128xf32>
    %558 = arith.divf %556, %557 : vector<8x128xf32>
    %559 = arith.mulf %550, %523 : vector<8x128xf32>
    %560 = arith.mulf %544, %552 : vector<8x128xf32>
    %561 = arith.addf %559, %560 : vector<8x128xf32>
    %562 = math.tanh %561 : vector<8x128xf32>
    %563 = arith.mulf %558, %562 : vector<8x128xf32>
    %564 = vector.broadcast %c6_i32_149 : i32 to vector<8x1xi32>
    %565 = arith.cmpi eq, %564, %4 : vector<8x1xi32>
    %566 = vector.shape_cast %565 : vector<8x1xi1> to vector<8x1xi1>
    %567 = vector.broadcast %566 : vector<8x1xi1> to vector<8x128xi1>
    %568 = arith.select %567, %563, %530 : vector<8x128xi1>, vector<8x128xf32>
    %c7_i32_158 = arith.constant 7 : i32
    %c8_i32_159 = arith.constant 8 : i32
    %569 = arith.muli %c7_i32_158, %c8_i32_159 : i32
    %570 = tpu.assume_multiple %569, 8 : i32
    %571 = arith.index_cast %570 : i32 to index
    %c0_160 = arith.constant 0 : index
    %572 = vector.load %arg12[%571, %c0_160] : memref<64x512xf32, #tpu.memory_space<vmem>>, vector<8x512xf32>
    %573 = arith.truncf %563 : vector<8x128xf32> to vector<8x128xbf16>
    %c0_161 = arith.constant 0 : index
    %c0_162 = arith.constant 0 : index
    %574 = vector.load %arg7[%c0_161, %c0_162] : memref<128x512xbf16, #tpu.memory_space<vmem>>, vector<128x512xbf16>
    %cst_163 = arith.constant dense<0.000000e+00> : vector<8x512xf32>
    %575 = tpu.matmul %573, %574, %cst_163 {dimension_numbers = #tpu.dot_dimension_numbers<[1], [0], [0], [1], [0, 0, 1, 1], [], []>} : vector<8x128xbf16>, vector<128x512xbf16>, vector<8x512xf32> -> vector<8x512xf32>
    %576 = arith.addf %572, %575 : vector<8x512xf32>
    %577 = vector.extract_strided_slice %576 {offsets = [0, 0], sizes = [8, 128], strides = [1, 1]} : vector<8x512xf32> to vector<8x128xf32>
    %578 = arith.negf %577 : vector<8x128xf32>
    %579 = math.exp %578 : vector<8x128xf32>
    %cst_164 = arith.constant 1.000000e+00 : f32
    %580 = vector.broadcast %cst_164 : f32 to vector<8x128xf32>
    %581 = arith.addf %580, %579 : vector<8x128xf32>
    %582 = arith.divf %580, %581 : vector<8x128xf32>
    %583 = vector.extract_strided_slice %576 {offsets = [0, 128], sizes = [8, 128], strides = [1, 1]} : vector<8x512xf32> to vector<8x128xf32>
    %584 = arith.negf %583 : vector<8x128xf32>
    %585 = math.exp %584 : vector<8x128xf32>
    %cst_165 = arith.constant 1.000000e+00 : f32
    %586 = vector.broadcast %cst_165 : f32 to vector<8x128xf32>
    %587 = arith.addf %586, %585 : vector<8x128xf32>
    %588 = arith.divf %586, %587 : vector<8x128xf32>
    %589 = vector.extract_strided_slice %576 {offsets = [0, 256], sizes = [8, 128], strides = [1, 1]} : vector<8x512xf32> to vector<8x128xf32>
    %590 = math.tanh %589 : vector<8x128xf32>
    %591 = vector.extract_strided_slice %576 {offsets = [0, 384], sizes = [8, 128], strides = [1, 1]} : vector<8x512xf32> to vector<8x128xf32>
    %592 = arith.negf %591 : vector<8x128xf32>
    %593 = math.exp %592 : vector<8x128xf32>
    %cst_166 = arith.constant 1.000000e+00 : f32
    %594 = vector.broadcast %cst_166 : f32 to vector<8x128xf32>
    %595 = arith.addf %594, %593 : vector<8x128xf32>
    %596 = arith.divf %594, %595 : vector<8x128xf32>
    %597 = arith.mulf %588, %561 : vector<8x128xf32>
    %598 = arith.mulf %582, %590 : vector<8x128xf32>
    %599 = arith.addf %597, %598 : vector<8x128xf32>
    %600 = math.tanh %599 : vector<8x128xf32>
    %601 = arith.mulf %596, %600 : vector<8x128xf32>
    %602 = vector.broadcast %c7_i32_158 : i32 to vector<8x1xi32>
    %603 = arith.cmpi eq, %602, %4 : vector<8x1xi32>
    %604 = vector.shape_cast %603 : vector<8x1xi1> to vector<8x1xi1>
    %605 = vector.broadcast %604 : vector<8x1xi1> to vector<8x128xi1>
    %606 = arith.select %605, %601, %568 : vector<8x128xi1>, vector<8x128xf32>
    %c8_i32_167 = arith.constant 8 : i32
    %c0_168 = arith.constant 0 : index
    %c0_169 = arith.constant 0 : index
    %607 = vector.load %arg9[%c0_168, %c0_169] : memref<8x128xf32, #tpu.memory_space<vmem>>, vector<8x128xf32>
    tpu.vector_store %arg9[%c0_168, %c0_169], %606 {strides = array<i32>} : memref<8x128xf32, #tpu.memory_space<vmem>>, vector<8x128xf32>,
    return
  }
  func.func @transform_0(%arg0: i32) -> (i32, i32) {
    %c0_i32 = arith.constant 0 : i32
    %c0_i32_0 = arith.constant 0 : i32
    return %arg0, %c0_i32 : i32, i32
  }
  func.func @transform_1(%arg0: i32) -> (i32, i32, i32) {
    %c0_i32 = arith.constant 0 : i32
    %c0_i32_0 = arith.constant 0 : i32
    %c0_i32_1 = arith.constant 0 : i32
    return %arg0, %c0_i32, %c0_i32_0 : i32, i32, i32
  }
  func.func @transform_2(%arg0: i32) -> (i32, i32) {
    %c0_i32 = arith.constant 0 : i32
    %c0_i32_0 = arith.constant 0 : i32
    %c0_i32_1 = arith.constant 0 : i32
    return %c0_i32, %c0_i32_0 : i32, i32
  }
  func.func @transform_3(%arg0: i32) -> (i32, i32) {
    %c0_i32 = arith.constant 0 : i32
    %c0_i32_0 = arith.constant 0 : i32
    %c0_i32_1 = arith.constant 0 : i32
    return %c0_i32, %c0_i32_0 : i32, i32
  }
  func.func @transform_4(%arg0: i32) -> (i32, i32) {
    %c0_i32 = arith.constant 0 : i32
    %c0_i32_0 = arith.constant 0 : i32
    %c0_i32_1 = arith.constant 0 : i32
    return %c0_i32, %c0_i32_0 : i32, i32
  }
  func.func @transform_5(%arg0: i32) -> (i32, i32) {
    %c0_i32 = arith.constant 0 : i32
    %c0_i32_0 = arith.constant 0 : i32
    %c0_i32_1 = arith.constant 0 : i32
    return %c0_i32, %c0_i32_0 : i32, i32
  }
  func.func @transform_6(%arg0: i32) -> (i32, i32) {
    %c0_i32 = arith.constant 0 : i32
    %c0_i32_0 = arith.constant 0 : i32
    %c0_i32_1 = arith.constant 0 : i32
    return %c0_i32, %c0_i32_0 : i32, i32
  }
  func.func @transform_7(%arg0: i32) -> (i32, i32) {
    %c0_i32 = arith.constant 0 : i32
    %c0_i32_0 = arith.constant 0 : i32
    %c0_i32_1 = arith.constant 0 : i32
    return %c0_i32, %c0_i32_0 : i32, i32
  }
  func.func @transform_8(%arg0: i32) -> (i32, i32) {
    %c0_i32 = arith.constant 0 : i32
    %c0_i32_0 = arith.constant 0 : i32
    return %arg0, %c0_i32 : i32, i32
  }
}

</mosaic_0001>

<bundles_post_ra>
// kernel: tpu_custom_call.1
= control target key start
LH: loop header
LB: loop body
LE: loop exit
PB: predicated region body
PF: predicated region fallthrough
CT: control target
= control target key end

     0   :  { %13 = vsyncpa [#allocation6], 0  ;;  %s6714_s0 = inlined_call_operand.vmem [shape: s32[8,1], index: 0, kind: input, shape index: {}]   ;;  %s6715_s1 = inlined_call_operand.vmem [shape: bf16[1,64,16], index: 1, kind: input, shape index: {}]   ;;  %s6716_s2 = inlined_call_operand.vmem [shape: bf16[16,512], index: 2, kind: input, shape index: {}]   ;;  %s6717_s3 = inlined_call_operand.hbm [shape: bf16[128,512], index: 3, kind: input, shape index: {}]   ;;  %s6718_s4 = inlined_call_operand.vmem [shape: f32[1,512], index: 4, kind: input, shape index: {}]   ;;  %s6719_s5 = inlined_call_operand.hbm [shape: bf16[128,512], index: 5, kind: input, shape index: {}]   ;;  %s6720_s6 = inlined_call_operand.hbm [shape: bf16[128,512], index: 6, kind: input, shape index: {}]   ;;  %s6721_s7 = inlined_call_operand.vmem [shape: f32[1,512], index: 7, kind: input, shape index: {}]   ;;  %s6722_s8 = inlined_call_operand.hbm [shape: f32[8,128], index: 8, kind: output, shape index: {}]  }
   0x1   :  { %14 = vsyncpa [#allocation9], 0 }
   0x2   :  { %15 = vsyncpa [#allocation7], 0  ;;  %s5400_s27 = smov [#allocation8]   ;;  %s5401_s29 = smov [#allocation5]  }
   0x3   :  { %s41_s28 = sshll.u32 %s5400_s27, 4  ;;  %s27_s30 = sshll.u32 %s5401_s29, 4  ;;  %s42_s28 = int_to_ptr.vmem [resolvable:$true] %s41_s28  ;;  %s28_s30 = int_to_ptr.vmem [resolvable:$true] %s27_s30 }
   0x4   :  { %s5322_s9 = scalar_lea.vmem %s42_s28, 4096  ;;  %p5327_p1 = scmp.lt.s32.totalorder %s42_s28, %s42_s28 }
   0x5   :  { %p5323_p0 = scmp.ne.s32.totalorder %s42_s28, %s5322_s9  ;;  %p5328_p2 = scmp.lt.s32.totalorder %s5322_s9, %s5322_s9 }
   0x7   :  { %p5329_p3 = por %p5328_p2, %p5327_p1 }
   0x9   :  { %p5330_p4 = pnand %p5329_p3, %p5323_p0 }
   0xb   :  { %5333 = shalt.err (!%p5330_p4)
}
   0xc   :  { %s5402_s10 = smov 256   ;;  %s5403_s11 = smov 16  }
   0xd   :  { %47 = dma.hbm_to_vmem [thread:$0]  %s6719_s5, 4096, %s42_s28, [#allocation9], %s5402_s10, %s5402_s10, %s5403_s11  }
   0xe   :  { %s5342_s14 = scalar_lea.vmem %s28_s30, 4096  ;;  %p5347_p6 = scmp.lt.s32.totalorder %s28_s30, %s28_s30 }
   0xf   :  { %p5343_p5 = scmp.ne.s32.totalorder %s28_s30, %s5342_s14  ;;  %p5348_p7 = scmp.lt.s32.totalorder %s5342_s14, %s5342_s14 }
  0x11   :  { %p5349_p8 = por %p5348_p7, %p5347_p6 }
  0x13   :  { %p5350_p9 = pnand %p5349_p8, %p5343_p5 }
  0x15   :  { %5353 = shalt.err (!%p5350_p9)
}
  0x16   :  { %33 = dma.hbm_to_vmem [thread:$0]  %s6717_s3, 4096, %s28_s30, [#allocation6], %s5402_s10, %s5402_s10, %s5403_s11  }
  0x17   :  { %s5404_s17 = smov [#allocation10]  }
  0x18   :  { %s53_s18 = sshll.u32 %s5404_s17, 4  ;;  %s54_s18 = int_to_ptr.vmem [resolvable:$true] %s53_s18 }
  0x19   :  { %s5362_s19 = scalar_lea.vmem %s54_s18, 4096  ;;  %p5367_p11 = scmp.lt.s32.totalorder %s54_s18, %s54_s18 }
  0x1a   :  { %p5363_p10 = scmp.ne.s32.totalorder %s54_s18, %s5362_s19  ;;  %p5368_p12 = scmp.lt.s32.totalorder %s5362_s19, %s5362_s19 }
  0x1c   :  { %p5369_p13 = por %p5368_p12, %p5367_p11 }
  0x1e   :  { %p5370_p0 = pnand %p5369_p13, %p5363_p10 }
  0x20   :  { %5373 = shalt.err (!%p5370_p0)
}
  0x21   :  { %59 = dma.hbm_to_vmem [thread:$0]  %s6720_s6, 4096, %s54_s18, [#allocation9], %s5402_s10, %s5402_s10, %s5403_s11  }
  0x22   :  { %5394 = dma.done.wait [#allocation6], 4096  }
  0x23   :  { %5395 = vsyncadd [#allocation6], 4294963200 }
  0x24   :  { %5396 = dma.done.wait [#allocation9], 8192  }
  0x25   :  { %5397 = vsyncadd [#allocation9], 4294959104  ;;  %v6727_v0 = vmov 0   ;;  %v4824_v1 = vld [vmem:[%s6716_s2 + $0x4] ss:$16 sps:$4 sm:$0xff]   ;;  %vm150_vm0 = vcmask 130048   ;;  %v90_v41 = vlaneseq }
  0x26   :  { %195 = vmatprep.mubr.bf16.mxu0 %v6727_v0  ;;  %268 = vmatprep.mubr.bf16.mxu1 %v6727_v0  ;;  %v4826_v2 = vld [vmem:[%s6716_s2 + $0xc] ss:$16 sps:$4 sm:$0xff]   ;;  %v4828_v3 = vld [vmem:[%s6716_s2] ss:$16 sps:$4 sm:$0xff]   ;;  %v4829_v4 = vld [vmem:[%s6716_s2 + $0x8] ss:$16 sps:$4 sm:$0xff]  }
  0x27   :  { %4822 = vset.pattern.permute.xlu0 %v6727_v0  ;;  %4823 = vset.pattern.permute.xlu1 %v6727_v0  ;;  %v4830_v5 = vld [vmem:[%s6715_s1] sm:$0xff]   ;;  %v5484_v8 = vld [vmem:[#allocation5 + $0xe8] ss:$16 sps:$4 sm:$0xff]   ;;  %v5487_v9 = vld [vmem:[#allocation5 + $0xec] ss:$16 sps:$4 sm:$0xff]   ;;  %v5639_v42 = vshrl.u32 %v90_v41, 7 }
  0x28   :  { %177 = vmatprep.subr.bf16.mxu0 %v4824_v1  ;;  %250 = vmatprep.subr.bf16.mxu1 %v4826_v2  ;;  %v5480_v6 = vld [vmem:[#allocation5 + $0xe0] ss:$16 sps:$4 sm:$0xff]   ;;  %v5482_v7 = vld [vmem:[#allocation5 + $0xe4] ss:$16 sps:$4 sm:$0xff]   ;;  %v5497_v12 = vld [vmem:[#allocation5 + $0xcc] ss:$16 sps:$4 sm:$0xff]  }
  0x29   :  { %178 = vmatpush1.bf16.msra.mxu0 %v4828_v3  ;;  %251 = vmatpush1.bf16.msra.mxu1 %v4829_v4  ;;  %v5491_v10 = vld [vmem:[#allocation5 + $0xc4] ss:$16 sps:$4 sm:$0xff]   ;;  %v5495_v11 = vld [vmem:[#allocation5 + $0xc0] ss:$16 sps:$4 sm:$0xff]   ;;  %v5501_v13 = vld [vmem:[#allocation5 + $0xc8] ss:$16 sps:$4 sm:$0xff]  }
  0x2a   :  { %540 = vmatprep.subr.bf16.mxu0 %v5482_v7  ;;  %581 = vmatprep.subr.bf16.mxu1 %v5487_v9  ;;  %v4843_v14 = vld [vmem:[%s6715_s1 + $0x8] sm:$0xff]   ;;  %v5509_v15 = vld [vmem:[#allocation5 + $0xa4] ss:$16 sps:$4 sm:$0xff]   ;;  %v5512_v16 = vld [vmem:[#allocation5 + $0xa0] ss:$16 sps:$4 sm:$0xff]   ;;  %6731 = vst [vmem:[#allocation15_spill] sm:$0xff] %v5639_v42 }
  0x2b   :  { %v5514_v17 = vld [vmem:[#allocation5 + $0xac] ss:$16 sps:$4 sm:$0xff]   ;;  %v5518_v18 = vld [vmem:[#allocation5 + $0xa8] ss:$16 sps:$4 sm:$0xff]   ;;  %v5520_v19 = vld [vmem:[#allocation5 + $0x84] ss:$16 sps:$4 sm:$0xff]  }
  0x2c   :  { %4439 = vmatmul.mubr.msk.bf16.vlgmr.msra.gmra.mxu0 %vm150_vm0, %v4830_v5  ;;  %4443 = vmatmul.mubr.msk.bf16.vlgmr.msra.gmra.mxu1 %vm150_vm0, %v4830_v5  ;;  %v5525_v20 = vld [vmem:[#allocation5 + $0x8c] ss:$16 sps:$4 sm:$0xff]   ;;  %v5528_v21 = vld [vmem:[#allocation5 + $0x80] ss:$16 sps:$4 sm:$0xff]   ;;  %v5533_v22 = vld [vmem:[#allocation5 + $0x88] ss:$16 sps:$4 sm:$0xff]  }
  0x2d   :  { %541 = vmatpush1.bf16.msra.mxu0 %v5480_v6  ;;  %582 = vmatpush1.bf16.msra.mxu1 %v5484_v8  ;;  %v5535_v23 = vld [vmem:[#allocation5 + $0x64] ss:$16 sps:$4 sm:$0xff]   ;;  %v5539_v24 = vld [vmem:[#allocation5 + $0x6c] ss:$16 sps:$4 sm:$0xff]   ;;  %v5545_v26 = vld [vmem:[#allocation5 + $0x60] ss:$16 sps:$4 sm:$0xff]  }
  0x2e   :  { %542 = vmatprep.subr.bf16.mxu0 %v5491_v10  ;;  %583 = vmatprep.subr.bf16.mxu1 %v5497_v12  ;;  %v4856_v25 = vld [vmem:[%s6715_s1 + $0x10] sm:$0xff]   ;;  %v5549_v27 = vld [vmem:[#allocation5 + $0x68] ss:$16 sps:$4 sm:$0xff]   ;;  %v5554_v29 = vld [vmem:[#allocation5 + $0x4c] ss:$16 sps:$4 sm:$0xff]   ;;  %v6723_v43 = vsub.s32 2, %v5639_v42 }
  0x2f   :  { %205 = vmatprep.mubr.bf16.mxu0 %v6727_v0  ;;  %278 = vmatprep.mubr.bf16.mxu1 %v6727_v0  ;;  %v5551_v28 = vld [vmem:[#allocation5 + $0x44] ss:$16 sps:$4 sm:$0xff]   ;;  %v5558_v30 = vld [vmem:[#allocation5 + $0x40] ss:$16 sps:$4 sm:$0xff]   ;;  %v5561_v31 = vld [vmem:[#allocation5 + $0x48] ss:$16 sps:$4 sm:$0xff]  }
  0x30   :  { %v4869_v32 = vld [vmem:[%s6715_s1 + $0x18] sm:$0xff]   ;;  %v5569_v33 = vld [vmem:[#allocation5 + $0x24] ss:$16 sps:$4 sm:$0xff]   ;;  %v5573_v34 = vld [vmem:[#allocation5 + $0x20] ss:$16 sps:$4 sm:$0xff]   ;;  %v6726_v44 = vsub.s32 0, %v5639_v42 }
  0x31   :  { %543 = vmatpush1.bf16.msra.mxu0 %v5495_v11  ;;  %584 = vmatpush1.bf16.msra.mxu1 %v5501_v13  ;;  %v5575_v35 = vld [vmem:[#allocation5 + $0x2c] ss:$16 sps:$4 sm:$0xff]   ;;  %v5577_v36 = vld [vmem:[#allocation5 + $0x28] ss:$16 sps:$4 sm:$0xff]   ;;  %v5579_v37 = vld [vmem:[#allocation5 + $0x4] ss:$16 sps:$4 sm:$0xff]  }
  0x32   :  { %544 = vmatprep.subr.bf16.mxu0 %v5509_v15  ;;  %585 = vmatprep.subr.bf16.mxu1 %v5514_v17  ;;  %v5582_v38 = vld [vmem:[#allocation5 + $0xc] ss:$16 sps:$4 sm:$0xff]   ;;  %v5587_v39 = vld [vmem:[#allocation5] ss:$16 sps:$4 sm:$0xff]   ;;  %v5591_v40 = vld [vmem:[#allocation5 + $0x8] ss:$16 sps:$4 sm:$0xff]  }
  0x33   :  { %v6724_v45 = vsub.s32 3, %v5639_v42  ;;  %v88_v46 = vld [vmem:[%s6718_s4] sm:$0xf]  ;;  %v6725_v50 = vsub.s32 1, %v5639_v42 }
  0x34   :  { %4440 = vmatmul.mubr.msk.bf16.gmra.mxu0 %vm150_vm0, %v4843_v14  ;;  %4444 = vmatmul.mubr.msk.bf16.gmra.mxu1 %vm150_vm0, %v4843_v14  ;;  %v5653_v49 = vrot.slane %v88_v46, %v6723_v43  ;;  %v93_v53 = vrot.slane %v88_v46, %v6726_v44 }
  0x35   :  { %545 = vmatpush1.bf16.msra.mxu0 %v5512_v16  ;;  %215 = vmatprep.mubr.bf16.mxu0 %v6727_v0  ;;  %v5664_v54 = vrot.slane %v88_v46, %v6724_v45  ;;  %v97_v57 = vrot.slane %v88_v46, %v6725_v50 }
  0x36   :  { %586 = vmatpush1.bf16.msra.mxu1 %v5518_v18  ;;  %546 = vmatprep.subr.bf16.mxu0 %v5520_v19 }
  0x37   :  { %587 = vmatprep.subr.bf16.mxu1 %v5525_v20  ;;  %288 = vmatprep.mubr.bf16.mxu1 %v6727_v0 }
  0x39   :  { %547 = vmatpush1.bf16.msra.mxu0 %v5528_v21 }
  0x3a   :  { %588 = vmatpush1.bf16.msra.mxu1 %v5533_v22  ;;  %548 = vmatprep.subr.bf16.mxu0 %v5535_v23 }
  0x3b   :  { %589 = vmatprep.subr.bf16.mxu1 %v5539_v24 }
  0x3c   :  { %4441 = vmatmul.mubr.msk.bf16.gmra.mxu0 %vm150_vm0, %v4856_v25  ;;  %4445 = vmatmul.mubr.msk.bf16.gmra.mxu1 %vm150_vm0, %v4856_v25 }
  0x3d   :  { %549 = vmatpush1.bf16.msra.mxu0 %v5545_v26  ;;  %225 = vmatprep.mubr.bf16.mxu0 %v6727_v0 }
  0x3e   :  { %590 = vmatpush1.bf16.msra.mxu1 %v5549_v27  ;;  %550 = vmatprep.subr.bf16.mxu0 %v5551_v28 }
  0x3f   :  { %591 = vmatprep.subr.bf16.mxu1 %v5554_v29  ;;  %298 = vmatprep.mubr.bf16.mxu1 %v6727_v0 }
  0x41   :  { %551 = vmatpush1.bf16.msra.mxu0 %v5558_v30 }
  0x42   :  { %592 = vmatpush1.bf16.msra.mxu1 %v5561_v31  ;;  %552 = vmatprep.subr.bf16.mxu0 %v5569_v33 }
  0x43   :  { %593 = vmatprep.subr.bf16.mxu1 %v5575_v35 }
  0x44   :  { %4442 = vmatmul.mubr.msk.bf16.gmra.mxu0 %vm150_vm0, %v4869_v32  ;;  %4446 = vmatmul.mubr.msk.bf16.gmra.mxu1 %vm150_vm0, %v4869_v32 }
  0x45   :  { %553 = vmatpush1.bf16.msra.mxu0 %v5573_v34  ;;  %572 = vmatprep.mubr.bf16.mxu0 %v6727_v0 }
  0x46   :  { %594 = vmatpush1.bf16.msra.mxu1 %v5577_v36  ;;  %554 = vmatprep.subr.bf16.mxu0 %v5579_v37 }
  0x47   :  { %595 = vmatprep.subr.bf16.mxu1 %v5582_v38  ;;  %613 = vmatprep.mubr.bf16.mxu1 %v6727_v0 }
  0x49   :  { %555 = vmatpush1.bf16.msra.mxu0 %v5587_v39 }
  0x4a   :  { %596 = vmatpush1.bf16.msra.mxu1 %v5591_v40  ;;  %851 = vmatprep.subr.bf16.mxu0 %v5482_v7 }
  0x4b   :  { %892 = vmatprep.subr.bf16.mxu1 %v5487_v9 }
  0x4c   :  { %573 = vmatmul.mubr.bf16.vlgmr.msra.gmra.mxu0 %v6727_v0 }
  0x4d   :  { %614 = vmatmul.mubr.bf16.vlgmr.msra.gmra.mxu1 %v6727_v0  ;;  %852 = vmatpush1.bf16.msra.mxu0 %v5480_v6 }
  0x4e   :  { %893 = vmatpush1.bf16.msra.mxu1 %v5484_v8  ;;  %853 = vmatprep.subr.bf16.mxu0 %v5491_v10 }
  0x4f   :  { %894 = vmatprep.subr.bf16.mxu1 %v5497_v12  ;;  %883 = vmatprep.mubr.bf16.mxu0 %v6727_v0 }
  0x50   :  { %924 = vmatprep.mubr.bf16.mxu1 %v6727_v0 }
  0x51   :  { %854 = vmatpush1.bf16.msra.mxu0 %v5495_v11 }
  0x52   :  { %895 = vmatpush1.bf16.msra.mxu1 %v5501_v13  ;;  %855 = vmatprep.subr.bf16.mxu0 %v5509_v15 }
  0x53   :  { %896 = vmatprep.subr.bf16.mxu1 %v5514_v17 }
  0x55   :  { %856 = vmatpush1.bf16.msra.mxu0 %v5512_v16 }
  0x56   :  { %897 = vmatpush1.bf16.msra.mxu1 %v5518_v18  ;;  %857 = vmatprep.subr.bf16.mxu0 %v5520_v19 }
  0x57   :  { %898 = vmatprep.subr.bf16.mxu1 %v5525_v20 }
  0x59   :  { %858 = vmatpush1.bf16.msra.mxu0 %v5528_v21 }
  0x5a   :  { %899 = vmatpush1.bf16.msra.mxu1 %v5533_v22  ;;  %859 = vmatprep.subr.bf16.mxu0 %v5535_v23 }
  0x5b   :  { %900 = vmatprep.subr.bf16.mxu1 %v5539_v24 }
  0x5d   :  { %860 = vmatpush1.bf16.msra.mxu0 %v5545_v26 }
  0x5e   :  { %901 = vmatpush1.bf16.msra.mxu1 %v5549_v27  ;;  %861 = vmatprep.subr.bf16.mxu0 %v5551_v28 }
  0x5f   :  { %902 = vmatprep.subr.bf16.mxu1 %v5554_v29 }
  0x61   :  { %862 = vmatpush1.bf16.msra.mxu0 %v5558_v30 }
  0x62   :  { %903 = vmatpush1.bf16.msra.mxu1 %v5561_v31  ;;  %863 = vmatprep.subr.bf16.mxu0 %v5569_v33 }
  0x63   :  { %904 = vmatprep.subr.bf16.mxu1 %v5575_v35 }
  0x65   :  { %864 = vmatpush1.bf16.msra.mxu0 %v5573_v34 }
  0x66   :  { %905 = vmatpush1.bf16.msra.mxu1 %v5577_v36  ;;  %865 = vmatprep.subr.bf16.mxu0 %v5579_v37 }
  0x67   :  { %906 = vmatprep.subr.bf16.mxu1 %v5582_v38 }
  0x69   :  { %866 = vmatpush1.bf16.msra.mxu0 %v5587_v39 }
  0x6a   :  { %907 = vmatpush1.bf16.msra.mxu1 %v5591_v40  ;;  %1163 = vmatprep.subr.bf16.mxu0 %v5482_v7 }
  0x6b   :  { %1204 = vmatprep.subr.bf16.mxu1 %v5487_v9 }
  0xec   :  { %v5647_v47 = vpop.f32.mrf.mxu0  ;;  %v5649_v48 = vpop.f32.mrf.mxu1 }
  0xee   :  { %v5656_v51 = vpop.f32.mrf.mxu0  ;;  %v5658_v52 = vpop.f32.mrf.mxu1 }
  0xf0   :  { %v201_v55 = vpop.f32.mrf.mxu0  ;;  %v274_v56 = vpop.f32.mrf.mxu1 }
  0xf1   :  { %v5668_v58 = vadd.f32 %v201_v55, %v93_v53  ;;  %v5671_v59 = vadd.f32 %v274_v56, %v5653_v49 }
  0xf2   :  { %v203_v60 = vpop.f32.mrf.mxu0  ;;  %v276_v61 = vpop.f32.mrf.mxu1 }
  0xf3   :  { %v5673_v62 = vadd.f32 %v203_v60, %v97_v57  ;;  %v5676_v63 = vadd.f32 %v276_v61, %v5664_v54 }
  0xf4   :  { %v207_v1 = vpop.f32.mrf.mxu0  ;;  %v280_v2 = vpop.f32.mrf.mxu1 }
  0xf5   :  { %v5678_v3 = vadd.f32 %v207_v1, %v93_v53  ;;  %v5681_v4 = vadd.f32 %v280_v2, %v5653_v49 }
  0xf6   :  { %v209_v5 = vpop.f32.mrf.mxu0  ;;  %v282_v14 = vpop.f32.mrf.mxu1 }
  0xf7   :  { %6732 = vst [vmem:[#allocation16_spill] sm:$0xff] %v5681_v4  ;;  %v5683_v25 = vadd.f32 %v209_v5, %v97_v57  ;;  %v5686_v32 = vadd.f32 %v282_v14, %v5664_v54 }
  0xf8   :  { %v211_v41 = vpop.f32.mrf.mxu0  ;;  %v284_v46 = vpop.f32.mrf.mxu1 }
  0xf9   :  { %v5688_v55 = vadd.f32 %v211_v41, %v93_v53  ;;  %v5691_v56 = vadd.f32 %v284_v46, %v5653_v49 }
  0xfa   :  { %v213_v60 = vpop.f32.mrf.mxu0  ;;  %v286_v61 = vpop.f32.mrf.mxu1 }
  0xfb   :  { %6733 = vst [vmem:[#allocation17_spill] sm:$0xff] %v5688_v55  ;;  %6734 = vst [vmem:[#allocation18_spill] sm:$0xff] %v5691_v56  ;;  %v5693_v1 = vadd.f32 %v213_v60, %v97_v57  ;;  %v5696_v2 = vadd.f32 %v286_v61, %v5664_v54 }
  0xfc   :  { %v217_v43 = vpop.f32.mrf.mxu0  ;;  %v290_v5 = vpop.f32.mrf.mxu1 }
  0xfd   :  { %6735 = vst [vmem:[#allocation19_spill] sm:$0xff] %v5693_v1  ;;  %6736 = vst [vmem:[#allocation20_spill] sm:$0xff] %v5696_v2  ;;  %v5698_v45 = vadd.f32 %v217_v43, %v93_v53  ;;  %v5701_v14 = vadd.f32 %v290_v5, %v5653_v49 }
  0xfe   :  { %v219_v50 = vpop.f32.mrf.mxu0  ;;  %v292_v41 = vpop.f32.mrf.mxu1 }
  0xff   :  { %6737 = vst [vmem:[#allocation21_spill] sm:$0xff] %v5698_v45  ;;  %6738 = vst [vmem:[#allocation22_spill] sm:$0xff] %v5701_v14  ;;  %v5703_v44 = vadd.f32 %v219_v50, %v97_v57  ;;  %v5706_v46 = vadd.f32 %v292_v41, %v5664_v54 }
 0x100   :  { %v221_v0 = vpop.f32.mrf.mxu0  ;;  %v294_v60 = vpop.f32.mrf.mxu1 }
 0x101   :  { %6739 = vst [vmem:[#allocation23_spill] sm:$0xff] %v5703_v44  ;;  %6740 = vst [vmem:[#allocation24_spill] sm:$0xff] %v5706_v46  ;;  %v5708_v42 = vadd.f32 %v221_v0, %v93_v53  ;;  %v5711_v61 = vadd.f32 %v294_v60, %v5653_v49 }
 0x102   :  { %v223_v56 = vpop.f32.mrf.mxu0  ;;  %v296_v43 = vpop.f32.mrf.mxu1 }
 0x103   :  { %6741 = vst [vmem:[#allocation25_spill] sm:$0xff] %v5708_v42  ;;  %6742 = vst [vmem:[#allocation26_spill] sm:$0xff] %v5711_v61  ;;  %v5713_v45 = vadd.f32 %v223_v56, %v97_v57  ;;  %v5716_v5 = vadd.f32 %v296_v43, %v5664_v54 }
 0x104   :  { %v227_v14 = vpop.f32.mrf.mxu0  ;;  %v300_v50 = vpop.f32.mrf.mxu1 }
 0x105   :  { %6743 = vst [vmem:[#allocation27_spill] sm:$0xff] %v5713_v45  ;;  %6744 = vst [vmem:[#allocation28_spill] sm:$0xff] %v5716_v5  ;;  %v5718_v44 = vadd.f32 %v227_v14, %v93_v53  ;;  %v5721_v41 = vadd.f32 %v300_v50, %v5653_v49 }
 0x106   :  { %v229_v46 = vpop.f32.mrf.mxu0  ;;  %v302_v0 = vpop.f32.mrf.mxu1 }
 0x107   :  { %6745 = vst [vmem:[#allocation29_spill] sm:$0xff] %v5718_v44  ;;  %6746 = vst [vmem:[#allocation30_spill] sm:$0xff] %v5721_v41  ;;  %v5723_v42 = vadd.f32 %v229_v46, %v97_v57  ;;  %v5726_v60 = vadd.f32 %v302_v0, %v5664_v54  ;;  %v198_v44 = vadd.f32 %v5647_v47, %v93_v53 }
 0x108   :  { %v231_v61 = vpop.f32.mrf.mxu0  ;;  %v304_v56 = vpop.f32.mrf.mxu1  ;;  %v200_v0 = vadd.f32 %v5656_v51, %v97_v57  ;;  %v271_v51 = vadd.f32 %v5649_v48, %v5653_v49 }
 0x109   :  { %6747 = vst [vmem:[#allocation31_spill] sm:$0xff] %v5723_v42  ;;  %6748 = vst [vmem:[#allocation32_spill] sm:$0xff] %v5726_v60  ;;  %v5728_v45 = vadd.f32 %v231_v61, %v93_v53  ;;  %v5731_v43 = vadd.f32 %v304_v56, %v5653_v49  ;;  %v273_v53 = vadd.f32 %v5658_v52, %v5664_v54 }
 0x10a   :  { %v233_v5 = vpop.f32.mrf.mxu0  ;;  %v306_v14 = vpop.f32.mrf.mxu1 }
 0x10b   :  { %6749 = vst [vmem:[#allocation33_spill] sm:$0xff] %v5728_v45  ;;  %6750 = vst [vmem:[#allocation34_spill] sm:$0xff] %v5731_v43  ;;  %v5734_v50 = vadd.f32 %v233_v5, %v97_v57  ;;  %v5737_v41 = vadd.f32 %v306_v14, %v5664_v54 }
 0x10c   :  { %v574_v46 = vpop.f32.mrf.mxu0 }
 0x10d   :  { %v622_v60 = vadd.f32 %v574_v46, %v198_v44  ;;  %v615_v42 = vpop.f32.mrf.mxu1 }
 0x10e   :  { %v576_v2 = vpop.f32.mrf.mxu0  ;;  %v624_v14 = vadd.f32 %v615_v42, %v271_v51 }
 0x10f   :  { %v4479_v61 = vmul.f32 -1.442695, %v622_v60  ;;  %v623_v45 = vadd.f32 %v576_v2, %v200_v0  ;;  %v617_v1 = vpop.f32.mrf.mxu1 }
 0x110   :  { %v578_v56 = vpop.f32.mrf.mxu0  ;;  %v625_v5 = vadd.f32 %v617_v1, %v273_v53 }
 0x111   :  { %5026 = vpow2.f32 %v4479_v61  ;;  %v4480_v43 = vmul.f32 -1.442695, %v623_v45  ;;  %v619_v55 = vpop.f32.mrf.mxu1  ;;  %v6751_v56 = vmov 0  }
 0x112   :  { %v579_v4 = vpop.f32.mrf.mxu0  ;;  %v4481_v44 = vmul.f32 -1.442695, %v625_v5 }
 0x113   :  { %5028 = vpow2.f32 %v4480_v43  ;;  %v620_v47 = vpop.f32.mrf.mxu1 }
 0x114   :  { %5030 = vpow2.f32 %v4481_v44 }
 0x11e   :  { %v5027_v57 = vpop.eup %5026 }
 0x11f   :  { %v629_v60 = vadd.f32 1.0, %v5027_v57 }
 0x120   :  { %v5029_v2 = vpop.eup %5028 }
 0x121   :  { %5032 = vrcp.f32 %v629_v60  ;;  %v635_v46 = vadd.f32 1.0, %v5029_v2  ;;  %v5031_v45 = vpop.eup %5030 }
 0x122   :  { %5034 = vtanh.f32 %v624_v14  ;;  %v642_v0 = vadd.f32 1.0, %v5031_v45 }
 0x123   :  { %5036 = vrcp.f32 %v635_v46 }
 0x124   :  { %5038 = vrcp.f32 %v642_v0 }
 0x12e   :  { %v5033_v4 = vpop.eup %5032 }
 0x12f   :  { %v5035_v55 = vpop.eup %5034 }
 0x130   :  { %v5037_v43 = vpop.eup %5036  ;;  %v646_v54 = vmul.f32 %v5035_v55, %v5033_v4 }
 0x131   :  { %v645_v52 = vmul.f32 0.0, %v5037_v43  ;;  %v5039_v42 = vpop.eup %5038 }
 0x133   :  { %v5744_v1 = vadd.f32 %v646_v54, %v645_v52 }
 0x135   :  { %5040 = vtanh.f32 %v5744_v1 }
 0x142   :  { %v5041_v48 = vpop.eup %5040 }
 0x143   :  { %v5747_v49 = vmul.f32 %v5041_v48, %v5039_v42 }
 0x145   :  { %v658_v61 = vpack.c.bf16 %v5747_v49, %v5747_v49 }
 0x147   :  { %884 = vmatmul.mubr.bf16.vlgmr.msra.gmra.mxu0 %v658_v61  ;;  %925 = vmatmul.mubr.bf16.vlgmr.msra.gmra.mxu1 %v658_v61 }
 0x148   :  { %1164 = vmatpush1.bf16.msra.mxu0 %v5480_v6  ;;  %1205 = vmatpush1.bf16.msra.mxu1 %v5484_v8 }
 0x149   :  { %1165 = vmatprep.subr.bf16.mxu0 %v5491_v10  ;;  %1206 = vmatprep.subr.bf16.mxu1 %v5497_v12 }
 0x14a   :  { %1195 = vmatprep.mubr.bf16.mxu0 %v6751_v56  ;;  %1236 = vmatprep.mubr.bf16.mxu1 %v6751_v56 }
 0x14c   :  { %1166 = vmatpush1.bf16.msra.mxu0 %v5495_v11  ;;  %1207 = vmatpush1.bf16.msra.mxu1 %v5501_v13 }
 0x14d   :  { %1167 = vmatprep.subr.bf16.mxu0 %v5509_v15  ;;  %1208 = vmatprep.subr.bf16.mxu1 %v5514_v17 }
 0x150   :  { %1168 = vmatpush1.bf16.msra.mxu0 %v5512_v16  ;;  %1209 = vmatpush1.bf16.msra.mxu1 %v5518_v18 }
 0x151   :  { %1169 = vmatprep.subr.bf16.mxu0 %v5520_v19  ;;  %1210 = vmatprep.subr.bf16.mxu1 %v5525_v20 }
 0x154   :  { %1170 = vmatpush1.bf16.msra.mxu0 %v5528_v21  ;;  %1211 = vmatpush1.bf16.msra.mxu1 %v5533_v22 }
 0x155   :  { %1171 = vmatprep.subr.bf16.mxu0 %v5535_v23  ;;  %1212 = vmatprep.subr.bf16.mxu1 %v5539_v24 }
 0x158   :  { %1172 = vmatpush1.bf16.msra.mxu0 %v5545_v26  ;;  %1213 = vmatpush1.bf16.msra.mxu1 %v5549_v27 }
 0x159   :  { %1173 = vmatprep.subr.bf16.mxu0 %v5551_v28  ;;  %1214 = vmatprep.subr.bf16.mxu1 %v5554_v29 }
 0x15c   :  { %1174 = vmatpush1.bf16.msra.mxu0 %v5558_v30  ;;  %1215 = vmatpush1.bf16.msra.mxu1 %v5561_v31 }
 0x15d   :  { %1175 = vmatprep.subr.bf16.mxu0 %v5569_v33  ;;  %1216 = vmatprep.subr.bf16.mxu1 %v5575_v35 }
 0x160   :  { %1176 = vmatpush1.bf16.msra.mxu0 %v5573_v34  ;;  %1217 = vmatpush1.bf16.msra.mxu1 %v5577_v36 }
 0x161   :  { %1177 = vmatprep.subr.bf16.mxu0 %v5579_v37  ;;  %1218 = vmatprep.subr.bf16.mxu1 %v5582_v38 }
 0x164   :  { %1178 = vmatpush1.bf16.msra.mxu0 %v5587_v39  ;;  %1219 = vmatpush1.bf16.msra.mxu1 %v5591_v40 }
 0x165   :  { %1475 = vmatprep.subr.bf16.mxu0 %v5482_v7  ;;  %1516 = vmatprep.subr.bf16.mxu1 %v5487_v9 }
 0x207   :  { %v885_v47 = vpop.f32.mrf.mxu0  ;;  %v926_v53 = vpop.f32.mrf.mxu1 }
 0x208   :  { %v933_v5 = vadd.f32 %v885_v47, %v5668_v58  ;;  %v935_v9 = vadd.f32 %v926_v53, %v5671_v59 }
 0x209   :  { %v887_v51 = vpop.f32.mrf.mxu0  ;;  %v928_v44 = vpop.f32.mrf.mxu1 }
 0x20a   :  { %v4514_v57 = vmul.f32 -1.442695, %v933_v5  ;;  %v934_v14 = vadd.f32 %v887_v51, %v5673_v62  ;;  %v936_v7 = vadd.f32 %v928_v44, %v5676_v63 }
 0x20b   :  { %v889_v60 = vpop.f32.mrf.mxu0  ;;  %v930_v2 = vpop.f32.mrf.mxu1 }
 0x20c   :  { %5042 = vpow2.f32 %v4514_v57  ;;  %v4515_v46 = vmul.f32 -1.442695, %v934_v14  ;;  %v4516_v55 = vmul.f32 -1.442695, %v936_v7  ;;  %v5847_v57 = vld [vmem:[#allocation5 + $0xe0] ss:$16 sps:$4 sm:$0xff]  }
 0x20d   :  { %v890_v45 = vpop.f32.mrf.mxu0  ;;  %v931_v4 = vpop.f32.mrf.mxu1  ;;  %v5849_v14 = vld [vmem:[#allocation5 + $0xe8] ss:$16 sps:$4 sm:$0xff]   ;;  %v5855_v60 = vld [vmem:[#allocation5 + $0xc4] ss:$16 sps:$4 sm:$0xff]   ;;  %v5857_v2 = vld [vmem:[#allocation5 + $0xcc] ss:$16 sps:$4 sm:$0xff]  }
 0x20e   :  { %5044 = vpow2.f32 %v4515_v46  ;;  %v5859_v46 = vld [vmem:[#allocation5 + $0xc0] ss:$16 sps:$4 sm:$0xff]   ;;  %v5861_v45 = vld [vmem:[#allocation5 + $0xc8] ss:$16 sps:$4 sm:$0xff]   ;;  %v5867_v4 = vld [vmem:[#allocation5 + $0xa4] ss:$16 sps:$4 sm:$0xff]  }
 0x20f   :  { %5046 = vtanh.f32 %v935_v9  ;;  %v5869_v7 = vld [vmem:[#allocation5 + $0xac] ss:$16 sps:$4 sm:$0xff]   ;;  %v5871_v9 = vld [vmem:[#allocation5 + $0xa0] ss:$16 sps:$4 sm:$0xff]  }
 0x210   :  { %5048 = vpow2.f32 %v4516_v55  ;;  %v5873_v55 = vld [vmem:[#allocation5 + $0xa8] ss:$16 sps:$4 sm:$0xff]  }
 0x219   :  { %v5043_v43 = vpop.eup %5042 }
 0x21a   :  { %v940_v0 = vadd.f32 1.0, %v5043_v43  ;;  %v5879_v43 = vld [vmem:[#allocation5 + $0x84] ss:$16 sps:$4 sm:$0xff]  }
 0x21b   :  { %v5045_v58 = vpop.eup %5044 }
 0x21c   :  { %5050 = vrcp.f32 %v940_v0  ;;  %v946_v52 = vadd.f32 1.0, %v5045_v58  ;;  %v5047_v62 = vpop.eup %5046  ;;  %v5881_v0 = vld [vmem:[#allocation5 + $0x8c] ss:$16 sps:$4 sm:$0xff]   ;;  %v5883_v58 = vld [vmem:[#allocation5 + $0x80] ss:$16 sps:$4 sm:$0xff]  }
 0x21d   :  { %v5049_v54 = vpop.eup %5048 }
 0x21e   :  { %5052 = vrcp.f32 %v946_v52  ;;  %v953_v47 = vadd.f32 1.0, %v5049_v54  ;;  %v5885_v52 = vld [vmem:[#allocation5 + $0x88] ss:$16 sps:$4 sm:$0xff]   ;;  %v5891_v54 = vld [vmem:[#allocation5 + $0x6c] ss:$16 sps:$4 sm:$0xff]  }
 0x220   :  { %5054 = vrcp.f32 %v953_v47  ;;  %v5903_v47 = vld [vmem:[#allocation5 + $0x4c] ss:$16 sps:$4 sm:$0xff]  }
 0x229   :  { %v5051_v42 = vpop.eup %5050 }
 0x22a   :  { %v957_v48 = vmul.f32 %v5051_v42, %v5047_v62  ;;  %v5889_v62 = vld [vmem:[#allocation5 + $0x64] ss:$16 sps:$4 sm:$0xff]   ;;  %v5895_v42 = vld [vmem:[#allocation5 + $0x60] ss:$16 sps:$4 sm:$0xff]  }
 0x22b   :  { %v5053_v61 = vpop.eup %5052 }
 0x22c   :  { %v956_v5 = vmul.f32 %v5053_v61, %v5744_v1  ;;  %v5845_v1 = vld [vmem:[#allocation5 + $0xec] ss:$16 sps:$4 sm:$0xff]   ;;  %v5901_v61 = vld [vmem:[#allocation5 + $0x44] ss:$16 sps:$4 sm:$0xff]  }
 0x22d   :  { %v5055_v59 = vpop.eup %5054 }
 0x22e   :  { %v5790_v63 = vadd.f32 %v957_v48, %v956_v5  ;;  %v5897_v48 = vld [vmem:[#allocation5 + $0x68] ss:$16 sps:$4 sm:$0xff]   ;;  %v5907_v5 = vld [vmem:[#allocation5 + $0x40] ss:$16 sps:$4 sm:$0xff]  }
 0x230   :  { %5056 = vtanh.f32 %v5790_v63 }
 0x23d   :  { %v5057_v53 = vpop.eup %5056 }
 0x23e   :  { %v5793_v51 = vmul.f32 %v5057_v53, %v5055_v59  ;;  %v5913_v59 = vld [vmem:[#allocation5 + $0x24] ss:$16 sps:$4 sm:$0xff]   ;;  %v5915_v53 = vld [vmem:[#allocation5 + $0x2c] ss:$16 sps:$4 sm:$0xff]  }
 0x240   :  { %v970_v44 = vpack.c.bf16 %v5793_v51, %v5793_v51 }
 0x242   :  { %1196 = vmatmul.mubr.bf16.vlgmr.msra.gmra.mxu0 %v970_v44  ;;  %1237 = vmatmul.mubr.bf16.vlgmr.msra.gmra.mxu1 %v970_v44  ;;  %v5919_v44 = vld [vmem:[#allocation5 + $0x20] ss:$16 sps:$4 sm:$0xff]  }
 0x243   :  { %1476 = vmatpush1.bf16.msra.mxu0 %v5480_v6  ;;  %1517 = vmatpush1.bf16.msra.mxu1 %v5484_v8 }
 0x244   :  { %1477 = vmatprep.subr.bf16.mxu0 %v5491_v10  ;;  %1518 = vmatprep.subr.bf16.mxu1 %v5497_v12 }
 0x245   :  { %1507 = vmatprep.mubr.bf16.mxu0 %v6751_v56  ;;  %1548 = vmatprep.mubr.bf16.mxu1 %v6751_v56 }
 0x247   :  { %1478 = vmatpush1.bf16.msra.mxu0 %v5495_v11  ;;  %1519 = vmatpush1.bf16.msra.mxu1 %v5501_v13 }
 0x248   :  { %1479 = vmatprep.subr.bf16.mxu0 %v5509_v15  ;;  %1520 = vmatprep.subr.bf16.mxu1 %v5514_v17 }
 0x24b   :  { %1480 = vmatpush1.bf16.msra.mxu0 %v5512_v16  ;;  %1521 = vmatpush1.bf16.msra.mxu1 %v5518_v18 }
 0x24c   :  { %1481 = vmatprep.subr.bf16.mxu0 %v5520_v19  ;;  %1522 = vmatprep.subr.bf16.mxu1 %v5525_v20 }
 0x24f   :  { %1482 = vmatpush1.bf16.msra.mxu0 %v5528_v21  ;;  %1523 = vmatpush1.bf16.msra.mxu1 %v5533_v22  ;;  %v6752_v22 = vld [vmem:[#allocation16_spill] sm:$0xff] }
 0x250   :  { %1483 = vmatprep.subr.bf16.mxu0 %v5535_v23  ;;  %1524 = vmatprep.subr.bf16.mxu1 %v5539_v24 }
 0x253   :  { %1484 = vmatpush1.bf16.msra.mxu0 %v5545_v26  ;;  %1525 = vmatpush1.bf16.msra.mxu1 %v5549_v27 }
 0x254   :  { %1485 = vmatprep.subr.bf16.mxu0 %v5551_v28  ;;  %1526 = vmatprep.subr.bf16.mxu1 %v5554_v29 }
 0x257   :  { %1486 = vmatpush1.bf16.msra.mxu0 %v5558_v30  ;;  %1527 = vmatpush1.bf16.msra.mxu1 %v5561_v31 }
 0x258   :  { %1487 = vmatprep.subr.bf16.mxu0 %v5569_v33  ;;  %1528 = vmatprep.subr.bf16.mxu1 %v5575_v35 }
 0x25b   :  { %1488 = vmatpush1.bf16.msra.mxu0 %v5573_v34  ;;  %1529 = vmatpush1.bf16.msra.mxu1 %v5577_v36 }
 0x25c   :  { %1489 = vmatprep.subr.bf16.mxu0 %v5579_v37  ;;  %1530 = vmatprep.subr.bf16.mxu1 %v5582_v38 }
 0x25f   :  { %1490 = vmatpush1.bf16.msra.mxu0 %v5587_v39  ;;  %1531 = vmatpush1.bf16.msra.mxu1 %v5591_v40 }
 0x260   :  { %1828 = vmatprep.subr.bf16.mxu1 %v5845_v1 }
 0x302   :  { %v1197_v6 = vpop.f32.mrf.mxu0  ;;  %v1238_v8 = vpop.f32.mrf.mxu1 }
 0x303   :  { %v1245_v10 = vadd.f32 %v1197_v6, %v5678_v3  ;;  %v1247_v23 = vadd.f32 %v1238_v8, %v6752_v22  ;;  %v5921_v6 = vld [vmem:[#allocation5 + $0x28] ss:$16 sps:$4 sm:$0xff]   ;;  %v5925_v8 = vld [vmem:[#allocation5 + $0x4] ss:$16 sps:$4 sm:$0xff]  }
 0x304   :  { %v1199_v11 = vpop.f32.mrf.mxu0  ;;  %v1240_v12 = vpop.f32.mrf.mxu1 }
 0x305   :  { %v4549_v13 = vmul.f32 -1.442695, %v1245_v10  ;;  %v1246_v15 = vadd.f32 %v1199_v11, %v5683_v25  ;;  %v1248_v21 = vadd.f32 %v1240_v12, %v5686_v32  ;;  %v5843_v32 = vld [vmem:[#allocation5 + $0xe4] ss:$16 sps:$4 sm:$0xff]   ;;  %v5927_v10 = vld [vmem:[#allocation5 + $0xc] ss:$16 sps:$4 sm:$0xff]  }
 0x306   :  { %v1201_v16 = vpop.f32.mrf.mxu0  ;;  %v1242_v17 = vpop.f32.mrf.mxu1  ;;  %1787 = vmatprep.subr.bf16.mxu0 %v5843_v32  ;;  %v5931_v11 = vld [vmem:[#allocation5] ss:$16 sps:$4 sm:$0xff]   ;;  %v5933_v12 = vld [vmem:[#allocation5 + $0x8] ss:$16 sps:$4 sm:$0xff]  }
 0x307   :  { %5058 = vpow2.f32 %v4549_v13  ;;  %v4550_v18 = vmul.f32 -1.442695, %v1246_v15  ;;  %v4551_v24 = vmul.f32 -1.442695, %v1248_v21  ;;  %v6753_v16 = vld [vmem:[#allocation17_spill] sm:$0xff]  ;;  %v6754_v21 = vld [vmem:[#allocation19_spill] sm:$0xff] }
 0x308   :  { %v1202_v19 = vpop.f32.mrf.mxu0  ;;  %v1243_v20 = vpop.f32.mrf.mxu1 }
 0x309   :  { %5060 = vpow2.f32 %v4550_v18 }
 0x30a   :  { %5062 = vtanh.f32 %v1247_v23 }
 0x30b   :  { %5064 = vpow2.f32 %v4551_v24 }
 0x314   :  { %v5059_v26 = vpop.eup %5058 }
 0x315   :  { %v1252_v27 = vadd.f32 1.0, %v5059_v26 }
 0x316   :  { %v5061_v28 = vpop.eup %5060 }
 0x317   :  { %5066 = vrcp.f32 %v1252_v27  ;;  %v1258_v29 = vadd.f32 1.0, %v5061_v28  ;;  %v5063_v30 = vpop.eup %5062 }
 0x318   :  { %v5065_v31 = vpop.eup %5064 }
 0x319   :  { %5068 = vrcp.f32 %v1258_v29  ;;  %v1265_v36 = vadd.f32 1.0, %v5065_v31  ;;  %v6755_v29 = vld [vmem:[#allocation20_spill] sm:$0xff]  ;;  %v6756_v31 = vld [vmem:[#allocation18_spill] sm:$0xff] }
 0x31b   :  { %5070 = vrcp.f32 %v1265_v36 }
 0x324   :  { %v5067_v33 = vpop.eup %5066 }
 0x325   :  { %v1269_v34 = vmul.f32 %v5067_v33, %v5063_v30 }
 0x326   :  { %v5069_v35 = vpop.eup %5068 }
 0x327   :  { %v1268_v37 = vmul.f32 %v5069_v35, %v5790_v63  ;;  %v5909_v63 = vld [vmem:[#allocation5 + $0x48] ss:$16 sps:$4 sm:$0xff]  }
 0x328   :  { %v5071_v39 = vpop.eup %5070 }
 0x329   :  { %v5834_v38 = vadd.f32 %v1269_v34, %v1268_v37 }
 0x32b   :  { %5072 = vtanh.f32 %v5834_v38 }
 0x338   :  { %v5073_v40 = vpop.eup %5072 }
 0x339   :  { %v5837_v3 = vmul.f32 %v5073_v40, %v5071_v39 }
 0x33b   :  { %v1282_v25 = vpack.c.bf16 %v5837_v3, %v5837_v3 }
 0x33d   :  { %1508 = vmatmul.mubr.bf16.vlgmr.msra.gmra.mxu0 %v1282_v25  ;;  %1549 = vmatmul.mubr.bf16.vlgmr.msra.gmra.mxu1 %v1282_v25 }
 0x33e   :  { %1819 = vmatprep.mubr.bf16.mxu0 %v6751_v56  ;;  %1860 = vmatprep.mubr.bf16.mxu1 %v6751_v56 }
 0x33f   :  { %1788 = vmatpush1.bf16.msra.mxu0 %v5847_v57  ;;  %1829 = vmatpush1.bf16.msra.mxu1 %v5849_v14 }
 0x340   :  { %1789 = vmatprep.subr.bf16.mxu0 %v5855_v60  ;;  %1830 = vmatprep.subr.bf16.mxu1 %v5857_v2 }
 0x343   :  { %1790 = vmatpush1.bf16.msra.mxu0 %v5859_v46  ;;  %1831 = vmatpush1.bf16.msra.mxu1 %v5861_v45 }
 0x344   :  { %1791 = vmatprep.subr.bf16.mxu0 %v5867_v4  ;;  %1832 = vmatprep.subr.bf16.mxu1 %v5869_v7 }
 0x347   :  { %1792 = vmatpush1.bf16.msra.mxu0 %v5871_v9  ;;  %1833 = vmatpush1.bf16.msra.mxu1 %v5873_v55 }
 0x348   :  { %1793 = vmatprep.subr.bf16.mxu0 %v5879_v43  ;;  %1834 = vmatprep.subr.bf16.mxu1 %v5881_v0 }
 0x34b   :  { %1794 = vmatpush1.bf16.msra.mxu0 %v5883_v58  ;;  %1835 = vmatpush1.bf16.msra.mxu1 %v5885_v52 }
 0x34c   :  { %1795 = vmatprep.subr.bf16.mxu0 %v5889_v62  ;;  %1836 = vmatprep.subr.bf16.mxu1 %v5891_v54 }
 0x34f   :  { %1796 = vmatpush1.bf16.msra.mxu0 %v5895_v42  ;;  %1837 = vmatpush1.bf16.msra.mxu1 %v5897_v48 }
 0x350   :  { %1797 = vmatprep.subr.bf16.mxu0 %v5901_v61  ;;  %1838 = vmatprep.subr.bf16.mxu1 %v5903_v47 }
 0x353   :  { %1798 = vmatpush1.bf16.msra.mxu0 %v5907_v5  ;;  %1839 = vmatpush1.bf16.msra.mxu1 %v5909_v63 }
 0x354   :  { %1799 = vmatprep.subr.bf16.mxu0 %v5913_v59  ;;  %1840 = vmatprep.subr.bf16.mxu1 %v5915_v53 }
 0x357   :  { %1800 = vmatpush1.bf16.msra.mxu0 %v5919_v44  ;;  %1841 = vmatpush1.bf16.msra.mxu1 %v5921_v6 }
 0x358   :  { %1801 = vmatprep.subr.bf16.mxu0 %v5925_v8  ;;  %1842 = vmatprep.subr.bf16.mxu1 %v5927_v10 }
 0x35b   :  { %1802 = vmatpush1.bf16.msra.mxu0 %v5931_v11  ;;  %1843 = vmatpush1.bf16.msra.mxu1 %v5933_v12 }
 0x35c   :  { %2099 = vmatprep.subr.bf16.mxu0 %v5843_v32  ;;  %2140 = vmatprep.subr.bf16.mxu1 %v5845_v1 }
 0x3fd   :  { %v1509_v13 = vpop.f32.mrf.mxu0  ;;  %v1550_v15 = vpop.f32.mrf.mxu1 }
 0x3fe   :  { %v1557_v17 = vadd.f32 %v1509_v13, %v6753_v16  ;;  %v1559_v33 = vadd.f32 %v1550_v15, %v6756_v31  ;;  %v6758_v31 = vld [vmem:[#allocation23_spill] sm:$0xff] }
 0x3ff   :  { %v1511_v18 = vpop.f32.mrf.mxu0  ;;  %v1552_v19 = vpop.f32.mrf.mxu1 }
 0x400   :  { %v4584_v20 = vmul.f32 -1.442695, %v1557_v17  ;;  %v1558_v22 = vadd.f32 %v1511_v18, %v6754_v21  ;;  %v1560_v30 = vadd.f32 %v1552_v19, %v6755_v29 }
 0x401   :  { %v1513_v23 = vpop.f32.mrf.mxu0  ;;  %v1554_v24 = vpop.f32.mrf.mxu1 }
 0x402   :  { %5074 = vpow2.f32 %v4584_v20  ;;  %v4585_v26 = vmul.f32 -1.442695, %v1558_v22  ;;  %v4586_v34 = vmul.f32 -1.442695, %v1560_v30 }
 0x403   :  { %v1514_v27 = vpop.f32.mrf.mxu0  ;;  %v1555_v28 = vpop.f32.mrf.mxu1 }
 0x404   :  { %5076 = vpow2.f32 %v4585_v26  ;;  %v6757_v26 = vld [vmem:[#allocation21_spill] sm:$0xff] }
 0x405   :  { %5078 = vtanh.f32 %v1559_v33 }
 0x406   :  { %5080 = vpow2.f32 %v4586_v34 }
 0x40f   :  { %v5075_v35 = vpop.eup %5074 }
 0x410   :  { %v1564_v36 = vadd.f32 1.0, %v5075_v35 }
 0x411   :  { %v5077_v37 = vpop.eup %5076 }
 0x412   :  { %5082 = vrcp.f32 %v1564_v36  ;;  %v1570_v39 = vadd.f32 1.0, %v5077_v37  ;;  %v5079_v40 = vpop.eup %5078 }
 0x413   :  { %v5081_v25 = vpop.eup %5080 }
 0x414   :  { %5084 = vrcp.f32 %v1570_v39  ;;  %v1577_v18 = vadd.f32 1.0, %v5081_v25 }
 0x416   :  { %5086 = vrcp.f32 %v1577_v18 }
 0x41f   :  { %v5083_v13 = vpop.eup %5082 }
 0x420   :  { %v1581_v16 = vmul.f32 %v5083_v13, %v5079_v40  ;;  %v6759_v40 = vld [vmem:[#allocation24_spill] sm:$0xff]  ;;  %v6760_v13 = vld [vmem:[#allocation22_spill] sm:$0xff] }
 0x421   :  { %v5085_v17 = vpop.eup %5084 }
 0x422   :  { %v1580_v20 = vmul.f32 %v5085_v17, %v5834_v38 }
 0x423   :  { %v5087_v15 = vpop.eup %5086 }
 0x424   :  { %v5946_v19 = vadd.f32 %v1581_v16, %v1580_v20 }
 0x426   :  { %5088 = vtanh.f32 %v5946_v19 }
 0x433   :  { %v5089_v21 = vpop.eup %5088 }
 0x434   :  { %v5949_v22 = vmul.f32 %v5089_v21, %v5087_v15 }
 0x436   :  { %v1594_v23 = vpack.c.bf16 %v5949_v22, %v5949_v22 }
 0x438   :  { %1820 = vmatmul.mubr.bf16.vlgmr.msra.gmra.mxu0 %v1594_v23  ;;  %1861 = vmatmul.mubr.bf16.vlgmr.msra.gmra.mxu1 %v1594_v23 }
 0x439   :  { %2100 = vmatpush1.bf16.msra.mxu0 %v5847_v57  ;;  %2141 = vmatpush1.bf16.msra.mxu1 %v5849_v14 }
 0x43a   :  { %2101 = vmatprep.subr.bf16.mxu0 %v5855_v60  ;;  %2142 = vmatprep.subr.bf16.mxu1 %v5857_v2 }
 0x43b   :  { %2131 = vmatprep.mubr.bf16.mxu0 %v6751_v56  ;;  %2172 = vmatprep.mubr.bf16.mxu1 %v6751_v56 }
 0x43d   :  { %2102 = vmatpush1.bf16.msra.mxu0 %v5859_v46  ;;  %2143 = vmatpush1.bf16.msra.mxu1 %v5861_v45 }
 0x43e   :  { %2103 = vmatprep.subr.bf16.mxu0 %v5867_v4  ;;  %2144 = vmatprep.subr.bf16.mxu1 %v5869_v7 }
 0x441   :  { %2104 = vmatpush1.bf16.msra.mxu0 %v5871_v9  ;;  %2145 = vmatpush1.bf16.msra.mxu1 %v5873_v55 }
 0x442   :  { %2105 = vmatprep.subr.bf16.mxu0 %v5879_v43  ;;  %2146 = vmatprep.subr.bf16.mxu1 %v5881_v0 }
 0x445   :  { %2106 = vmatpush1.bf16.msra.mxu0 %v5883_v58  ;;  %2147 = vmatpush1.bf16.msra.mxu1 %v5885_v52 }
 0x446   :  { %2107 = vmatprep.subr.bf16.mxu0 %v5889_v62  ;;  %2148 = vmatprep.subr.bf16.mxu1 %v5891_v54 }
 0x449   :  { %2108 = vmatpush1.bf16.msra.mxu0 %v5895_v42  ;;  %2149 = vmatpush1.bf16.msra.mxu1 %v5897_v48 }
 0x44a   :  { %2109 = vmatprep.subr.bf16.mxu0 %v5901_v61  ;;  %2150 = vmatprep.subr.bf16.mxu1 %v5903_v47 }
 0x44d   :  { %2110 = vmatpush1.bf16.msra.mxu0 %v5907_v5  ;;  %2151 = vmatpush1.bf16.msra.mxu1 %v5909_v63 }
 0x44e   :  { %2111 = vmatprep.subr.bf16.mxu0 %v5913_v59  ;;  %2152 = vmatprep.subr.bf16.mxu1 %v5915_v53 }
 0x451   :  { %2112 = vmatpush1.bf16.msra.mxu0 %v5919_v44  ;;  %2153 = vmatpush1.bf16.msra.mxu1 %v5921_v6 }
 0x452   :  { %2113 = vmatprep.subr.bf16.mxu0 %v5925_v8  ;;  %2154 = vmatprep.subr.bf16.mxu1 %v5927_v10 }
 0x455   :  { %2114 = vmatpush1.bf16.msra.mxu0 %v5931_v11  ;;  %2155 = vmatpush1.bf16.msra.mxu1 %v5933_v12 }
 0x456   :  { %2411 = vmatprep.subr.bf16.mxu0 %v5843_v32  ;;  %2452 = vmatprep.subr.bf16.mxu1 %v5845_v1 }
 0x4f8   :  { %v1821_v38 = vpop.f32.mrf.mxu0  ;;  %v1862_v24 = vpop.f32.mrf.mxu1 }
 0x4f9   :  { %v1869_v27 = vadd.f32 %v1821_v38, %v6757_v26  ;;  %v1871_v16 = vadd.f32 %v1862_v24, %v6760_v13 }
 0x4fa   :  { %v1823_v28 = vpop.f32.mrf.mxu0  ;;  %v1864_v29 = vpop.f32.mrf.mxu1 }
 0x4fb   :  { %v4619_v30 = vmul.f32 -1.442695, %v1869_v27  ;;  %v1870_v33 = vadd.f32 %v1823_v28, %v6758_v31  ;;  %v1872_v25 = vadd.f32 %v1864_v29, %v6759_v40 }
 0x4fc   :  { %v1825_v34 = vpop.f32.mrf.mxu0  ;;  %v1866_v35 = vpop.f32.mrf.mxu1 }
 0x4fd   :  { %5090 = vpow2.f32 %v4619_v30  ;;  %v4620_v36 = vmul.f32 -1.442695, %v1870_v33  ;;  %v4621_v17 = vmul.f32 -1.442695, %v1872_v25 }
 0x4fe   :  { %v1826_v37 = vpop.f32.mrf.mxu0  ;;  %v1867_v39 = vpop.f32.mrf.mxu1 }
 0x4ff   :  { %5092 = vpow2.f32 %v4620_v36  ;;  %v6761_v37 = vld [vmem:[#allocation25_spill] sm:$0xff] }
 0x500   :  { %5094 = vtanh.f32 %v1871_v16  ;;  %v6762_v16 = vld [vmem:[#allocation27_spill] sm:$0xff] }
 0x501   :  { %5096 = vpow2.f32 %v4621_v17 }
 0x50a   :  { %v5091_v18 = vpop.eup %5090 }
 0x50b   :  { %v1876_v20 = vadd.f32 1.0, %v5091_v18 }
 0x50c   :  { %v5093_v15 = vpop.eup %5092 }
 0x50d   :  { %5098 = vrcp.f32 %v1876_v20  ;;  %v1882_v21 = vadd.f32 1.0, %v5093_v15  ;;  %v5095_v23 = vpop.eup %5094 }
 0x50e   :  { %v5097_v38 = vpop.eup %5096 }
 0x50f   :  { %5100 = vrcp.f32 %v1882_v21  ;;  %v1889_v30 = vadd.f32 1.0, %v5097_v38  ;;  %v6763_v38 = vld [vmem:[#allocation28_spill] sm:$0xff] }
 0x511   :  { %5102 = vrcp.f32 %v1889_v30 }
 0x51a   :  { %v5099_v26 = vpop.eup %5098 }
 0x51b   :  { %v1893_v27 = vmul.f32 %v5099_v26, %v5095_v23  ;;  %v6764_v26 = vld [vmem:[#allocation26_spill] sm:$0xff] }
 0x51c   :  { %v5101_v28 = vpop.eup %5100 }
 0x51d   :  { %v1892_v31 = vmul.f32 %v5101_v28, %v5946_v19 }
 0x51e   :  { %v5103_v24 = vpop.eup %5102 }
 0x51f   :  { %v5992_v29 = vadd.f32 %v1893_v27, %v1892_v31 }
 0x521   :  { %5104 = vtanh.f32 %v5992_v29 }
 0x52e   :  { %v5105_v33 = vpop.eup %5104 }
 0x52f   :  { %v5995_v34 = vmul.f32 %v5105_v33, %v5103_v24 }
 0x531   :  { %v1906_v35 = vpack.c.bf16 %v5995_v34, %v5995_v34 }
 0x533   :  { %2132 = vmatmul.mubr.bf16.vlgmr.msra.gmra.mxu0 %v1906_v35  ;;  %2173 = vmatmul.mubr.bf16.vlgmr.msra.gmra.mxu1 %v1906_v35 }
 0x534   :  { %2412 = vmatpush1.bf16.msra.mxu0 %v5847_v57  ;;  %2453 = vmatpush1.bf16.msra.mxu1 %v5849_v14 }
 0x535   :  { %2413 = vmatprep.subr.bf16.mxu0 %v5855_v60  ;;  %2454 = vmatprep.subr.bf16.mxu1 %v5857_v2 }
 0x536   :  { %2443 = vmatprep.mubr.bf16.mxu0 %v6751_v56  ;;  %2484 = vmatprep.mubr.bf16.mxu1 %v6751_v56 }
 0x538   :  { %2414 = vmatpush1.bf16.msra.mxu0 %v5859_v46  ;;  %2455 = vmatpush1.bf16.msra.mxu1 %v5861_v45 }
 0x539   :  { %2415 = vmatprep.subr.bf16.mxu0 %v5867_v4  ;;  %2456 = vmatprep.subr.bf16.mxu1 %v5869_v7 }
 0x53c   :  { %2416 = vmatpush1.bf16.msra.mxu0 %v5871_v9  ;;  %2457 = vmatpush1.bf16.msra.mxu1 %v5873_v55 }
 0x53d   :  { %2417 = vmatprep.subr.bf16.mxu0 %v5879_v43  ;;  %2458 = vmatprep.subr.bf16.mxu1 %v5881_v0 }
 0x540   :  { %2418 = vmatpush1.bf16.msra.mxu0 %v5883_v58  ;;  %2459 = vmatpush1.bf16.msra.mxu1 %v5885_v52 }
 0x541   :  { %2419 = vmatprep.subr.bf16.mxu0 %v5889_v62  ;;  %2460 = vmatprep.subr.bf16.mxu1 %v5891_v54 }
 0x544   :  { %2420 = vmatpush1.bf16.msra.mxu0 %v5895_v42  ;;  %2461 = vmatpush1.bf16.msra.mxu1 %v5897_v48 }
 0x545   :  { %2421 = vmatprep.subr.bf16.mxu0 %v5901_v61  ;;  %2462 = vmatprep.subr.bf16.mxu1 %v5903_v47 }
 0x548   :  { %2422 = vmatpush1.bf16.msra.mxu0 %v5907_v5  ;;  %2463 = vmatpush1.bf16.msra.mxu1 %v5909_v63 }
 0x549   :  { %2423 = vmatprep.subr.bf16.mxu0 %v5913_v59  ;;  %2464 = vmatprep.subr.bf16.mxu1 %v5915_v53 }
 0x54c   :  { %2424 = vmatpush1.bf16.msra.mxu0 %v5919_v44  ;;  %2465 = vmatpush1.bf16.msra.mxu1 %v5921_v6 }
 0x54d   :  { %2425 = vmatprep.subr.bf16.mxu0 %v5925_v8  ;;  %2466 = vmatprep.subr.bf16.mxu1 %v5927_v10 }
 0x550   :  { %2426 = vmatpush1.bf16.msra.mxu0 %v5931_v11  ;;  %2467 = vmatpush1.bf16.msra.mxu1 %v5933_v12 }
 0x551   :  { %2723 = vmatprep.subr.bf16.mxu0 %v5843_v32  ;;  %2764 = vmatprep.subr.bf16.mxu1 %v5845_v1 }
 0x5f3   :  { %v2133_v19 = vpop.f32.mrf.mxu0  ;;  %v2174_v36 = vpop.f32.mrf.mxu1 }
 0x5f4   :  { %v2181_v39 = vadd.f32 %v2133_v19, %v6761_v37  ;;  %v2183_v1 = vadd.f32 %v2174_v36, %v6764_v26  ;;  %v4933_v26 = vld [vmem:[#allocation8 + $0xe8] ss:$16 sps:$4 sm:$0xff]  }
 0x5f5   :  { %v2135_v40 = vpop.f32.mrf.mxu0  ;;  %v2176_v25 = vpop.f32.mrf.mxu1 }
 0x5f6   :  { %v4654_v13 = vmul.f32 -1.442695, %v2181_v39  ;;  %v2182_v17 = vadd.f32 %v2135_v40, %v6762_v16  ;;  %v2184_v32 = vadd.f32 %v2176_v25, %v6763_v38 }
 0x5f7   :  { %v2137_v18 = vpop.f32.mrf.mxu0  ;;  %v2178_v20 = vpop.f32.mrf.mxu1 }
 0x5f8   :  { %5106 = vpow2.f32 %v4654_v13  ;;  %v4655_v15 = vmul.f32 -1.442695, %v2182_v17  ;;  %v4656_v27 = vmul.f32 -1.442695, %v2184_v32  ;;  %v4930_v32 = vld [vmem:[#allocation8 + $0xe0] ss:$16 sps:$4 sm:$0xff]  }
 0x5f9   :  { %v2138_v21 = vpop.f32.mrf.mxu0  ;;  %v2179_v23 = vpop.f32.mrf.mxu1 }
 0x5fa   :  { %5108 = vpow2.f32 %v4655_v15 }
 0x5fb   :  { %5110 = vtanh.f32 %v2183_v1 }
 0x5fc   :  { %5112 = vpow2.f32 %v4656_v27  ;;  %v4938_v27 = vld [vmem:[#allocation8 + $0xc4] ss:$16 sps:$4 sm:$0xff]  }
 0x605   :  { %v5107_v28 = vpop.eup %5106 }
 0x606   :  { %v2188_v30 = vadd.f32 1.0, %v5107_v28  ;;  %v4941_v28 = vld [vmem:[#allocation8 + $0xcc] ss:$16 sps:$4 sm:$0xff]  }
 0x607   :  { %v5109_v31 = vpop.eup %5108 }
 0x608   :  { %5114 = vrcp.f32 %v2188_v30  ;;  %v2194_v24 = vadd.f32 1.0, %v5109_v31  ;;  %v5111_v33 = vpop.eup %5110  ;;  %v4936_v30 = vld [vmem:[#allocation8 + $0xc0] ss:$16 sps:$4 sm:$0xff]   ;;  %v4939_v31 = vld [vmem:[#allocation8 + $0xc8] ss:$16 sps:$4 sm:$0xff]  }
 0x609   :  { %v5113_v35 = vpop.eup %5112 }
 0x60a   :  { %5116 = vrcp.f32 %v2194_v24  ;;  %v2201_v40 = vadd.f32 1.0, %v5113_v35  ;;  %v4944_v24 = vld [vmem:[#allocation8 + $0xa4] ss:$16 sps:$4 sm:$0xff]   ;;  %v4942_v35 = vld [vmem:[#allocation8 + $0xa0] ss:$16 sps:$4 sm:$0xff]  }
 0x60c   :  { %5118 = vrcp.f32 %v2201_v40  ;;  %v4948_v40 = vld [vmem:[#allocation8 + $0x80] ss:$16 sps:$4 sm:$0xff]  }
 0x615   :  { %v5115_v19 = vpop.eup %5114 }
 0x616   :  { %v2205_v37 = vmul.f32 %v5115_v19, %v5111_v33  ;;  %v4947_v33 = vld [vmem:[#allocation8 + $0xac] ss:$16 sps:$4 sm:$0xff]   ;;  %v4945_v19 = vld [vmem:[#allocation8 + $0xa8] ss:$16 sps:$4 sm:$0xff]  }
 0x617   :  { %v5117_v39 = vpop.eup %5116 }
 0x618   :  { %v2204_v13 = vmul.f32 %v5117_v39, %v5992_v29  ;;  %v4953_v39 = vld [vmem:[#allocation8 + $0x8c] ss:$16 sps:$4 sm:$0xff]  }
 0x619   :  { %v5119_v36 = vpop.eup %5118 }
 0x61a   :  { %v6038_v25 = vadd.f32 %v2205_v37, %v2204_v13  ;;  %v4950_v37 = vld [vmem:[#allocation8 + $0x84] ss:$16 sps:$4 sm:$0xff]   ;;  %v4951_v13 = vld [vmem:[#allocation8 + $0x88] ss:$16 sps:$4 sm:$0xff]  }
 0x61c   :  { %5120 = vtanh.f32 %v6038_v25 }
 0x629   :  { %v5121_v16 = vpop.eup %5120 }
 0x62a   :  { %v6041_v17 = vmul.f32 %v5121_v16, %v5119_v36  ;;  %v4959_v36 = vld [vmem:[#allocation8 + $0x6c] ss:$16 sps:$4 sm:$0xff]   ;;  %v4954_v16 = vld [vmem:[#allocation8 + $0x60] ss:$16 sps:$4 sm:$0xff]  }
 0x62c   :  { %v2218_v18 = vpack.c.bf16 %v6041_v17, %v6041_v17 }
 0x62e   :  { %2444 = vmatmul.mubr.bf16.vlgmr.msra.gmra.mxu0 %v2218_v18  ;;  %2485 = vmatmul.mubr.bf16.vlgmr.msra.gmra.mxu1 %v2218_v18  ;;  %v4957_v18 = vld [vmem:[#allocation8 + $0x68] ss:$16 sps:$4 sm:$0xff]  }
 0x62f   :  { %2724 = vmatpush1.bf16.msra.mxu0 %v5847_v57  ;;  %2765 = vmatpush1.bf16.msra.mxu1 %v5849_v14  ;;  %v4932_v57 = vld [vmem:[#allocation8 + $0xe4] ss:$16 sps:$4 sm:$0xff]   ;;  %v4935_v14 = vld [vmem:[#allocation8 + $0xec] ss:$16 sps:$4 sm:$0xff]  }
 0x630   :  { %2725 = vmatprep.subr.bf16.mxu0 %v5855_v60  ;;  %2766 = vmatprep.subr.bf16.mxu1 %v5857_v2 }
 0x631   :  { %2755 = vmatprep.mubr.bf16.mxu0 %v6751_v56  ;;  %2796 = vmatprep.mubr.bf16.mxu1 %v6751_v56 }
 0x633   :  { %2726 = vmatpush1.bf16.msra.mxu0 %v5859_v46  ;;  %2767 = vmatpush1.bf16.msra.mxu1 %v5861_v45  ;;  %v6765_v46 = vld [vmem:[#allocation29_spill] sm:$0xff] }
 0x634   :  { %2727 = vmatprep.subr.bf16.mxu0 %v5867_v4  ;;  %2768 = vmatprep.subr.bf16.mxu1 %v5869_v7 }
 0x637   :  { %2728 = vmatpush1.bf16.msra.mxu0 %v5871_v9  ;;  %2769 = vmatpush1.bf16.msra.mxu1 %v5873_v55  ;;  %v6766_v55 = vld [vmem:[#allocation31_spill] sm:$0xff] }
 0x638   :  { %2729 = vmatprep.subr.bf16.mxu0 %v5879_v43  ;;  %2770 = vmatprep.subr.bf16.mxu1 %v5881_v0 }
 0x63b   :  { %2730 = vmatpush1.bf16.msra.mxu0 %v5883_v58  ;;  %2771 = vmatpush1.bf16.msra.mxu1 %v5885_v52 }
 0x63c   :  { %2731 = vmatprep.subr.bf16.mxu0 %v5889_v62  ;;  %2772 = vmatprep.subr.bf16.mxu1 %v5891_v54 }
 0x63f   :  { %2732 = vmatpush1.bf16.msra.mxu0 %v5895_v42  ;;  %2773 = vmatpush1.bf16.msra.mxu1 %v5897_v48  ;;  %v6767_v42 = vld [vmem:[#allocation32_spill] sm:$0xff] }
 0x640   :  { %2733 = vmatprep.subr.bf16.mxu0 %v5901_v61  ;;  %2774 = vmatprep.subr.bf16.mxu1 %v5903_v47  ;;  %v6768_v61 = vld [vmem:[#allocation30_spill] sm:$0xff] }
 0x643   :  { %2734 = vmatpush1.bf16.msra.mxu0 %v5907_v5  ;;  %2775 = vmatpush1.bf16.msra.mxu1 %v5909_v63 }
 0x644   :  { %2735 = vmatprep.subr.bf16.mxu0 %v5913_v59  ;;  %2776 = vmatprep.subr.bf16.mxu1 %v5915_v53 }
 0x647   :  { %2736 = vmatpush1.bf16.msra.mxu0 %v5919_v44  ;;  %2777 = vmatpush1.bf16.msra.mxu1 %v5921_v6 }
 0x648   :  { %2737 = vmatprep.subr.bf16.mxu0 %v5925_v8  ;;  %2778 = vmatprep.subr.bf16.mxu1 %v5927_v10 }
 0x64b   :  { %2738 = vmatpush1.bf16.msra.mxu0 %v5931_v11  ;;  %2779 = vmatpush1.bf16.msra.mxu1 %v5933_v12 }
 0x64c   :  { %3061 = vmatprep.subr.bf16.mxu0 %v4932_v57  ;;  %3134 = vmatprep.subr.bf16.mxu1 %v4935_v14  ;;  %v4962_v57 = vld [vmem:[#allocation8 + $0x44] ss:$16 sps:$4 sm:$0xff]   ;;  %v4965_v14 = vld [vmem:[#allocation8 + $0x4c] ss:$16 sps:$4 sm:$0xff]  }
 0x6ee   :  { %v2445_v60 = vpop.f32.mrf.mxu0  ;;  %v2486_v2 = vpop.f32.mrf.mxu1 }
 0x6ef   :  { %v2493_v45 = vadd.f32 %v2445_v60, %v6765_v46  ;;  %v2495_v47 = vadd.f32 %v2486_v2, %v6768_v61  ;;  %v4960_v60 = vld [vmem:[#allocation8 + $0x40] ss:$16 sps:$4 sm:$0xff]   ;;  %v4963_v2 = vld [vmem:[#allocation8 + $0x48] ss:$16 sps:$4 sm:$0xff]   ;;  %v4968_v46 = vld [vmem:[#allocation8 + $0x24] ss:$16 sps:$4 sm:$0xff]  }
 0x6f0   :  { %v2447_v4 = vpop.f32.mrf.mxu0  ;;  %v2488_v7 = vpop.f32.mrf.mxu1  ;;  %v6129_v61 = vld [vmem:[#allocation10 + $0xac] ss:$16 sps:$4 sm:$0xff]  }
 0x6f1   :  { %v4689_v9 = vmul.f32 -1.442695, %v2493_v45  ;;  %v2494_v43 = vadd.f32 %v2447_v4, %v6766_v55  ;;  %v2496_v48 = vadd.f32 %v2488_v7, %v6767_v42  ;;  %v4971_v45 = vld [vmem:[#allocation8 + $0x2c] ss:$16 sps:$4 sm:$0xff]   ;;  %v4966_v4 = vld [vmem:[#allocation8 + $0x20] ss:$16 sps:$4 sm:$0xff]  }
 0x6f2   :  { %v2449_v0 = vpop.f32.mrf.mxu0  ;;  %v2490_v58 = vpop.f32.mrf.mxu1  ;;  %v4969_v7 = vld [vmem:[#allocation8 + $0x28] ss:$16 sps:$4 sm:$0xff]   ;;  %v4977_v55 = vld [vmem:[#allocation8 + $0xc] ss:$16 sps:$4 sm:$0xff]  }
 0x6f3   :  { %5122 = vpow2.f32 %v4689_v9  ;;  %v4690_v52 = vmul.f32 -1.442695, %v2494_v43  ;;  %v4691_v5 = vmul.f32 -1.442695, %v2496_v48  ;;  %v4974_v9 = vld [vmem:[#allocation8 + $0x4] ss:$16 sps:$4 sm:$0xff]   ;;  %v2843_v58 = vpack.c.bf16 %v5793_v51, %v5747_v49 }
 0x6f4   :  { %v2450_v62 = vpop.f32.mrf.mxu0  ;;  %v2491_v54 = vpop.f32.mrf.mxu1  ;;  %v4972_v43 = vld [vmem:[#allocation8] ss:$16 sps:$4 sm:$0xff]   ;;  %v4975_v0 = vld [vmem:[#allocation8 + $0x8] ss:$16 sps:$4 sm:$0xff]   ;;  %v6103_v49 = vld [vmem:[#allocation10 + $0xe4] ss:$16 sps:$4 sm:$0xff]  }
 0x6f5   :  { %5124 = vpow2.f32 %v4690_v52  ;;  %v2844_v52 = vpack.c.bf16 %v5949_v22, %v5837_v3  ;;  %v2845_v62 = vpack.c.bf16 %v6041_v17, %v5995_v34  ;;  %v6105_v51 = vld [vmem:[#allocation10 + $0xec] ss:$16 sps:$4 sm:$0xff]   ;;  %v6107_v3 = vld [vmem:[#allocation10 + $0xe0] ss:$16 sps:$4 sm:$0xff]   ;;  %v6109_v22 = vld [vmem:[#allocation10 + $0xe8] ss:$16 sps:$4 sm:$0xff]  }
 0x6f6   :  { %5126 = vtanh.f32 %v2495_v47  ;;  %v6115_v34 = vld [vmem:[#allocation10 + $0xc4] ss:$16 sps:$4 sm:$0xff]   ;;  %v6117_v17 = vld [vmem:[#allocation10 + $0xcc] ss:$16 sps:$4 sm:$0xff]   ;;  %v6119_v54 = vld [vmem:[#allocation10 + $0xc0] ss:$16 sps:$4 sm:$0xff]  }
 0x6f7   :  { %5128 = vpow2.f32 %v4691_v5  ;;  %v6121_v42 = vld [vmem:[#allocation10 + $0xc8] ss:$16 sps:$4 sm:$0xff]   ;;  %v6127_v48 = vld [vmem:[#allocation10 + $0xa4] ss:$16 sps:$4 sm:$0xff]   ;;  %v6131_v47 = vld [vmem:[#allocation10 + $0xa0] ss:$16 sps:$4 sm:$0xff]  }
 0x6f8   :  { %v6133_v5 = vld [vmem:[#allocation10 + $0xa8] ss:$16 sps:$4 sm:$0xff]  }
 0x700   :  { %v5123_v63 = vpop.eup %5122 }
 0x701   :  { %v2500_v59 = vadd.f32 1.0, %v5123_v63  ;;  %v6139_v63 = vld [vmem:[#allocation10 + $0x84] ss:$16 sps:$4 sm:$0xff]  }
 0x702   :  { %v5125_v53 = vpop.eup %5124 }
 0x703   :  { %5130 = vrcp.f32 %v2500_v59  ;;  %v2506_v44 = vadd.f32 1.0, %v5125_v53  ;;  %v5127_v6 = vpop.eup %5126  ;;  %v6141_v59 = vld [vmem:[#allocation10 + $0x8c] ss:$16 sps:$4 sm:$0xff]   ;;  %v6143_v53 = vld [vmem:[#allocation10 + $0x80] ss:$16 sps:$4 sm:$0xff]  }
 0x704   :  { %v5129_v8 = vpop.eup %5128 }
 0x705   :  { %5132 = vrcp.f32 %v2506_v44  ;;  %v2513_v29 = vadd.f32 1.0, %v5129_v8  ;;  %v6145_v44 = vld [vmem:[#allocation10 + $0x88] ss:$16 sps:$4 sm:$0xff]   ;;  %v6153_v8 = vld [vmem:[#allocation10 + $0x6c] ss:$16 sps:$4 sm:$0xff]  }
 0x707   :  { %5134 = vrcp.f32 %v2513_v29  ;;  %v6165_v29 = vld [vmem:[#allocation10 + $0x4c] ss:$16 sps:$4 sm:$0xff]  }
 0x710   :  { %v5131_v10 = vpop.eup %5130 }
 0x711   :  { %v2517_v11 = vmul.f32 %v5131_v10, %v5127_v6  ;;  %v6151_v6 = vld [vmem:[#allocation10 + $0x64] ss:$16 sps:$4 sm:$0xff]   ;;  %v6155_v10 = vld [vmem:[#allocation10 + $0x60] ss:$16 sps:$4 sm:$0xff]  }
 0x712   :  { %v5133_v12 = vpop.eup %5132 }
 0x713   :  { %v2516_v20 = vmul.f32 %v5133_v12, %v6038_v25  ;;  %v4956_v25 = vld [vmem:[#allocation8 + $0x64] ss:$16 sps:$4 sm:$0xff]  }
 0x714   :  { %v5135_v21 = vpop.eup %5134  ;;  %v6163_v12 = vld [vmem:[#allocation10 + $0x44] ss:$16 sps:$4 sm:$0xff]  }
 0x715   :  { %v6082_v15 = vadd.f32 %v2517_v11, %v2516_v20  ;;  %v6157_v11 = vld [vmem:[#allocation10 + $0x68] ss:$16 sps:$4 sm:$0xff]   ;;  %v6167_v20 = vld [vmem:[#allocation10 + $0x40] ss:$16 sps:$4 sm:$0xff]  }
 0x717   :  { %5136 = vtanh.f32 %v6082_v15 }
 0x724   :  { %v5137_v23 = vpop.eup %5136 }
 0x725   :  { %v6085_v38 = vmul.f32 %v5137_v23, %v5135_v21  ;;  %v6169_v21 = vld [vmem:[#allocation10 + $0x48] ss:$16 sps:$4 sm:$0xff]   ;;  %v6175_v23 = vld [vmem:[#allocation10 + $0x24] ss:$16 sps:$4 sm:$0xff]  }
 0x727   :  { %v2530_v1 = vpack.c.bf16 %v6085_v38, %v6085_v38 }
 0x729   :  { %2756 = vmatmul.mubr.bf16.vlgmr.msra.gmra.mxu0 %v2530_v1  ;;  %2797 = vmatmul.mubr.bf16.vlgmr.msra.gmra.mxu1 %v2530_v1  ;;  %v6181_v1 = vld [vmem:[#allocation10 + $0x28] ss:$16 sps:$4 sm:$0xff]  }
 0x72a   :  { %3062 = vmatpush1.bf16.msra.mxu0 %v4930_v32  ;;  %3135 = vmatpush1.bf16.msra.mxu1 %v4933_v26  ;;  %v6177_v32 = vld [vmem:[#allocation10 + $0x2c] ss:$16 sps:$4 sm:$0xff]   ;;  %v6179_v26 = vld [vmem:[#allocation10 + $0x20] ss:$16 sps:$4 sm:$0xff]  }
 0x72b   :  { %3063 = vmatprep.subr.bf16.mxu0 %v4938_v27  ;;  %3136 = vmatprep.subr.bf16.mxu1 %v4941_v28  ;;  %v6183_v27 = vld [vmem:[#allocation10 + $0x4] ss:$16 sps:$4 sm:$0xff]   ;;  %v6187_v28 = vld [vmem:[#allocation10 + $0xc] ss:$16 sps:$4 sm:$0xff]  }
 0x72c   :  { %3093 = vmatprep.mubr.bf16.mxu0 %v6751_v56  ;;  %3166 = vmatprep.mubr.bf16.mxu1 %v6751_v56 }
 0x72e   :  { %3064 = vmatpush1.bf16.msra.mxu0 %v4936_v30  ;;  %3137 = vmatpush1.bf16.msra.mxu1 %v4939_v31  ;;  %v6191_v30 = vld [vmem:[#allocation10] ss:$16 sps:$4 sm:$0xff]   ;;  %v6193_v31 = vld [vmem:[#allocation10 + $0x8] ss:$16 sps:$4 sm:$0xff]  }
 0x72f   :  { %3065 = vmatprep.subr.bf16.mxu0 %v4944_v24  ;;  %3138 = vmatprep.subr.bf16.mxu1 %v4947_v33  ;;  %v72_v24 = vld [vmem:[%s6714_s0] sm:$0xff] }
 0x730   :  { %v4430_v33 = vadd.s32 4294967295, %v72_v24 }
 0x732   :  { %3066 = vmatpush1.bf16.msra.mxu0 %v4942_v35  ;;  %3139 = vmatpush1.bf16.msra.mxu1 %v4945_v19  ;;  %vm74_vm1 = vcmp.gt.s32.totalorder %v4430_v33, 0 }
 0x733   :  { %3067 = vmatprep.subr.bf16.mxu0 %v4950_v37  ;;  %3140 = vmatprep.subr.bf16.mxu1 %v4953_v39  ;;  %v6204_v35 = vsel %vm74_vm1, %v4430_v33, 0 }
 0x734   :  { %vm3545_vm2 = vcmp.eq.s32.totalorder %v6204_v35, 0  ;;  %vm3667_vm3 = vcmp.eq.s32.totalorder %v6204_v35, 1  ;;  %vm3789_vm4 = vcmp.eq.s32.totalorder %v6204_v35, 2  ;;  %vm3911_vm7 = vcmp.eq.s32.totalorder %v6204_v35, 3 }
 0x735   :  { %v3546_v19 = vsel %vm3545_vm2, 1, %v6751_v56  ;;  %vm4033_vm9 = vcmp.eq.s32.totalorder %v6204_v35, 4  ;;  %vm4155_vm11 = vcmp.eq.s32.totalorder %v6204_v35, 5  ;;  %vm4277_vm13 = vcmp.eq.s32.totalorder %v6204_v35, 6 }
 0x736   :  { %3068 = vmatpush1.bf16.msra.mxu0 %v4948_v40  ;;  %3141 = vmatpush1.bf16.msra.mxu1 %v4951_v13  ;;  %v6769_v40 = vld [vmem:[#allocation33_spill] sm:$0xff]  ;;  %vm4399_vm15 = vcmp.eq.s32.totalorder %v6204_v35, 7 }
 0x737   :  { %3069 = vmatprep.subr.bf16.mxu0 %v4956_v25  ;;  %3142 = vmatprep.subr.bf16.mxu1 %v4959_v36 }
 0x738   :  { %3548 = vperm.xlu0 %4822, %v3546_v19  }
 0x73a   :  { %3070 = vmatpush1.bf16.msra.mxu0 %v4954_v16  ;;  %3143 = vmatpush1.bf16.msra.mxu1 %v4957_v18 }
 0x73b   :  { %3071 = vmatprep.subr.bf16.mxu0 %v4962_v57  ;;  %3144 = vmatprep.subr.bf16.mxu1 %v4965_v14 }
 0x73e   :  { %3072 = vmatpush1.bf16.msra.mxu0 %v4960_v60  ;;  %3145 = vmatpush1.bf16.msra.mxu1 %v4963_v2 }
 0x73f   :  { %3073 = vmatprep.subr.bf16.mxu0 %v4968_v46  ;;  %3146 = vmatprep.subr.bf16.mxu1 %v4971_v45 }
 0x742   :  { %3074 = vmatpush1.bf16.msra.mxu0 %v4966_v4  ;;  %3147 = vmatpush1.bf16.msra.mxu1 %v4969_v7  ;;  %v6770_v4 = vld [vmem:[#allocation34_spill] sm:$0xff] }
 0x743   :  { %3075 = vmatprep.subr.bf16.mxu0 %v4974_v9  ;;  %3148 = vmatprep.subr.bf16.mxu1 %v4977_v55 }
 0x746   :  { %3076 = vmatpush1.bf16.msra.mxu0 %v4972_v43  ;;  %3149 = vmatpush1.bf16.msra.mxu1 %v4975_v0 }
 0x747   :  { %3435 = vmatprep.subr.bf16.mxu0 %v6103_v49  ;;  %3476 = vmatprep.subr.bf16.mxu1 %v6105_v51 }
 0x749   :  { %3094 = vmatmul.mubr.bf16.vlgmr.msra.gmra.mxu0 %v2843_v58  ;;  %3167 = vmatmul.mubr.bf16.vlgmr.msra.gmra.mxu1 %v2843_v58 }
 0x74a   :  { %3103 = vmatprep.mubr.bf16.mxu0 %v6751_v56  ;;  %3176 = vmatprep.mubr.bf16.mxu1 %v6751_v56 }
 0x74b   :  { %3436 = vmatpush1.bf16.msra.mxu0 %v6107_v3  ;;  %3477 = vmatpush1.bf16.msra.mxu1 %v6109_v22 }
 0x74c   :  { %3437 = vmatprep.subr.bf16.mxu0 %v6115_v34  ;;  %3478 = vmatprep.subr.bf16.mxu1 %v6117_v17 }
 0x74f   :  { %3438 = vmatpush1.bf16.msra.mxu0 %v6119_v54  ;;  %3479 = vmatpush1.bf16.msra.mxu1 %v6121_v42 }
 0x750   :  { %3439 = vmatprep.subr.bf16.mxu0 %v6127_v48  ;;  %3480 = vmatprep.subr.bf16.mxu1 %v6129_v61 }
 0x751   :  { %3104 = vmatmul.mubr.bf16.gmra.mxu0 %v2844_v52  ;;  %3177 = vmatmul.mubr.bf16.gmra.mxu1 %v2844_v52 }
 0x752   :  { %3113 = vmatprep.mubr.bf16.mxu0 %v6751_v56  ;;  %3186 = vmatprep.mubr.bf16.mxu1 %v6751_v56 }
 0x753   :  { %3440 = vmatpush1.bf16.msra.mxu0 %v6131_v47  ;;  %3481 = vmatpush1.bf16.msra.mxu1 %v6133_v5 }
 0x754   :  { %3441 = vmatprep.subr.bf16.mxu0 %v6139_v63  ;;  %3482 = vmatprep.subr.bf16.mxu1 %v6141_v59 }
 0x757   :  { %3442 = vmatpush1.bf16.msra.mxu0 %v6143_v53  ;;  %3483 = vmatpush1.bf16.msra.mxu1 %v6145_v44 }
 0x758   :  { %3443 = vmatprep.subr.bf16.mxu0 %v6151_v6  ;;  %3484 = vmatprep.subr.bf16.mxu1 %v6153_v8 }
 0x759   :  { %3114 = vmatmul.mubr.bf16.gmra.mxu0 %v2845_v62  ;;  %3187 = vmatmul.mubr.bf16.gmra.mxu1 %v2845_v62 }
 0x75a   :  { %3123 = vmatprep.mubr.bf16.mxu0 %v6751_v56  ;;  %3196 = vmatprep.mubr.bf16.mxu1 %v6751_v56 }
 0x75b   :  { %3444 = vmatpush1.bf16.msra.mxu0 %v6155_v10  ;;  %3485 = vmatpush1.bf16.msra.mxu1 %v6157_v11 }
 0x75c   :  { %3445 = vmatprep.subr.bf16.mxu0 %v6163_v12  ;;  %3486 = vmatprep.subr.bf16.mxu1 %v6165_v29 }
 0x75f   :  { %3446 = vmatpush1.bf16.msra.mxu0 %v6167_v20  ;;  %3487 = vmatpush1.bf16.msra.mxu1 %v6169_v21 }
 0x760   :  { %3447 = vmatprep.subr.bf16.mxu0 %v6175_v23  ;;  %3488 = vmatprep.subr.bf16.mxu1 %v6177_v32 }
 0x763   :  { %3448 = vmatpush1.bf16.msra.mxu0 %v6179_v26  ;;  %3489 = vmatpush1.bf16.msra.mxu1 %v6181_v1 }
 0x764   :  { %3449 = vmatprep.subr.bf16.mxu0 %v6183_v27  ;;  %3490 = vmatprep.subr.bf16.mxu1 %v6187_v28 }
 0x767   :  { %3450 = vmatpush1.bf16.msra.mxu0 %v6191_v30  ;;  %3491 = vmatpush1.bf16.msra.mxu1 %v6193_v31 }
 0x768   :  { %3557 = vmatprep.subr.bf16.mxu0 %v6103_v49  ;;  %3598 = vmatprep.subr.bf16.mxu1 %v6105_v51 }
 0x7e9   :  { %v2757_v37 = vpop.f32.mrf.mxu0  ;;  %v2798_v39 = vpop.f32.mrf.mxu1 }
 0x7ea   :  { %v2805_v13 = vadd.f32 %v2757_v37, %v6769_v40  ;;  %v2807_v7 = vadd.f32 %v2798_v39, %v6770_v4 }
 0x7eb   :  { %v2759_v25 = vpop.f32.mrf.mxu0  ;;  %v2800_v36 = vpop.f32.mrf.mxu1 }
 0x7ec   :  { %v4724_v16 = vmul.f32 -1.442695, %v2805_v13  ;;  %v2806_v18 = vadd.f32 %v2759_v25, %v5734_v50  ;;  %v2808_v45 = vadd.f32 %v2800_v36, %v5737_v41 }
 0x7ed   :  { %v2761_v57 = vpop.f32.mrf.mxu0  ;;  %v2802_v14 = vpop.f32.mrf.mxu1 }
 0x7ee   :  { %5138 = vpow2.f32 %v4724_v16  ;;  %v4725_v60 = vmul.f32 -1.442695, %v2806_v18  ;;  %v4726_v9 = vmul.f32 -1.442695, %v2808_v45 }
 0x7ef   :  { %v2762_v2 = vpop.f32.mrf.mxu0  ;;  %v2803_v46 = vpop.f32.mrf.mxu1 }
 0x7f0   :  { %5140 = vpow2.f32 %v4725_v60 }
 0x7f1   :  { %5142 = vtanh.f32 %v2807_v7 }
 0x7f2   :  { %5144 = vpow2.f32 %v4726_v9 }
 0x7fb   :  { %v5139_v55 = vpop.eup %5138 }
 0x7fc   :  { %v2812_v43 = vadd.f32 1.0, %v5139_v55 }
 0x7fd   :  { %v5141_v0 = vpop.eup %5140 }
 0x7fe   :  { %5146 = vrcp.f32 %v2812_v43  ;;  %v2818_v58 = vadd.f32 1.0, %v5141_v0  ;;  %v5143_v50 = vpop.eup %5142 }
 0x7ff   :  { %v5145_v52 = vpop.eup %5144 }
 0x800   :  { %5148 = vrcp.f32 %v2818_v58  ;;  %v2825_v19 = vadd.f32 1.0, %v5145_v52 }
 0x802   :  { %5150 = vrcp.f32 %v2825_v19 }
 0x809   :  { %v3168_v36 = vpop.f32.mrf.mxu1 }
 0x80b   :  { %v5147_v62 = vpop.eup %5146  ;;  %v3170_v18 = vpop.f32.mrf.mxu1 }
 0x80c   :  { %v2829_v24 = vmul.f32 %v5147_v62, %v5143_v50 }
 0x80d   :  { %v5149_v33 = vpop.eup %5148  ;;  %v6256_v14 = vpop.f32.mrf.mxu1 }
 0x80e   :  { %v2828_v37 = vmul.f32 %v5149_v33, %v6082_v15  ;;  %v3668_v15 = vsel %vm3667_vm3, 1, %v6751_v56 }
 0x80f   :  { %v5151_v39 = vpop.eup %5150  ;;  %3670 = vperm.xlu0 %4822, %v3668_v15   ;;  %v6260_v2 = vpop.f32.mrf.mxu1  ;;  %v6789_v15 = vld [vmem:[#allocation15_spill] sm:$0xff] }
 0x810   :  { %v2830_v41 = vadd.f32 %v2829_v24, %v2828_v37 }
 0x811   :  { %v6264_v45 = vpop.f32.mrf.mxu1 }
 0x812   :  { %5152 = vtanh.f32 %v2830_v41  ;;  %6771 = vst [vmem:[#allocation16_spill] sm:$0xff] %v6264_v45  ;;  %v2879_v41 = vld [vmem:[%s6721_s7] sm:$0xf]  ;;  %v6796_v45 = vsub.s32 3, %v6789_v15  ;;  %s5406_s7 = smov [#allocation11]  }
 0x813   :  { %v6268_v7 = vpop.f32.mrf.mxu1  ;;  %s4413_s15 = sshll.u32 %s5406_s7, 4  ;;  %s4414_s15 = int_to_ptr.vmem [resolvable:$true] %s4413_s15 }
 0x814   :  { %6772 = vst [vmem:[#allocation17_spill] sm:$0xff] %v6268_v7  ;;  %s5374_s16 = scalar_lea.vmem %s4414_s15, 128  ;;  %p5379_p2 = scmp.lt.s32.totalorder %s4414_s15, %s4414_s15 }
 0x815   :  { %v6272_v55 = vpop.f32.mrf.mxu1  ;;  %p5375_p1 = scmp.ne.s32.totalorder %s4414_s15, %s5374_s16  ;;  %p5380_p3 = scmp.lt.s32.totalorder %s5374_s16, %s5374_s16 }
 0x816   :  { %6774 = vst [vmem:[#allocation20_spill] sm:$0xff] %v6272_v55 }
 0x817   :  { %v6276_v0 = vpop.f32.mrf.mxu1  ;;  %p5381_p4 = por %p5380_p3, %p5379_p2 }
 0x818   :  { %6776 = vst [vmem:[#allocation21_spill] sm:$0xff] %v6276_v0 }
 0x819   :  { %v6280_v50 = vpop.f32.mrf.mxu1  ;;  %p5382_p5 = pnand %p5381_p4, %p5375_p1 }
 0x81a   :  { %6778 = vst [vmem:[#allocation24_spill] sm:$0xff] %v6280_v50 }
 0x81b   :  { %v6284_v62 = vpop.f32.mrf.mxu1 }
 0x81c   :  { %6780 = vst [vmem:[#allocation25_spill] sm:$0xff] %v6284_v62 }
 0x81d   :  { %v6288_v33 = vpop.f32.mrf.mxu1 }
 0x81e   :  { %6782 = vst [vmem:[#allocation28_spill] sm:$0xff] %v6288_v33 }
 0x81f   :  { %v5153_v40 = vpop.eup %5152  ;;  %v6292_v37 = vpop.f32.mrf.mxu1 }
 0x820   :  { %v2832_v13 = vmul.f32 %v5153_v40, %v5151_v39  ;;  %6784 = vst [vmem:[#allocation29_spill] sm:$0xff] %v6292_v37  ;;  %v6793_v37 = vsub.s32 1, %v6789_v15 }
 0x822   :  { %v2846_v25 = vpack.c.bf16 %v2832_v13, %v6085_v38  ;;  %v3095_v38 = vpop.f32.mrf.mxu0  ;;  %v6315_v62 = vrot.slane %v2879_v41, %v6793_v37 }
 0x824   :  { %3124 = vmatmul.mubr.bf16.gmra.mxu0 %v2846_v25  ;;  %3197 = vmatmul.mubr.bf16.gmra.mxu1 %v2846_v25  ;;  %v3097_v16 = vpop.f32.mrf.mxu0 }
 0x825   :  { %3467 = vmatprep.mubr.bf16.mxu0 %v6751_v56  ;;  %3508 = vmatprep.mubr.bf16.mxu1 %v6751_v56 }
 0x826   :  { %v6254_v57 = vpop.f32.mrf.mxu0 }
 0x828   :  { %v6258_v60 = vpop.f32.mrf.mxu0 }
 0x82a   :  { %v6262_v46 = vpop.f32.mrf.mxu0 }
 0x82c   :  { %3468 = vmatmul.mubr.bf16.vlgmr.msra.gmra.mxu0 %v6751_v56  ;;  %3509 = vmatmul.mubr.bf16.vlgmr.msra.gmra.mxu1 %v6751_v56  ;;  %v6266_v4 = vpop.f32.mrf.mxu0 }
 0x82d   :  { %3558 = vmatpush1.bf16.msra.mxu0 %v6107_v3  ;;  %3599 = vmatpush1.bf16.msra.mxu1 %v6109_v22 }
 0x82e   :  { %3559 = vmatprep.subr.bf16.mxu0 %v6115_v34  ;;  %3600 = vmatprep.subr.bf16.mxu1 %v6117_v17  ;;  %v6270_v9 = vpop.f32.mrf.mxu0 }
 0x82f   :  { %3589 = vmatprep.mubr.bf16.mxu0 %v6751_v56  ;;  %3630 = vmatprep.mubr.bf16.mxu1 %v6751_v56  ;;  %6773 = vst [vmem:[#allocation19_spill] sm:$0xff] %v6270_v9 }
 0x830   :  { %v6274_v43 = vpop.f32.mrf.mxu0 }
 0x831   :  { %3560 = vmatpush1.bf16.msra.mxu0 %v6119_v54  ;;  %3601 = vmatpush1.bf16.msra.mxu1 %v6121_v42  ;;  %6775 = vst [vmem:[#allocation18_spill] sm:$0xff] %v6274_v43 }
 0x832   :  { %3561 = vmatprep.subr.bf16.mxu0 %v6127_v48  ;;  %3602 = vmatprep.subr.bf16.mxu1 %v6129_v61  ;;  %v6278_v58 = vpop.f32.mrf.mxu0 }
 0x833   :  { %6777 = vst [vmem:[#allocation23_spill] sm:$0xff] %v6278_v58  ;;  %v3098_v58 = vadd.f32 %v3097_v16, %v6315_v62  ;;  %v6797_v16 = vsub.s32 2, %v6789_v15 }
 0x834   :  { %v6282_v52 = vpop.f32.mrf.mxu0 }
 0x835   :  { %3562 = vmatpush1.bf16.msra.mxu0 %v6131_v47  ;;  %3603 = vmatpush1.bf16.msra.mxu1 %v6133_v5  ;;  %6779 = vst [vmem:[#allocation22_spill] sm:$0xff] %v6282_v52 }
 0x836   :  { %3563 = vmatprep.subr.bf16.mxu0 %v6139_v63  ;;  %3604 = vmatprep.subr.bf16.mxu1 %v6141_v59  ;;  %v6286_v24 = vpop.f32.mrf.mxu0 }
 0x837   :  { %6781 = vst [vmem:[#allocation27_spill] sm:$0xff] %v6286_v24  ;;  %v6790_v24 = vsub.s32 0, %v6789_v15 }
 0x838   :  { %v6290_v19 = vpop.f32.mrf.mxu0 }
 0x839   :  { %3564 = vmatpush1.bf16.msra.mxu0 %v6143_v53  ;;  %3605 = vmatpush1.bf16.msra.mxu1 %v6145_v44  ;;  %6783 = vst [vmem:[#allocation26_spill] sm:$0xff] %v6290_v19  ;;  %v6307_v50 = vrot.slane %v2879_v41, %v6790_v24 }
 0x83a   :  { %3565 = vmatprep.subr.bf16.mxu0 %v6151_v6  ;;  %3606 = vmatprep.subr.bf16.mxu1 %v6153_v8 }
 0x83d   :  { %3566 = vmatpush1.bf16.msra.mxu0 %v6155_v10  ;;  %3607 = vmatpush1.bf16.msra.mxu1 %v6157_v11 }
 0x83e   :  { %3567 = vmatprep.subr.bf16.mxu0 %v6163_v12  ;;  %3608 = vmatprep.subr.bf16.mxu1 %v6165_v29 }
 0x841   :  { %3568 = vmatpush1.bf16.msra.mxu0 %v6167_v20  ;;  %3609 = vmatpush1.bf16.msra.mxu1 %v6169_v21 }
 0x842   :  { %3569 = vmatprep.subr.bf16.mxu0 %v6175_v23  ;;  %3610 = vmatprep.subr.bf16.mxu1 %v6177_v32 }
 0x845   :  { %3570 = vmatpush1.bf16.msra.mxu0 %v6179_v26  ;;  %3611 = vmatpush1.bf16.msra.mxu1 %v6181_v1 }
 0x846   :  { %3571 = vmatprep.subr.bf16.mxu0 %v6183_v27  ;;  %3612 = vmatprep.subr.bf16.mxu1 %v6187_v28 }
 0x849   :  { %3572 = vmatpush1.bf16.msra.mxu0 %v6191_v30  ;;  %3613 = vmatpush1.bf16.msra.mxu1 %v6193_v31 }
 0x84a   :  { %3679 = vmatprep.subr.bf16.mxu0 %v6103_v49  ;;  %3720 = vmatprep.subr.bf16.mxu1 %v6105_v51 }
 0x8e4   :  { %v6297_v39 = vpop.f32.mrf.mxu0  ;;  %v6299_v40 = vpop.f32.mrf.mxu1 }
 0x8e5   :  { %6785 = vst [vmem:[#allocation31_spill] sm:$0xff] %v6297_v39  ;;  %6786 = vst [vmem:[#allocation32_spill] sm:$0xff] %v6299_v40  ;;  %v3096_v40 = vadd.f32 %v3095_v38, %v6307_v50 }
 0x8e6   :  { %v6301_v13 = vpop.f32.mrf.mxu0  ;;  %v6303_v25 = vpop.f32.mrf.mxu1 }
 0x8e7   :  { %6787 = vst [vmem:[#allocation30_spill] sm:$0xff] %v6301_v13  ;;  %6788 = vst [vmem:[#allocation33_spill] sm:$0xff] %v6303_v25 }
 0x8e8   :  { %v6309_v33 = vpop.f32.mrf.mxu0  ;;  %v6311_v19 = vpop.f32.mrf.mxu1 }
 0x8e9   :  { %6791 = vst [vmem:[#allocation34_spill] sm:$0xff] %v6309_v33  ;;  %6792 = vst [vmem:[#allocation15_spill] sm:$0xff] %v6311_v19 }
 0x8ea   :  { %v6317_v52 = vpop.f32.mrf.mxu0  ;;  %v6319_v39 = vpop.f32.mrf.mxu1 }
 0x8eb   :  { %6794 = vst [vmem:[#allocation35_spill] sm:$0xff] %v6317_v52  ;;  %6795 = vst [vmem:[#allocation36_spill] sm:$0xff] %v6319_v39  ;;  %v6325_v52 = vrot.slane %v2879_v41, %v6796_v45 }
 0x8ec   :  { %v3469_v13 = vpop.f32.mrf.mxu0  ;;  %v3510_v25 = vpop.f32.mrf.mxu1 }
 0x8ed   :  { %v3517_v24 = vadd.f32 %v3469_v13, %v3096_v40  ;;  %v3171_v38 = vadd.f32 %v3170_v18, %v6325_v52  ;;  %v6330_v40 = vrot.slane %v2879_v41, %v6797_v16 }
 0x8ee   :  { %v3471_v55 = vpop.f32.mrf.mxu0  ;;  %v3512_v0 = vpop.f32.mrf.mxu1 }
 0x8ef   :  { %v4791_v33 = vmul.f32 -1.442695, %v3517_v24  ;;  %v3518_v43 = vadd.f32 %v3471_v55, %v3098_v58  ;;  %v3520_v13 = vadd.f32 %v3512_v0, %v3171_v38  ;;  %v3169_v55 = vadd.f32 %v3168_v36, %v6330_v40 }
 0x8f0   :  { %v3473_v19 = vpop.f32.mrf.mxu0  ;;  %v3514_v9 = vpop.f32.mrf.mxu1 }
 0x8f1   :  { %5154 = vpow2.f32 %v4791_v33  ;;  %v4792_v37 = vmul.f32 -1.442695, %v3518_v43  ;;  %v4793_v58 = vmul.f32 -1.442695, %v3520_v13  ;;  %v3519_v33 = vadd.f32 %v3510_v25, %v3169_v55 }
 0x8f2   :  { %v3474_v39 = vpop.f32.mrf.mxu0  ;;  %v3515_v7 = vpop.f32.mrf.mxu1  ;;  %v3790_v13 = vsel %vm3789_vm4, 1, %v6751_v56  ;;  %v3100_v55 = vadd.f32 %v6254_v57, %v6307_v50  ;;  %v3175_v57 = vadd.f32 %v6260_v2, %v6325_v52 }
 0x8f3   :  { %5156 = vpow2.f32 %v4792_v37  ;;  %3792 = vperm.xlu1 %4823, %v3790_v13  }
 0x8f4   :  { %5158 = vpow2.f32 %v4793_v58 }
 0x8fe   :  { %v5155_v9 = vpop.eup %5154 }
 0x8ff   :  { %v3524_v43 = vadd.f32 1.0, %v5155_v9 }
 0x900   :  { %v5157_v19 = vpop.eup %5156 }
 0x901   :  { %5160 = vrcp.f32 %v3524_v43  ;;  %v3530_v45 = vadd.f32 1.0, %v5157_v19  ;;  %v5159_v7 = vpop.eup %5158 }
 0x902   :  { %5162 = vtanh.f32 %v3519_v33  ;;  %v3537_v15 = vadd.f32 1.0, %v5159_v7  ;;  %v3102_v33 = vadd.f32 %v6258_v60, %v6315_v62 }
 0x903   :  { %5164 = vrcp.f32 %v3530_v45 }
 0x904   :  { %5166 = vrcp.f32 %v3537_v15 }
 0x90e   :  { %v5161_v39 = vpop.eup %5160 }
 0x90f   :  { %v5163_v18 = vpop.eup %5162 }
 0x910   :  { %v5165_v24 = vpop.eup %5164  ;;  %v3541_v37 = vmul.f32 %v5163_v18, %v5161_v39 }
 0x911   :  { %v3540_v41 = vmul.f32 0.0, %v5165_v24  ;;  %v5167_v36 = vpop.eup %5166 }
 0x913   :  { %v6333_v0 = vadd.f32 %v3541_v37, %v3540_v41 }
 0x915   :  { %5168 = vtanh.f32 %v6333_v0 }
 0x922   :  { %v5169_v25 = vpop.eup %5168 }
 0x923   :  { %v6336_v38 = vmul.f32 %v5169_v25, %v5167_v36  ;;  %v3173_v25 = vadd.f32 %v6256_v14, %v6330_v40  ;;  %v3549_v14 = vpop.permute.xlu0 %3548 }
 0x924   :  { %vm3550_vm5 = vcmp.eq.s32.totalorder %v3549_v14, 1  ;;  %v6798_v14 = vld [vmem:[#allocation17_spill] sm:$0xff] }
 0x925   :  { %v3556_v16 = vpack.c.bf16 %v6336_v38, %v6336_v38 }
 0x927   :  { %3590 = vmatmul.mubr.bf16.vlgmr.msra.gmra.mxu0 %v3556_v16  ;;  %3631 = vmatmul.mubr.bf16.vlgmr.msra.gmra.mxu1 %v3556_v16 }
 0x928   :  { %3680 = vmatpush1.bf16.msra.mxu0 %v6107_v3  ;;  %3721 = vmatpush1.bf16.msra.mxu1 %v6109_v22 }
 0x929   :  { %3681 = vmatprep.subr.bf16.mxu0 %v6115_v34  ;;  %3722 = vmatprep.subr.bf16.mxu1 %v6117_v17 }
 0x92a   :  { %3711 = vmatprep.mubr.bf16.mxu0 %v6751_v56  ;;  %3752 = vmatprep.mubr.bf16.mxu1 %v6751_v56 }
 0x92c   :  { %3682 = vmatpush1.bf16.msra.mxu0 %v6119_v54  ;;  %3723 = vmatpush1.bf16.msra.mxu1 %v6121_v42 }
 0x92d   :  { %3683 = vmatprep.subr.bf16.mxu0 %v6127_v48  ;;  %3724 = vmatprep.subr.bf16.mxu1 %v6129_v61 }
 0x930   :  { %3684 = vmatpush1.bf16.msra.mxu0 %v6131_v47  ;;  %3725 = vmatpush1.bf16.msra.mxu1 %v6133_v5 }
 0x931   :  { %3685 = vmatprep.subr.bf16.mxu0 %v6139_v63  ;;  %3726 = vmatprep.subr.bf16.mxu1 %v6141_v59 }
 0x934   :  { %3686 = vmatpush1.bf16.msra.mxu0 %v6143_v53  ;;  %3727 = vmatpush1.bf16.msra.mxu1 %v6145_v44 }
 0x935   :  { %3687 = vmatprep.subr.bf16.mxu0 %v6151_v6  ;;  %3728 = vmatprep.subr.bf16.mxu1 %v6153_v8 }
 0x938   :  { %3688 = vmatpush1.bf16.msra.mxu0 %v6155_v10  ;;  %3729 = vmatpush1.bf16.msra.mxu1 %v6157_v11 }
 0x939   :  { %3689 = vmatprep.subr.bf16.mxu0 %v6163_v12  ;;  %3730 = vmatprep.subr.bf16.mxu1 %v6165_v29 }
 0x93c   :  { %3690 = vmatpush1.bf16.msra.mxu0 %v6167_v20  ;;  %3731 = vmatpush1.bf16.msra.mxu1 %v6169_v21 }
 0x93d   :  { %3691 = vmatprep.subr.bf16.mxu0 %v6175_v23  ;;  %3732 = vmatprep.subr.bf16.mxu1 %v6177_v32 }
 0x940   :  { %3692 = vmatpush1.bf16.msra.mxu0 %v6179_v26  ;;  %3733 = vmatpush1.bf16.msra.mxu1 %v6181_v1 }
 0x941   :  { %3693 = vmatprep.subr.bf16.mxu0 %v6183_v27  ;;  %3734 = vmatprep.subr.bf16.mxu1 %v6187_v28 }
 0x944   :  { %3694 = vmatpush1.bf16.msra.mxu0 %v6191_v30  ;;  %3735 = vmatpush1.bf16.msra.mxu1 %v6193_v31 }
 0x945   :  { %3801 = vmatprep.subr.bf16.mxu0 %v6103_v49  ;;  %3842 = vmatprep.subr.bf16.mxu1 %v6105_v51 }
 0x9e7   :  { %v3591_v58 = vpop.f32.mrf.mxu0  ;;  %v3632_v9 = vpop.f32.mrf.mxu1 }
 0x9e8   :  { %v3639_v43 = vadd.f32 %v3591_v58, %v3100_v55  ;;  %v3641_v60 = vadd.f32 %v3632_v9, %v3173_v25  ;;  %v3671_v9 = vpop.permute.xlu0 %3670 }
 0x9e9   :  { %v3593_v19 = vpop.f32.mrf.mxu0  ;;  %v3634_v45 = vpop.f32.mrf.mxu1  ;;  %vm3672_vm6 = vcmp.eq.s32.totalorder %v3671_v9, 1 }
 0x9ea   :  { %v4794_v7 = vmul.f32 -1.442695, %v3639_v43  ;;  %v3640_v39 = vadd.f32 %v3593_v19, %v3102_v33  ;;  %v3642_v36 = vadd.f32 %v3634_v45, %v3175_v57  ;;  %v3551_v57 = vsel %vm3550_vm5, %v6336_v38, 0.0 }
 0x9eb   :  { %v3595_v18 = vpop.f32.mrf.mxu0  ;;  %v3636_v24 = vpop.f32.mrf.mxu1  ;;  %v3106_v38 = vadd.f32 %v6262_v46, %v6307_v50  ;;  %v3181_v46 = vadd.f32 %v6798_v14, %v6325_v52 }
 0x9ec   :  { %5170 = vpow2.f32 %v4794_v7  ;;  %v4795_v15 = vmul.f32 -1.442695, %v3640_v39  ;;  %v4796_v16 = vmul.f32 -1.442695, %v3642_v36 }
 0x9ed   :  { %v3596_v41 = vpop.f32.mrf.mxu0  ;;  %v3637_v37 = vpop.f32.mrf.mxu1 }
 0x9ee   :  { %5172 = vpow2.f32 %v4795_v15 }
 0x9ef   :  { %5174 = vtanh.f32 %v3641_v60 }
 0x9f0   :  { %5176 = vpow2.f32 %v4796_v16 }
 0x9f9   :  { %v5171_v13 = vpop.eup %5170 }
 0x9fa   :  { %v3646_v55 = vadd.f32 1.0, %v5171_v13  ;;  %v3108_v13 = vadd.f32 %v6266_v4, %v6315_v62 }
 0x9fb   :  { %v5173_v58 = vpop.eup %5172 }
 0x9fc   :  { %5178 = vrcp.f32 %v3646_v55  ;;  %v3652_v33 = vadd.f32 1.0, %v5173_v58  ;;  %v5175_v43 = vpop.eup %5174 }
 0x9fd   :  { %v5177_v19 = vpop.eup %5176 }
 0x9fe   :  { %5180 = vrcp.f32 %v3652_v33  ;;  %v3659_v2 = vadd.f32 1.0, %v5177_v19 }
 0xa00   :  { %5182 = vrcp.f32 %v3659_v2 }
 0xa09   :  { %v5179_v7 = vpop.eup %5178 }
 0xa0a   :  { %v3663_v39 = vmul.f32 %v5179_v7, %v5175_v43 }
 0xa0b   :  { %v5181_v18 = vpop.eup %5180 }
 0xa0c   :  { %v3662_v45 = vmul.f32 %v5181_v18, %v6333_v0  ;;  %v3912_v0 = vsel %vm3911_vm7, 1, %v6751_v56 }
 0xa0d   :  { %v5183_v15 = vpop.eup %5182  ;;  %3914 = vperm.xlu1 %4823, %v3912_v0  }
 0xa0e   :  { %v6385_v24 = vadd.f32 %v3663_v39, %v3662_v45 }
 0xa10   :  { %5184 = vtanh.f32 %v6385_v24 }
 0xa1d   :  { %v5185_v41 = vpop.eup %5184 }
 0xa1e   :  { %v3666_v37 = vmul.f32 %v5185_v41, %v5183_v15  ;;  %v6799_v15 = vld [vmem:[#allocation16_spill] sm:$0xff] }
 0xa1f   :  { %v3179_v41 = vadd.f32 %v6799_v15, %v6330_v40 }
 0xa20   :  { %v6389_v36 = vsel %vm3672_vm6, %v3666_v37, %v3551_v57  ;;  %v3678_v25 = vpack.c.bf16 %v3666_v37, %v3666_v37 }
 0xa22   :  { %3712 = vmatmul.mubr.bf16.vlgmr.msra.gmra.mxu0 %v3678_v25  ;;  %3753 = vmatmul.mubr.bf16.vlgmr.msra.gmra.mxu1 %v3678_v25 }
 0xa23   :  { %3802 = vmatpush1.bf16.msra.mxu0 %v6107_v3  ;;  %3843 = vmatpush1.bf16.msra.mxu1 %v6109_v22 }
 0xa24   :  { %3803 = vmatprep.subr.bf16.mxu0 %v6115_v34  ;;  %3844 = vmatprep.subr.bf16.mxu1 %v6117_v17 }
 0xa25   :  { %3833 = vmatprep.mubr.bf16.mxu0 %v6751_v56  ;;  %3874 = vmatprep.mubr.bf16.mxu1 %v6751_v56 }
 0xa27   :  { %3804 = vmatpush1.bf16.msra.mxu0 %v6119_v54  ;;  %3845 = vmatpush1.bf16.msra.mxu1 %v6121_v42 }
 0xa28   :  { %3805 = vmatprep.subr.bf16.mxu0 %v6127_v48  ;;  %3846 = vmatprep.subr.bf16.mxu1 %v6129_v61 }
 0xa2b   :  { %3806 = vmatpush1.bf16.msra.mxu0 %v6131_v47  ;;  %3847 = vmatpush1.bf16.msra.mxu1 %v6133_v5 }
 0xa2c   :  { %3807 = vmatprep.subr.bf16.mxu0 %v6139_v63  ;;  %3848 = vmatprep.subr.bf16.mxu1 %v6141_v59 }
 0xa2f   :  { %3808 = vmatpush1.bf16.msra.mxu0 %v6143_v53  ;;  %3849 = vmatpush1.bf16.msra.mxu1 %v6145_v44 }
 0xa30   :  { %3809 = vmatprep.subr.bf16.mxu0 %v6151_v6  ;;  %3850 = vmatprep.subr.bf16.mxu1 %v6153_v8 }
 0xa33   :  { %3810 = vmatpush1.bf16.msra.mxu0 %v6155_v10  ;;  %3851 = vmatpush1.bf16.msra.mxu1 %v6157_v11 }
 0xa34   :  { %3811 = vmatprep.subr.bf16.mxu0 %v6163_v12  ;;  %3852 = vmatprep.subr.bf16.mxu1 %v6165_v29 }
 0xa37   :  { %3812 = vmatpush1.bf16.msra.mxu0 %v6167_v20  ;;  %3853 = vmatpush1.bf16.msra.mxu1 %v6169_v21 }
 0xa38   :  { %3813 = vmatprep.subr.bf16.mxu0 %v6175_v23  ;;  %3854 = vmatprep.subr.bf16.mxu1 %v6177_v32 }
 0xa3b   :  { %3814 = vmatpush1.bf16.msra.mxu0 %v6179_v26  ;;  %3855 = vmatpush1.bf16.msra.mxu1 %v6181_v1 }
 0xa3c   :  { %3815 = vmatprep.subr.bf16.mxu0 %v6183_v27  ;;  %3856 = vmatprep.subr.bf16.mxu1 %v6187_v28 }
 0xa3f   :  { %3816 = vmatpush1.bf16.msra.mxu0 %v6191_v30  ;;  %3857 = vmatpush1.bf16.msra.mxu1 %v6193_v31 }
 0xa40   :  { %3923 = vmatprep.subr.bf16.mxu0 %v6103_v49  ;;  %3964 = vmatprep.subr.bf16.mxu1 %v6105_v51 }
 0xae2   :  { %v3713_v60 = vpop.f32.mrf.mxu0  ;;  %v3754_v16 = vpop.f32.mrf.mxu1 }
 0xae3   :  { %v3761_v55 = vadd.f32 %v3713_v60, %v3106_v38  ;;  %v3763_v4 = vadd.f32 %v3754_v16, %v3179_v41  ;;  %v3793_v16 = vpop.permute.xlu1 %3792  ;;  %v6801_v41 = vld [vmem:[#allocation18_spill] sm:$0xff] }
 0xae4   :  { %v3715_v58 = vpop.f32.mrf.mxu0  ;;  %v3756_v33 = vpop.f32.mrf.mxu1  ;;  %vm3794_vm8 = vcmp.eq.s32.totalorder %v3793_v16, 1 }
 0xae5   :  { %v4797_v43 = vmul.f32 -1.442695, %v3761_v55  ;;  %v3762_v19 = vadd.f32 %v3715_v58, %v3108_v13  ;;  %v3764_v9 = vadd.f32 %v3756_v33, %v3181_v46 }
 0xae6   :  { %v3717_v7 = vpop.f32.mrf.mxu0  ;;  %v3758_v39 = vpop.f32.mrf.mxu1 }
 0xae7   :  { %5186 = vpow2.f32 %v4797_v43  ;;  %v4798_v18 = vmul.f32 -1.442695, %v3762_v19  ;;  %v4799_v37 = vmul.f32 -1.442695, %v3764_v9 }
 0xae8   :  { %v3718_v2 = vpop.f32.mrf.mxu0  ;;  %v3759_v45 = vpop.f32.mrf.mxu1 }
 0xae9   :  { %5188 = vpow2.f32 %v4798_v18 }
 0xaea   :  { %5190 = vtanh.f32 %v3763_v4  ;;  %v3112_v4 = vadd.f32 %v6801_v41, %v6315_v62 }
 0xaeb   :  { %5192 = vpow2.f32 %v4799_v37 }
 0xaf4   :  { %v5187_v57 = vpop.eup %5186 }
 0xaf5   :  { %v3768_v25 = vadd.f32 1.0, %v5187_v57 }
 0xaf6   :  { %v5189_v0 = vpop.eup %5188 }
 0xaf7   :  { %5194 = vrcp.f32 %v3768_v25  ;;  %v3774_v38 = vadd.f32 1.0, %v5189_v0  ;;  %v5191_v60 = vpop.eup %5190 }
 0xaf8   :  { %v5193_v13 = vpop.eup %5192 }
 0xaf9   :  { %5196 = vrcp.f32 %v3774_v38  ;;  %v3781_v19 = vadd.f32 1.0, %v5193_v13 }
 0xafb   :  { %5198 = vrcp.f32 %v3781_v19 }
 0xb04   :  { %v5195_v55 = vpop.eup %5194 }
 0xb05   :  { %v3785_v58 = vmul.f32 %v5195_v55, %v5191_v60 }
 0xb06   :  { %v5197_v43 = vpop.eup %5196 }
 0xb07   :  { %v3784_v33 = vmul.f32 %v5197_v43, %v6385_v24  ;;  %v4034_v24 = vsel %vm4033_vm9, 1, %v6751_v56 }
 0xb08   :  { %v5199_v39 = vpop.eup %5198  ;;  %4036 = vperm.xlu0 %4822, %v4034_v24  }
 0xb09   :  { %v6436_v7 = vadd.f32 %v3785_v58, %v3784_v33  ;;  %v6802_v58 = vld [vmem:[#allocation21_spill] sm:$0xff]  ;;  %v6803_v33 = vld [vmem:[#allocation20_spill] sm:$0xff] }
 0xb0a   :  { %v3185_v43 = vadd.f32 %v6802_v58, %v6325_v52  ;;  %v3183_v16 = vadd.f32 %v6803_v33, %v6330_v40 }
 0xb0b   :  { %5200 = vtanh.f32 %v6436_v7 }
 0xb18   :  { %v5201_v18 = vpop.eup %5200 }
 0xb19   :  { %v3788_v2 = vmul.f32 %v5201_v18, %v5199_v39 }
 0xb1b   :  { %v6440_v45 = vsel %vm3794_vm8, %v3788_v2, %v6389_v36  ;;  %v3800_v14 = vpack.c.bf16 %v3788_v2, %v3788_v2  ;;  %v6800_v36 = vld [vmem:[#allocation19_spill] sm:$0xff] }
 0xb1c   :  { %v3110_v46 = vadd.f32 %v6800_v36, %v6307_v50 }
 0xb1d   :  { %3834 = vmatmul.mubr.bf16.vlgmr.msra.gmra.mxu0 %v3800_v14  ;;  %3875 = vmatmul.mubr.bf16.vlgmr.msra.gmra.mxu1 %v3800_v14 }
 0xb1e   :  { %3924 = vmatpush1.bf16.msra.mxu0 %v6107_v3  ;;  %3965 = vmatpush1.bf16.msra.mxu1 %v6109_v22 }
 0xb1f   :  { %3925 = vmatprep.subr.bf16.mxu0 %v6115_v34  ;;  %3966 = vmatprep.subr.bf16.mxu1 %v6117_v17 }
 0xb20   :  { %3955 = vmatprep.mubr.bf16.mxu0 %v6751_v56  ;;  %3996 = vmatprep.mubr.bf16.mxu1 %v6751_v56 }
 0xb22   :  { %3926 = vmatpush1.bf16.msra.mxu0 %v6119_v54  ;;  %3967 = vmatpush1.bf16.msra.mxu1 %v6121_v42 }
 0xb23   :  { %3927 = vmatprep.subr.bf16.mxu0 %v6127_v48  ;;  %3968 = vmatprep.subr.bf16.mxu1 %v6129_v61 }
 0xb26   :  { %3928 = vmatpush1.bf16.msra.mxu0 %v6131_v47  ;;  %3969 = vmatpush1.bf16.msra.mxu1 %v6133_v5 }
 0xb27   :  { %3929 = vmatprep.subr.bf16.mxu0 %v6139_v63  ;;  %3970 = vmatprep.subr.bf16.mxu1 %v6141_v59 }
 0xb2a   :  { %3930 = vmatpush1.bf16.msra.mxu0 %v6143_v53  ;;  %3971 = vmatpush1.bf16.msra.mxu1 %v6145_v44 }
 0xb2b   :  { %3931 = vmatprep.subr.bf16.mxu0 %v6151_v6  ;;  %3972 = vmatprep.subr.bf16.mxu1 %v6153_v8 }
 0xb2e   :  { %3932 = vmatpush1.bf16.msra.mxu0 %v6155_v10  ;;  %3973 = vmatpush1.bf16.msra.mxu1 %v6157_v11 }
 0xb2f   :  { %3933 = vmatprep.subr.bf16.mxu0 %v6163_v12  ;;  %3974 = vmatprep.subr.bf16.mxu1 %v6165_v29 }
 0xb32   :  { %3934 = vmatpush1.bf16.msra.mxu0 %v6167_v20  ;;  %3975 = vmatpush1.bf16.msra.mxu1 %v6169_v21 }
 0xb33   :  { %3935 = vmatprep.subr.bf16.mxu0 %v6175_v23  ;;  %3976 = vmatprep.subr.bf16.mxu1 %v6177_v32 }
 0xb36   :  { %3936 = vmatpush1.bf16.msra.mxu0 %v6179_v26  ;;  %3977 = vmatpush1.bf16.msra.mxu1 %v6181_v1 }
 0xb37   :  { %3937 = vmatprep.subr.bf16.mxu0 %v6183_v27  ;;  %3978 = vmatprep.subr.bf16.mxu1 %v6187_v28 }
 0xb3a   :  { %3938 = vmatpush1.bf16.msra.mxu0 %v6191_v30  ;;  %3979 = vmatpush1.bf16.msra.mxu1 %v6193_v31 }
 0xb3b   :  { %4045 = vmatprep.subr.bf16.mxu0 %v6103_v49  ;;  %4086 = vmatprep.subr.bf16.mxu1 %v6105_v51 }
 0xbdd   :  { %v3835_v9 = vpop.f32.mrf.mxu0  ;;  %v3876_v15 = vpop.f32.mrf.mxu1 }
 0xbde   :  { %v3883_v37 = vadd.f32 %v3835_v9, %v3110_v46  ;;  %v3885_v39 = vadd.f32 %v3876_v15, %v3183_v16  ;;  %v3915_v15 = vpop.permute.xlu1 %3914 }
 0xbdf   :  { %v3837_v57 = vpop.f32.mrf.mxu0  ;;  %v3878_v25 = vpop.f32.mrf.mxu1  ;;  %vm3916_vm10 = vcmp.eq.s32.totalorder %v3915_v15, 1  ;;  %v6574_v15 = vld [vmem:[#allocation10 + $0xa0] ss:$16 sps:$4 sm:$0xff]  }
 0xbe0   :  { %v4800_v0 = vmul.f32 -1.442695, %v3883_v37  ;;  %v3884_v49 = vadd.f32 %v3837_v57, %v3112_v4  ;;  %v3886_v19 = vadd.f32 %v3878_v25, %v3185_v43 }
 0xbe1   :  { %v3839_v38 = vpop.f32.mrf.mxu0  ;;  %v3880_v51 = vpop.f32.mrf.mxu1 }
 0xbe2   :  { %5202 = vpow2.f32 %v4800_v0  ;;  %v4801_v60 = vmul.f32 -1.442695, %v3884_v49  ;;  %v4802_v18 = vmul.f32 -1.442695, %v3886_v19 }
 0xbe3   :  { %v3840_v13 = vpop.f32.mrf.mxu0  ;;  %v3881_v55 = vpop.f32.mrf.mxu1 }
 0xbe4   :  { %5204 = vpow2.f32 %v4801_v60 }
 0xbe5   :  { %5206 = vtanh.f32 %v3885_v39  ;;  %v4037_v39 = vpop.permute.xlu0 %4036 }
 0xbe6   :  { %5208 = vpow2.f32 %v4802_v18  ;;  %vm4038_vm12 = vcmp.eq.s32.totalorder %v4037_v39, 1 }
 0xbef   :  { %v5203_v2 = vpop.eup %5202 }
 0xbf0   :  { %v3890_v14 = vadd.f32 1.0, %v5203_v2 }
 0xbf1   :  { %v5205_v24 = vpop.eup %5204 }
 0xbf2   :  { %5210 = vrcp.f32 %v3890_v14  ;;  %v3896_v36 = vadd.f32 1.0, %v5205_v24  ;;  %v5207_v46 = vpop.eup %5206 }
 0xbf3   :  { %v5209_v9 = vpop.eup %5208 }
 0xbf4   :  { %5212 = vrcp.f32 %v3896_v36  ;;  %v3903_v57 = vadd.f32 1.0, %v5209_v9  ;;  %v6551_v9 = vld [vmem:[#allocation10 + $0xe8] ss:$16 sps:$4 sm:$0xff]  }
 0xbf6   :  { %5214 = vrcp.f32 %v3903_v57  ;;  %v6565_v57 = vld [vmem:[#allocation10 + $0xc8] ss:$16 sps:$4 sm:$0xff]  }
 0xbff   :  { %v5211_v41 = vpop.eup %5210 }
 0xc00   :  { %v3907_v4 = vmul.f32 %v5211_v41, %v5207_v46  ;;  %v6548_v46 = vld [vmem:[#allocation10 + $0xe0] ss:$16 sps:$4 sm:$0xff]   ;;  %v6554_v41 = vld [vmem:[#allocation10 + $0xc4] ss:$16 sps:$4 sm:$0xff]  }
 0xc01   :  { %v5213_v37 = vpop.eup %5212 }
 0xc02   :  { %v3906_v25 = vmul.f32 %v5213_v37, %v6436_v7  ;;  %v6562_v37 = vld [vmem:[#allocation10 + $0xc0] ss:$16 sps:$4 sm:$0xff]  }
 0xc03   :  { %v5215_v49 = vpop.eup %5214 }
 0xc04   :  { %v6487_v0 = vadd.f32 %v3907_v4, %v3906_v25  ;;  %v6557_v4 = vld [vmem:[#allocation10 + $0xcc] ss:$16 sps:$4 sm:$0xff]   ;;  %v6568_v25 = vld [vmem:[#allocation10 + $0xa4] ss:$16 sps:$4 sm:$0xff]  }
 0xc06   :  { %5216 = vtanh.f32 %v6487_v0 }
 0xc13   :  { %v5217_v38 = vpop.eup %5216 }
 0xc14   :  { %v3910_v51 = vmul.f32 %v5217_v38, %v5215_v49  ;;  %v6577_v49 = vld [vmem:[#allocation10 + $0xa8] ss:$16 sps:$4 sm:$0xff]   ;;  %v6580_v38 = vld [vmem:[#allocation10 + $0x84] ss:$16 sps:$4 sm:$0xff]  }
 0xc16   :  { %v6491_v60 = vsel %vm3916_vm10, %v3910_v51, %v6440_v45  ;;  %v3922_v13 = vpack.c.bf16 %v3910_v51, %v3910_v51  ;;  %v6583_v51 = vld [vmem:[#allocation10 + $0x8c] ss:$16 sps:$4 sm:$0xff]  }
 0xc18   :  { %3956 = vmatmul.mubr.bf16.vlgmr.msra.gmra.mxu0 %v3922_v13  ;;  %3997 = vmatmul.mubr.bf16.vlgmr.msra.gmra.mxu1 %v3922_v13  ;;  %v6589_v13 = vld [vmem:[#allocation10 + $0x88] ss:$16 sps:$4 sm:$0xff]  }
 0xc19   :  { %4046 = vmatpush1.bf16.msra.mxu0 %v6107_v3  ;;  %4087 = vmatpush1.bf16.msra.mxu1 %v6109_v22  ;;  %v6525_v3 = vld [vmem:[#allocation10 + $0xe4] ss:$16 sps:$4 sm:$0xff]   ;;  %v6528_v22 = vld [vmem:[#allocation10 + $0xec] ss:$16 sps:$4 sm:$0xff]  }
 0xc1a   :  { %4047 = vmatprep.subr.bf16.mxu0 %v6115_v34  ;;  %4088 = vmatprep.subr.bf16.mxu1 %v6117_v17  ;;  %v4156_v34 = vsel %vm4155_vm11, 1, %v6751_v56  ;;  %v6804_v17 = vld [vmem:[#allocation23_spill] sm:$0xff] }
 0xc1b   :  { %4077 = vmatprep.mubr.bf16.mxu0 %v6751_v56  ;;  %4118 = vmatprep.mubr.bf16.mxu1 %v6751_v56 }
 0xc1c   :  { %4158 = vperm.xlu1 %4823, %v4156_v34   ;;  %v6592_v34 = vld [vmem:[#allocation10 + $0x64] ss:$16 sps:$4 sm:$0xff]  }
 0xc1d   :  { %4048 = vmatpush1.bf16.msra.mxu0 %v6119_v54  ;;  %4089 = vmatpush1.bf16.msra.mxu1 %v6121_v42  ;;  %v3116_v54 = vadd.f32 %v6804_v17, %v6307_v50  ;;  %v6595_v17 = vld [vmem:[#allocation10 + $0x6c] ss:$16 sps:$4 sm:$0xff]  }
 0xc1e   :  { %4049 = vmatprep.subr.bf16.mxu0 %v6127_v48  ;;  %4090 = vmatprep.subr.bf16.mxu1 %v6129_v61  ;;  %v6805_v61 = vld [vmem:[#allocation22_spill] sm:$0xff] }
 0xc21   :  { %4050 = vmatpush1.bf16.msra.mxu0 %v6131_v47  ;;  %4091 = vmatpush1.bf16.msra.mxu1 %v6133_v5  ;;  %v3118_v47 = vadd.f32 %v6805_v61, %v6315_v62  ;;  %v6607_v61 = vld [vmem:[#allocation10 + $0x4c] ss:$16 sps:$4 sm:$0xff]  }
 0xc22   :  { %4051 = vmatprep.subr.bf16.mxu0 %v6139_v63  ;;  %4092 = vmatprep.subr.bf16.mxu1 %v6141_v59 }
 0xc25   :  { %4052 = vmatpush1.bf16.msra.mxu0 %v6143_v53  ;;  %4093 = vmatpush1.bf16.msra.mxu1 %v6145_v44 }
 0xc26   :  { %4053 = vmatprep.subr.bf16.mxu0 %v6151_v6  ;;  %4094 = vmatprep.subr.bf16.mxu1 %v6153_v8 }
 0xc29   :  { %4054 = vmatpush1.bf16.msra.mxu0 %v6155_v10  ;;  %4095 = vmatpush1.bf16.msra.mxu1 %v6157_v11 }
 0xc2a   :  { %4055 = vmatprep.subr.bf16.mxu0 %v6163_v12  ;;  %4096 = vmatprep.subr.bf16.mxu1 %v6165_v29  ;;  %v6806_v29 = vld [vmem:[#allocation25_spill] sm:$0xff] }
 0xc2d   :  { %4056 = vmatpush1.bf16.msra.mxu0 %v6167_v20  ;;  %4097 = vmatpush1.bf16.msra.mxu1 %v6169_v21  ;;  %v3191_v20 = vadd.f32 %v6806_v29, %v6325_v52  ;;  %v6808_v29 = vld [vmem:[#allocation27_spill] sm:$0xff] }
 0xc2e   :  { %4057 = vmatprep.subr.bf16.mxu0 %v6175_v23  ;;  %4098 = vmatprep.subr.bf16.mxu1 %v6177_v32  ;;  %v6807_v23 = vld [vmem:[#allocation24_spill] sm:$0xff] }
 0xc2f   :  { %v3189_v32 = vadd.f32 %v6807_v23, %v6330_v40 }
 0xc31   :  { %4058 = vmatpush1.bf16.msra.mxu0 %v6179_v26  ;;  %4099 = vmatpush1.bf16.msra.mxu1 %v6181_v1 }
 0xc32   :  { %4059 = vmatprep.subr.bf16.mxu0 %v6183_v27  ;;  %4100 = vmatprep.subr.bf16.mxu1 %v6187_v28 }
 0xc35   :  { %4060 = vmatpush1.bf16.msra.mxu0 %v6191_v30  ;;  %4101 = vmatpush1.bf16.msra.mxu1 %v6193_v31 }
 0xc36   :  { %4167 = vmatprep.subr.bf16.mxu0 %v6525_v3  ;;  %4208 = vmatprep.subr.bf16.mxu1 %v6528_v22 }
 0xcd8   :  { %v3957_v42 = vpop.f32.mrf.mxu0  ;;  %v3998_v48 = vpop.f32.mrf.mxu1 }
 0xcd9   :  { %v4005_v5 = vadd.f32 %v3957_v42, %v3116_v54  ;;  %v4007_v26 = vadd.f32 %v3998_v48, %v3189_v32  ;;  %v6598_v54 = vld [vmem:[#allocation10 + $0x60] ss:$16 sps:$4 sm:$0xff]   ;;  %v6601_v42 = vld [vmem:[#allocation10 + $0x68] ss:$16 sps:$4 sm:$0xff]   ;;  %v6604_v48 = vld [vmem:[#allocation10 + $0x44] ss:$16 sps:$4 sm:$0xff]  }
 0xcda   :  { %v3959_v63 = vpop.f32.mrf.mxu0  ;;  %v4000_v59 = vpop.f32.mrf.mxu1  ;;  %v6809_v32 = vld [vmem:[#allocation26_spill] sm:$0xff] }
 0xcdb   :  { %v4803_v53 = vmul.f32 -1.442695, %v4005_v5  ;;  %v4006_v44 = vadd.f32 %v3959_v63, %v3118_v47  ;;  %v4008_v21 = vadd.f32 %v4000_v59, %v3191_v20  ;;  %v6610_v47 = vld [vmem:[#allocation10 + $0x40] ss:$16 sps:$4 sm:$0xff]   ;;  %v6613_v5 = vld [vmem:[#allocation10 + $0x48] ss:$16 sps:$4 sm:$0xff]   ;;  %v3120_v20 = vadd.f32 %v6808_v29, %v6307_v50 }
 0xcdc   :  { %v3961_v6 = vpop.f32.mrf.mxu0  ;;  %v4002_v8 = vpop.f32.mrf.mxu1  ;;  %v6616_v63 = vld [vmem:[#allocation10 + $0x24] ss:$16 sps:$4 sm:$0xff]   ;;  %v6619_v59 = vld [vmem:[#allocation10 + $0x2c] ss:$16 sps:$4 sm:$0xff]  }
 0xcdd   :  { %5218 = vpow2.f32 %v4803_v53  ;;  %v4804_v10 = vmul.f32 -1.442695, %v4006_v44  ;;  %v4805_v1 = vmul.f32 -1.442695, %v4008_v21  ;;  %v6622_v53 = vld [vmem:[#allocation10 + $0x20] ss:$16 sps:$4 sm:$0xff]  }
 0xcde   :  { %v3962_v11 = vpop.f32.mrf.mxu0  ;;  %v4003_v12 = vpop.f32.mrf.mxu1  ;;  %v6625_v44 = vld [vmem:[#allocation10 + $0x28] ss:$16 sps:$4 sm:$0xff]   ;;  %v6628_v6 = vld [vmem:[#allocation10 + $0x4] ss:$16 sps:$4 sm:$0xff]   ;;  %v6631_v8 = vld [vmem:[#allocation10 + $0xc] ss:$16 sps:$4 sm:$0xff]  }
 0xcdf   :  { %5220 = vpow2.f32 %v4804_v10  ;;  %v6634_v10 = vld [vmem:[#allocation10] ss:$16 sps:$4 sm:$0xff]   ;;  %v6637_v11 = vld [vmem:[#allocation10 + $0x8] ss:$16 sps:$4 sm:$0xff]   ;;  %v4278_v12 = vsel %vm4277_vm13, 1, %v6751_v56 }
 0xce0   :  { %5222 = vtanh.f32 %v4007_v26  ;;  %4280 = vperm.xlu0 %4822, %v4278_v12   ;;  %v3122_v26 = vadd.f32 %v6809_v32, %v6315_v62 }
 0xce1   :  { %5224 = vpow2.f32 %v4805_v1 }
 0xcea   :  { %v5219_v27 = vpop.eup %5218 }
 0xceb   :  { %v4012_v28 = vadd.f32 1.0, %v5219_v27 }
 0xcec   :  { %v5221_v30 = vpop.eup %5220 }
 0xced   :  { %5226 = vrcp.f32 %v4012_v28  ;;  %v4018_v31 = vadd.f32 1.0, %v5221_v30  ;;  %v5223_v7 = vpop.eup %5222 }
 0xcee   :  { %v5225_v45 = vpop.eup %5224 }
 0xcef   :  { %5228 = vrcp.f32 %v4018_v31  ;;  %v4025_v19 = vadd.f32 1.0, %v5225_v45 }
 0xcf1   :  { %5230 = vrcp.f32 %v4025_v19 }
 0xcfa   :  { %v5227_v55 = vpop.eup %5226 }
 0xcfb   :  { %v4029_v58 = vmul.f32 %v5227_v55, %v5223_v7 }
 0xcfc   :  { %v5229_v43 = vpop.eup %5228 }
 0xcfd   :  { %v4028_v33 = vmul.f32 %v5229_v43, %v6487_v0  ;;  %v6571_v0 = vld [vmem:[#allocation10 + $0xac] ss:$16 sps:$4 sm:$0xff]  }
 0xcfe   :  { %v5231_v18 = vpop.eup %5230 }
 0xcff   :  { %v6542_v16 = vadd.f32 %v4029_v58, %v4028_v33  ;;  %v6810_v58 = vld [vmem:[#allocation29_spill] sm:$0xff]  ;;  %v6811_v33 = vld [vmem:[#allocation28_spill] sm:$0xff] }
 0xd00   :  { %v3195_v43 = vadd.f32 %v6810_v58, %v6325_v52  ;;  %v3193_v39 = vadd.f32 %v6811_v33, %v6330_v40 }
 0xd01   :  { %5232 = vtanh.f32 %v6542_v16 }
 0xd0e   :  { %v5233_v2 = vpop.eup %5232 }
 0xd0f   :  { %v4032_v14 = vmul.f32 %v5233_v2, %v5231_v18 }
 0xd11   :  { %v6546_v24 = vsel %vm4038_vm12, %v4032_v14, %v6491_v60  ;;  %v4044_v36 = vpack.c.bf16 %v4032_v14, %v4032_v14  ;;  %v6586_v60 = vld [vmem:[#allocation10 + $0x80] ss:$16 sps:$4 sm:$0xff]  }
 0xd13   :  { %4078 = vmatmul.mubr.bf16.vlgmr.msra.gmra.mxu0 %v4044_v36  ;;  %4119 = vmatmul.mubr.bf16.vlgmr.msra.gmra.mxu1 %v4044_v36 }
 0xd14   :  { %4168 = vmatpush1.bf16.msra.mxu0 %v6548_v46  ;;  %4209 = vmatpush1.bf16.msra.mxu1 %v6551_v9 }
 0xd15   :  { %4169 = vmatprep.subr.bf16.mxu0 %v6554_v41  ;;  %4210 = vmatprep.subr.bf16.mxu1 %v6557_v4 }
 0xd16   :  { %4199 = vmatprep.mubr.bf16.mxu0 %v6751_v56  ;;  %4240 = vmatprep.mubr.bf16.mxu1 %v6751_v56 }
 0xd18   :  { %4170 = vmatpush1.bf16.msra.mxu0 %v6562_v37  ;;  %4211 = vmatpush1.bf16.msra.mxu1 %v6565_v57 }
 0xd19   :  { %4171 = vmatprep.subr.bf16.mxu0 %v6568_v25  ;;  %4212 = vmatprep.subr.bf16.mxu1 %v6571_v0 }
 0xd1c   :  { %4172 = vmatpush1.bf16.msra.mxu0 %v6574_v15  ;;  %4213 = vmatpush1.bf16.msra.mxu1 %v6577_v49 }
 0xd1d   :  { %4173 = vmatprep.subr.bf16.mxu0 %v6580_v38  ;;  %4214 = vmatprep.subr.bf16.mxu1 %v6583_v51 }
 0xd20   :  { %4174 = vmatpush1.bf16.msra.mxu0 %v6586_v60  ;;  %4215 = vmatpush1.bf16.msra.mxu1 %v6589_v13 }
 0xd21   :  { %4175 = vmatprep.subr.bf16.mxu0 %v6592_v34  ;;  %4216 = vmatprep.subr.bf16.mxu1 %v6595_v17 }
 0xd24   :  { %4176 = vmatpush1.bf16.msra.mxu0 %v6598_v54  ;;  %4217 = vmatpush1.bf16.msra.mxu1 %v6601_v42 }
 0xd25   :  { %4177 = vmatprep.subr.bf16.mxu0 %v6604_v48  ;;  %4218 = vmatprep.subr.bf16.mxu1 %v6607_v61 }
 0xd28   :  { %4178 = vmatpush1.bf16.msra.mxu0 %v6610_v47  ;;  %4219 = vmatpush1.bf16.msra.mxu1 %v6613_v5 }
 0xd29   :  { %4179 = vmatprep.subr.bf16.mxu0 %v6616_v63  ;;  %4220 = vmatprep.subr.bf16.mxu1 %v6619_v59 }
 0xd2c   :  { %4180 = vmatpush1.bf16.msra.mxu0 %v6622_v53  ;;  %4221 = vmatpush1.bf16.msra.mxu1 %v6625_v44 }
 0xd2d   :  { %4181 = vmatprep.subr.bf16.mxu0 %v6628_v6  ;;  %4222 = vmatprep.subr.bf16.mxu1 %v6631_v8 }
 0xd30   :  { %4182 = vmatpush1.bf16.msra.mxu0 %v6634_v10  ;;  %4223 = vmatpush1.bf16.msra.mxu1 %v6637_v11 }
 0xd31   :  { %4289 = vmatprep.subr.bf16.mxu0 %v6525_v3  ;;  %4330 = vmatprep.subr.bf16.mxu1 %v6528_v22 }
 0xdd3   :  { %v4079_v21 = vpop.f32.mrf.mxu0  ;;  %v4120_v23 = vpop.f32.mrf.mxu1 }
 0xdd4   :  { %v4127_v1 = vadd.f32 %v4079_v21, %v3120_v20  ;;  %v4129_v18 = vadd.f32 %v4120_v23, %v3193_v39  ;;  %v4159_v23 = vpop.permute.xlu1 %4158 }
 0xdd5   :  { %v4081_v27 = vpop.f32.mrf.mxu0  ;;  %v4122_v28 = vpop.f32.mrf.mxu1  ;;  %vm4160_vm14 = vcmp.eq.s32.totalorder %v4159_v23, 1 }
 0xdd6   :  { %v4806_v30 = vmul.f32 -1.442695, %v4127_v1  ;;  %v4128_v3 = vadd.f32 %v4081_v27, %v3122_v26  ;;  %v4130_v19 = vadd.f32 %v4122_v28, %v3195_v43  ;;  %v4281_v43 = vpop.permute.xlu0 %4280 }
 0xdd7   :  { %v4083_v31 = vpop.f32.mrf.mxu0  ;;  %v4124_v22 = vpop.f32.mrf.mxu1  ;;  %vm4282_vm0 = vcmp.eq.s32.totalorder %v4281_v43, 1 }
 0xdd8   :  { %5234 = vpow2.f32 %v4806_v30  ;;  %v4807_v7 = vmul.f32 -1.442695, %v4128_v3  ;;  %v4808_v2 = vmul.f32 -1.442695, %v4130_v19 }
 0xdd9   :  { %v4084_v45 = vpop.f32.mrf.mxu0  ;;  %v4125_v55 = vpop.f32.mrf.mxu1 }
 0xdda   :  { %5236 = vpow2.f32 %v4807_v7 }
 0xddb   :  { %5238 = vtanh.f32 %v4129_v18 }
 0xddc   :  { %5240 = vpow2.f32 %v4808_v2 }
 0xde5   :  { %v5235_v14 = vpop.eup %5234 }
 0xde6   :  { %v4134_v36 = vadd.f32 1.0, %v5235_v14  ;;  %v6816_v14 = vld [vmem:[#allocation34_spill] sm:$0xff] }
 0xde7   :  { %v5237_v12 = vpop.eup %5236 }
 0xde8   :  { %5242 = vrcp.f32 %v4134_v36  ;;  %v4140_v29 = vadd.f32 1.0, %v5237_v12  ;;  %v5239_v20 = vpop.eup %5238  ;;  %v3130_v36 = vadd.f32 %v6816_v14, %v6307_v50 }
 0xde9   :  { %v5241_v21 = vpop.eup %5240 }
 0xdea   :  { %5244 = vrcp.f32 %v4140_v29  ;;  %v4147_v27 = vadd.f32 1.0, %v5241_v21 }
 0xdec   :  { %5246 = vrcp.f32 %v4147_v27 }
 0xdf5   :  { %v5243_v32 = vpop.eup %5242 }
 0xdf6   :  { %v4151_v26 = vmul.f32 %v5243_v32, %v5239_v20  ;;  %v6817_v20 = vld [vmem:[#allocation35_spill] sm:$0xff] }
 0xdf7   :  { %v5245_v1 = vpop.eup %5244  ;;  %v3132_v21 = vadd.f32 %v6817_v20, %v6315_v62 }
 0xdf8   :  { %v4150_v28 = vmul.f32 %v5245_v1, %v6542_v16  ;;  %v4400_v16 = vsel %vm4399_vm15, 1, %v6751_v56 }
 0xdf9   :  { %v5247_v3 = vpop.eup %5246  ;;  %4402 = vperm.xlu1 %4823, %v4400_v16   ;;  %v6819_v16 = vld [vmem:[#allocation15_spill] sm:$0xff] }
 0xdfa   :  { %v6653_v30 = vadd.f32 %v4151_v26, %v4150_v28 }
 0xdfc   :  { %5248 = vtanh.f32 %v6653_v30 }
 0xe09   :  { %v5249_v31 = vpop.eup %5248 }
 0xe0a   :  { %v4154_v22 = vmul.f32 %v5249_v31, %v5247_v3 }
 0xe0c   :  { %v6657_v7 = vsel %vm4160_vm14, %v4154_v22, %v6546_v24  ;;  %v4166_v45 = vpack.c.bf16 %v4154_v22, %v4154_v22  ;;  %v6812_v24 = vld [vmem:[#allocation31_spill] sm:$0xff] }
 0xe0e   :  { %4200 = vmatmul.mubr.bf16.vlgmr.msra.gmra.mxu0 %v4166_v45  ;;  %4241 = vmatmul.mubr.bf16.vlgmr.msra.gmra.mxu1 %v4166_v45 }
 0xe0f   :  { %4290 = vmatpush1.bf16.msra.mxu0 %v6548_v46  ;;  %4331 = vmatpush1.bf16.msra.mxu1 %v6551_v9  ;;  %v3126_v46 = vadd.f32 %v6812_v24, %v6307_v50  ;;  %v3203_v24 = vadd.f32 %v6819_v16, %v6330_v40 }
 0xe10   :  { %4291 = vmatprep.subr.bf16.mxu0 %v6554_v41  ;;  %4332 = vmatprep.subr.bf16.mxu1 %v6557_v4  ;;  %v6813_v4 = vld [vmem:[#allocation30_spill] sm:$0xff] }
 0xe11   :  { %4321 = vmatprep.mubr.bf16.mxu0 %v6751_v56  ;;  %4362 = vmatprep.mubr.bf16.mxu1 %v6751_v56 }
 0xe13   :  { %4292 = vmatpush1.bf16.msra.mxu0 %v6562_v37  ;;  %4333 = vmatpush1.bf16.msra.mxu1 %v6565_v57  ;;  %v3128_v37 = vadd.f32 %v6813_v4, %v6315_v62 }
 0xe14   :  { %4293 = vmatprep.subr.bf16.mxu0 %v6568_v25  ;;  %4334 = vmatprep.subr.bf16.mxu1 %v6571_v0 }
 0xe17   :  { %4294 = vmatpush1.bf16.msra.mxu0 %v6574_v15  ;;  %4335 = vmatpush1.bf16.msra.mxu1 %v6577_v49 }
 0xe18   :  { %4295 = vmatprep.subr.bf16.mxu0 %v6580_v38  ;;  %4336 = vmatprep.subr.bf16.mxu1 %v6583_v51 }
 0xe1b   :  { %4296 = vmatpush1.bf16.msra.mxu0 %v6586_v60  ;;  %4337 = vmatpush1.bf16.msra.mxu1 %v6589_v13  ;;  %v6814_v13 = vld [vmem:[#allocation33_spill] sm:$0xff] }
 0xe1c   :  { %4297 = vmatprep.subr.bf16.mxu0 %v6592_v34  ;;  %4338 = vmatprep.subr.bf16.mxu1 %v6595_v17  ;;  %v3201_v34 = vadd.f32 %v6814_v13, %v6325_v52 }
 0xe1f   :  { %4298 = vmatpush1.bf16.msra.mxu0 %v6598_v54  ;;  %4339 = vmatpush1.bf16.msra.mxu1 %v6601_v42  ;;  %v6815_v54 = vld [vmem:[#allocation32_spill] sm:$0xff] }
 0xe20   :  { %4299 = vmatprep.subr.bf16.mxu0 %v6604_v48  ;;  %4340 = vmatprep.subr.bf16.mxu1 %v6607_v61  ;;  %v3199_v42 = vadd.f32 %v6815_v54, %v6330_v40 }
 0xe23   :  { %4300 = vmatpush1.bf16.msra.mxu0 %v6610_v47  ;;  %4341 = vmatpush1.bf16.msra.mxu1 %v6613_v5 }
 0xe24   :  { %4301 = vmatprep.subr.bf16.mxu0 %v6616_v63  ;;  %4342 = vmatprep.subr.bf16.mxu1 %v6619_v59 }
 0xe27   :  { %4302 = vmatpush1.bf16.msra.mxu0 %v6622_v53  ;;  %4343 = vmatpush1.bf16.msra.mxu1 %v6625_v44 }
 0xe28   :  { %4303 = vmatprep.subr.bf16.mxu0 %v6628_v6  ;;  %4344 = vmatprep.subr.bf16.mxu1 %v6631_v8 }
 0xe2b   :  { %4304 = vmatpush1.bf16.msra.mxu0 %v6634_v10  ;;  %4345 = vmatpush1.bf16.msra.mxu1 %v6637_v11 }
 0xece   :  { %v4201_v9 = vpop.f32.mrf.mxu0  ;;  %v4242_v41 = vpop.f32.mrf.mxu1 }
 0xecf   :  { %v4249_v57 = vadd.f32 %v4201_v9, %v3126_v46  ;;  %v4251_v48 = vadd.f32 %v4242_v41, %v3199_v42 }
 0xed0   :  { %v4203_v25 = vpop.f32.mrf.mxu0  ;;  %v4244_v0 = vpop.f32.mrf.mxu1 }
 0xed1   :  { %v4809_v15 = vmul.f32 -1.442695, %v4249_v57  ;;  %v4250_v49 = vadd.f32 %v4203_v25, %v3128_v37  ;;  %v4252_v17 = vadd.f32 %v4244_v0, %v3201_v34 }
 0xed2   :  { %v4205_v38 = vpop.f32.mrf.mxu0  ;;  %v4246_v51 = vpop.f32.mrf.mxu1 }
 0xed3   :  { %5250 = vpow2.f32 %v4809_v15  ;;  %v4810_v35 = vmul.f32 -1.442695, %v4250_v49  ;;  %v4811_v61 = vmul.f32 -1.442695, %v4252_v17 }
 0xed4   :  { %v4206_v60 = vpop.f32.mrf.mxu0  ;;  %v4247_v56 = vpop.f32.mrf.mxu1 }
 0xed5   :  { %5252 = vpow2.f32 %v4810_v35  ;;  %v4403_v35 = vpop.permute.xlu1 %4402 }
 0xed6   :  { %5254 = vtanh.f32 %v4251_v48  ;;  %vm4404_vm1 = vcmp.eq.s32.totalorder %v4403_v35, 1 }
 0xed7   :  { %5256 = vpow2.f32 %v4811_v61 }
 0xee0   :  { %v5251_v47 = vpop.eup %5250 }
 0xee1   :  { %v4256_v5 = vadd.f32 1.0, %v5251_v47 }
 0xee2   :  { %v5253_v63 = vpop.eup %5252 }
 0xee3   :  { %5258 = vrcp.f32 %v4256_v5  ;;  %v4262_v59 = vadd.f32 1.0, %v5253_v63  ;;  %v5255_v53 = vpop.eup %5254 }
 0xee4   :  { %v5257_v44 = vpop.eup %5256 }
 0xee5   :  { %5260 = vrcp.f32 %v4262_v59  ;;  %v4269_v11 = vadd.f32 1.0, %v5257_v44 }
 0xee7   :  { %5262 = vrcp.f32 %v4269_v11 }
 0xef0   :  { %v5259_v6 = vpop.eup %5258 }
 0xef1   :  { %v4273_v8 = vmul.f32 %v5259_v6, %v5255_v53 }
 0xef2   :  { %v5261_v10 = vpop.eup %5260 }
 0xef3   :  { %v4272_v55 = vmul.f32 %v5261_v10, %v6653_v30 }
 0xef4   :  { %v5263_v19 = vpop.eup %5262 }
 0xef5   :  { %v4274_v58 = vadd.f32 %v4273_v8, %v4272_v55 }
 0xef7   :  { %5264 = vtanh.f32 %v4274_v58 }
 0xf04   :  { %v5265_v33 = vpop.eup %5264 }
 0xf05   :  { %v4276_v39 = vmul.f32 %v5265_v33, %v5263_v19 }
 0xf07   :  { %v4283_v18 = vsel %vm4282_vm0, %v4276_v39, %v6657_v7  ;;  %v4288_v2 = vpack.c.bf16 %v4276_v39, %v4276_v39  ;;  %v6818_v7 = vld [vmem:[#allocation36_spill] sm:$0xff] }
 0xf08   :  { %v3205_v50 = vadd.f32 %v6818_v7, %v6325_v52 }
 0xf09   :  { %4322 = vmatmul.mubr.bf16.vlgmr.msra.gmra.mxu0 %v4288_v2  ;;  %4363 = vmatmul.mubr.bf16.vlgmr.msra.gmra.mxu1 %v4288_v2 }
 0xfc9   :  { %v4323_v12 = vpop.f32.mrf.mxu0  ;;  %v4364_v29 = vpop.f32.mrf.mxu1 }
 0xfca   :  { %v4371_v32 = vadd.f32 %v4323_v12, %v3130_v36  ;;  %v4373_v62 = vadd.f32 %v4364_v29, %v3203_v24 }
 0xfcb   :  { %v4325_v26 = vpop.f32.mrf.mxu0  ;;  %v4366_v1 = vpop.f32.mrf.mxu1 }
 0xfcc   :  { %v4812_v27 = vmul.f32 -1.442695, %v4371_v32  ;;  %v4372_v28 = vadd.f32 %v4325_v26, %v3132_v21  ;;  %v4374_v45 = vadd.f32 %v4366_v1, %v3205_v50 }
 0xfcd   :  { %v4327_v30 = vpop.f32.mrf.mxu0  ;;  %v4368_v23 = vpop.f32.mrf.mxu1 }
 0xfce   :  { %5266 = vpow2.f32 %v4812_v27  ;;  %v4813_v3 = vmul.f32 -1.442695, %v4372_v28  ;;  %v4814_v46 = vmul.f32 -1.442695, %v4374_v45 }
 0xfcf   :  { %v4328_v31 = vpop.f32.mrf.mxu0  ;;  %v4369_v22 = vpop.f32.mrf.mxu1 }
 0xfd0   :  { %5268 = vpow2.f32 %v4813_v3 }
 0xfd1   :  { %5270 = vtanh.f32 %v4373_v62 }
 0xfd2   :  { %5272 = vpow2.f32 %v4814_v46 }
 0xfdb   :  { %v5267_v9 = vpop.eup %5266 }
 0xfdc   :  { %v4378_v41 = vadd.f32 1.0, %v5267_v9 }
 0xfdd   :  { %v5269_v4 = vpop.eup %5268 }
 0xfde   :  { %5274 = vrcp.f32 %v4378_v41  ;;  %v4384_v37 = vadd.f32 1.0, %v5269_v4  ;;  %v5271_v57 = vpop.eup %5270 }
 0xfdf   :  { %v5273_v25 = vpop.eup %5272 }
 0xfe0   :  { %5276 = vrcp.f32 %v4384_v37  ;;  %v4391_v52 = vadd.f32 1.0, %v5273_v25 }
 0xfe2   :  { %5278 = vrcp.f32 %v4391_v52 }
 0xfeb   :  { %v5275_v0 = vpop.eup %5274 }
 0xfec   :  { %v4395_v15 = vmul.f32 %v5275_v0, %v5271_v57 }
 0xfed   :  { %v5277_v49 = vpop.eup %5276 }
 0xfee   :  { %v4394_v38 = vmul.f32 %v5277_v49, %v4274_v58 }
 0xfef   :  { %v5279_v40 = vpop.eup %5278 }
 0xff0   :  { %v4396_v51 = vadd.f32 %v4395_v15, %v4394_v38 }
 0xff2   :  { %5280 = vtanh.f32 %v4396_v51 }
 0xfff   :  { %v5281_v60 = vpop.eup %5280 }
0x1000   :  { %v4398_v56 = vmul.f32 %v5281_v60, %v5279_v40 }
0x1002   :  { %v4405_v13 = vsel %vm4404_vm1, %v4398_v56, %v4283_v18 }
0x1003   :  { %4406 = vst [vmem:[#allocation11] sm:$0xff] %v4405_v13 }
0x1004   :  { %5385 = shalt.err (!%p5382_p5)
}
0x1005   :  { %4416 = dma.vmem_to_hbm [thread:$0]  %s4414_s15, 128, %s6722_s8, [#allocation7]  }
0x1006   :  { %5398 = dma.done.wait [#allocation7], 128  }
0x1007   :  { %5399 = vsyncadd [#allocation7], 4294967168 }
0x1008   :  { %4420 = vsyncpa [#allocation6], 1 }
0x1009   :  { %4421 = vsyncpa [#allocation9], 1 }
0x100a   :  { %4422 = vsyncpa [#allocation7], 1 }

</bundles_post_ra>
